<compile_context>
chip_gen: v7x
topology: tpu7x:2x2x1
jax: 0.10.0
libtpu: 0.0.40
codegen_flags: <defaults>
</compile_context>

<pallas_src>
import math
import numpy as np
import jax
import jax.numpy as jnp
from jax import lax
from jax.experimental import pallas as pl
from jax.experimental.pallas import tpu as pltpu

LANE = 128


def _round_up(x, m):
    return ((x + m - 1) // m) * m


# --------------------------- fused GRU + FC kernel ---------------------------

def _make_fused_kernel(num_layers, T, B, Hp):
    """Kernel refs layout:
       inputs : x_flat(T*B, D),
                [w_ih(in_p, 3*Hp), w_hh(Hp, 3*Hp), bias_i(1, 3*Hp), bias_hn(1, Hp)] * L,
                w_fc(Hp, O), b_fc(1, O)
       outputs: o(B, O)
       scratch: gi_buf(T*B, 3*Hp) f32, hseq_buf(T*B, Hp) f32
       Row ordering of x_flat / gi_buf / hseq_buf is time-major: row = t*B + b.
    """

    def kernel(*refs):
        n_in = 1 + 4 * num_layers + 2
        x_ref = refs[0]
        w_fc_ref = refs[1 + 4 * num_layers]
        b_fc_ref = refs[2 + 4 * num_layers]
        o_ref = refs[n_in]
        gi_buf = refs[n_in + 1]
        hseq_buf = refs[n_in + 2]

        h_last = None
        for l in range(num_layers):
            w_ih_ref, w_hh_ref, bi_ref, bhn_ref = refs[1 + 4 * l: 1 + 4 * (l + 1)]
            cd = w_ih_ref.dtype                       # matmul operand dtype (f32 or bf16)
            layer_in = x_ref[...] if l == 0 else hseq_buf[...]

            # (1) Hoisted input projection: one batched MXU matmul over all T*B
            #     rows. r/z hidden biases are pre-folded into bias_i; the n-gate
            #     keeps only its input bias here (PyTorch n-gate form).
            gi_buf[...] = (
                jnp.dot(layer_in.astype(cd), w_ih_ref[...],
                        preferred_element_type=jnp.float32)
                + bi_ref[...])

            # Weights / biases resident for the whole time loop (hoisted).
            w_hh = w_hh_ref[...]
            bhn = jnp.broadcast_to(bhn_ref[...], (B, Hp))
            store_seq = (l + 1) < num_layers          # last layer only needs h_T

            def step(t, h, w_hh=w_hh, bhn=bhn, cd=cd, store_seq=store_seq):
                row = t * B
                gi = gi_buf[pl.ds(row, B), :]                       # (B, 3*Hp)
                gh = jnp.dot(h.astype(cd), w_hh,
                             preferred_element_type=jnp.float32)    # (B, 3*Hp)
                # Gate slices are 128-lane aligned (Hp multiple of 128).
                r = jax.nn.sigmoid(gi[:, 0:Hp] + gh[:, 0:Hp])
                z = jax.nn.sigmoid(gi[:, Hp:2 * Hp] + gh[:, Hp:2 * Hp])
                n = jnp.tanh(gi[:, 2 * Hp:3 * Hp] + r * (gh[:, 2 * Hp:3 * Hp] + bhn))
                h_new = n + z * (h - n)               # == (1 - z) * n + z * h
                if store_seq:
                    hseq_buf[pl.ds(row, B), :] = h_new
                return h_new

            h_last = lax.fori_loop(0, T, step,
                                   jnp.zeros((B, Hp), jnp.float32),
                                   unroll=True)

        # Final FC on the last layer's last-timestep hidden state (fused, free of
        # an extra kernel launch / HBM round trip).
        o_ref[...] = (jnp.dot(h_last.astype(w_fc_ref.dtype), w_fc_ref[...],
                              preferred_element_type=jnp.float32)
                      + b_fc_ref[...]).astype(o_ref.dtype)

    return kernel


# --------------------------- parameter preparation ---------------------------

def init_gru_model_params(key, input_dim, hidden_dim, layer_dim, output_dim):
    """PyTorch-style uniform(-1/sqrt(H), 1/sqrt(H)) init. Gate order (r, z, n)."""
    params = {"layers": []}
    bound = 1.0 / math.sqrt(hidden_dim)
    for layer in range(layer_dim):
        in_dim = input_dim if layer == 0 else hidden_dim
        key, k1, k2, k3, k4 = jax.random.split(key, 5)
        params["layers"].append({
            # stored transposed: (in_dim, 3H) / (H, 3H)
            "w_ih_t": jax.random.uniform(k1, (in_dim, 3 * hidden_dim),
                                         jnp.float32, -bound, bound),
            "w_hh_t": jax.random.uniform(k2, (hidden_dim, 3 * hidden_dim),
                                         jnp.float32, -bound, bound),
            "b_ih": jax.random.uniform(k3, (1, 3 * hidden_dim), jnp.float32, -bound, bound),
            "b_hh": jax.random.uniform(k4, (1, 3 * hidden_dim), jnp.float32, -bound, bound),
        })
    key, k5, k6 = jax.random.split(key, 3)
    params["w_fc_t"] = jax.random.uniform(k5, (hidden_dim, output_dim),
                                          jnp.float32, -bound, bound)
    params["b_fc"] = jax.random.uniform(k6, (1, output_dim), jnp.float32, -bound, bound)
    return params


def prepare_gru_params(params, input_dim, hidden_dim, output_dim,
                       matmul_dtype=jnp.float32):
    """Pad gates to 128-lane boundaries, fold r/z hidden biases into the input
    bias, and (optionally) cast matmul operands to bf16 (v6e/v7x fast path)."""
    H = hidden_dim
    Hp = _round_up(H, LANE)
    layers = []
    for l, p in enumerate(params["layers"]):
        in_dim = input_dim if l == 0 else H
        in_dim_p = input_dim if l == 0 else Hp
        w_ih_p = jnp.zeros((in_dim_p, 3 * Hp), jnp.float32)
        w_hh_p = jnp.zeros((Hp, 3 * Hp), jnp.float32)
        bias_i = jnp.zeros((1, 3 * Hp), jnp.float32)
        for g in range(3):
            w_ih_p = w_ih_p.at[:in_dim, g * Hp:g * Hp + H].set(
                p["w_ih_t"][:, g * H:(g + 1) * H])
            w_hh_p = w_hh_p.at[:H, g * Hp:g * Hp + H].set(
                p["w_hh_t"][:, g * H:(g + 1) * H])
            b = p["b_ih"][:, g * H:(g + 1) * H]
            if g < 2:   # fold b_hh into the precomputed bias for r and z gates
                b = b + p["b_hh"][:, g * H:(g + 1) * H]
            bias_i = bias_i.at[:, g * Hp:g * Hp + H].set(b)
        bias_hn = jnp.zeros((1, Hp), jnp.float32).at[:, :H].set(
            p["b_hh"][:, 2 * H:3 * H])
        layers.append({
            "w_ih": w_ih_p.astype(matmul_dtype),
            "w_hh": w_hh_p.astype(matmul_dtype),
            "bias_i": bias_i,        # kept f32 (added to the f32 accumulator)
            "bias_hn": bias_hn,      # kept f32 (f32 gate math on all chips)
        })
    w_fc = jnp.zeros((Hp, output_dim), jnp.float32).at[:H, :].set(
        params["w_fc_t"]).astype(matmul_dtype)
    return {"layers": layers, "w_fc": w_fc, "b_fc": params["b_fc"], "Hp": Hp}


# ------------------------------ model forward ---------------------------------

def gru_model_forward(prepared, x_btd):
    """x_btd: (B, T, D) batch_first. Returns (B, output_dim) = fc(out[:, -1, :])."""
    B, T, D = x_btd.shape
    Hp = prepared["Hp"]
    layers = prepared["layers"]
    L = len(layers)
    O = prepared["w_fc"].shape[1]

    # Tiny one-off XLA transpose+reshape of the raw input to time-major flat
    # layout (row = t*B + b); all intermediates stay in VMEM inside the kernel.
    x_flat = jnp.transpose(x_btd, (1, 0, 2)).reshape(T * B, D).astype(jnp.float32)

    inputs = [x_flat]
    in_specs = [pl.BlockSpec(x_flat.shape, lambda: (0, 0))]
    for lp in layers:
        for name in ("w_ih", "w_hh", "bias_i", "bias_hn"):
            a = lp[name]
            inputs.append(a)
            in_specs.append(pl.BlockSpec(a.shape, lambda: (0, 0)))
    inputs += [prepared["w_fc"], prepared["b_fc"]]
    in_specs += [pl.BlockSpec(prepared["w_fc"].shape, lambda: (0, 0)),
                 pl.BlockSpec(prepared["b_fc"].shape, lambda: (0, 0))]

    # NOTE(v7x): at this scale total VMEM use is < 1 MiB; if H is ever scaled up,
    # budget the (Hp, 3*Hp) weights against 64 MiB VMEM (bf16 weights / tiling)
    # and set pltpu.CompilerParams(vmem_limit_bytes=...) explicitly.
    return pl.pallas_call(
        _make_fused_kernel(L, T, B, Hp),
        out_shape=jax.ShapeDtypeStruct((B, O), jnp.float32),
        in_specs=in_specs,
        out_specs=pl.BlockSpec((B, O), lambda: (0, 0)),
        scratch_shapes=[
            pltpu.VMEM((T * B, 3 * Hp), jnp.float32),   # precomputed input gates
            pltpu.VMEM((T * B, Hp), jnp.float32),       # inter-layer hidden seq
        ],
    )(*inputs)


# ------------------------------ pure-JAX reference ----------------------------

def gru_model_reference(params, x_btd):
    x_tbd = jnp.transpose(x_btd, (1, 0, 2)).astype(jnp.float32)
    T, B, _ = x_tbd.shape
    h_seq = x_tbd
    for layer_p in params["layers"]:
        H = layer_p["w_hh_t"].shape[0]

        def step(h, x_t, p=layer_p, H=H):
            gi = x_t @ p["w_ih_t"] + p["b_ih"]
            gh = h @ p["w_hh_t"] + p["b_hh"]
            r = jax.nn.sigmoid(gi[:, :H] + gh[:, :H])
            z = jax.nn.sigmoid(gi[:, H:2 * H] + gh[:, H:2 * H])
            n = jnp.tanh(gi[:, 2 * H:] + r * gh[:, 2 * H:])
            h_new = (1.0 - z) * n + z * h
            return h_new, h_new

        h0 = jnp.zeros((B, H), jnp.float32)
        _, h_seq = lax.scan(step, h0, h_seq)
    return h_seq[-1] @ params["w_fc_t"] + params["b_fc"]


# ----------------------------------- main --------------------------------------

if __name__ == "__main__":
    input_dim, hidden_dim, layer_dim, output_dim = 16, 32, 2, 4
    batch, seq = 2, 8

    key = jax.random.PRNGKey(0)
    key, pkey, xkey = jax.random.split(key, 3)

    params = init_gru_model_params(pkey, input_dim, hidden_dim, layer_dim, output_dim)
    x = jax.random.normal(xkey, (batch, seq, input_dim), jnp.float32)  # (B, T, D)

    ref = jax.block_until_ready(gru_model_reference(params, x))

    # f32 matmul-operand path (exact nn.GRU eval semantics).
    prep_f32 = prepare_gru_params(params, input_dim, hidden_dim, output_dim,
                                  matmul_dtype=jnp.float32)
    out = jax.block_until_ready(gru_model_forward(prep_f32, x))
    assert out.shape == (batch, output_dim)
    np.testing.assert_allclose(np.asarray(out), np.asarray(ref), rtol=2e-3, atol=2e-3)

    # bf16 matmul-operand path (v6e/v7x MXU fast path; f32 state/accumulation),
    # checked with a correspondingly loose tolerance.
    prep_bf16 = prepare_gru_params(params, input_dim, hidden_dim, output_dim,
                                   matmul_dtype=jnp.bfloat16)
    out_bf16 = jax.block_until_ready(gru_model_forward(prep_bf16, x))
    np.testing.assert_allclose(np.asarray(out_bf16), np.asarray(ref), rtol=1e-1, atol=1e-1)

    print("KERNEL_OK")
</pallas_src>

<mosaic_0001>
module attributes {stable_mosaic.version = 11 : i64} {
  func.func @kernel(%arg0: memref<16x16xf32, #tpu.memory_space<vmem>>, %arg1: memref<16x384xf32, #tpu.memory_space<vmem>>, %arg2: memref<128x384xf32, #tpu.memory_space<vmem>>, %arg3: memref<1x384xf32, #tpu.memory_space<vmem>>, %arg4: memref<1x128xf32, #tpu.memory_space<vmem>>, %arg5: memref<128x384xf32, #tpu.memory_space<vmem>>, %arg6: memref<128x384xf32, #tpu.memory_space<vmem>>, %arg7: memref<1x384xf32, #tpu.memory_space<vmem>>, %arg8: memref<1x128xf32, #tpu.memory_space<vmem>>, %arg9: memref<128x4xf32, #tpu.memory_space<vmem>>, %arg10: memref<1x4xf32, #tpu.memory_space<vmem>>, %arg11: memref<2x4xf32, #tpu.memory_space<vmem>>, %arg12: memref<16x384xf32, #tpu.memory_space<vmem>>, %arg13: memref<16x128xf32, #tpu.memory_space<vmem>>) attributes {dimension_semantics = [], scalar_prefetch = 0 : i64, scratch_operands = 2 : i64, tpu.core_type = #tpu.core_type<tc>} {
    %c0 = arith.constant 0 : index
    %c0_0 = arith.constant 0 : index
    %0 = vector.load %arg0[%c0, %c0_0] : memref<16x16xf32, #tpu.memory_space<vmem>>, vector<16x16xf32>
    %c0_1 = arith.constant 0 : index
    %c0_2 = arith.constant 0 : index
    %1 = vector.load %arg1[%c0_1, %c0_2] : memref<16x384xf32, #tpu.memory_space<vmem>>, vector<16x384xf32>
    %cst = arith.constant dense<0.000000e+00> : vector<16x384xf32>
    %2 = tpu.matmul %0, %1, %cst {dimension_numbers = #tpu.dot_dimension_numbers<[1], [0], [0], [1], [0, 0, 1, 1], [], []>} : vector<16x16xf32>, vector<16x384xf32>, vector<16x384xf32> -> vector<16x384xf32>
    %c0_3 = arith.constant 0 : index
    %c0_4 = arith.constant 0 : index
    %3 = vector.load %arg3[%c0_3, %c0_4] : memref<1x384xf32, #tpu.memory_space<vmem>>, vector<1x384xf32>
    %4 = vector.broadcast %3 : vector<1x384xf32> to vector<16x384xf32>
    %5 = arith.addf %2, %4 : vector<16x384xf32>
    %c0_5 = arith.constant 0 : index
    %c0_6 = arith.constant 0 : index
    %6 = vector.load %arg12[%c0_5, %c0_6] : memref<16x384xf32, #tpu.memory_space<vmem>>, vector<16x384xf32>
    tpu.vector_store %arg12[%c0_5, %c0_6], %5 {strides = array<i32>} : memref<16x384xf32, #tpu.memory_space<vmem>>, vector<16x384xf32>,
    %c0_7 = arith.constant 0 : index
    %c0_8 = arith.constant 0 : index
    %7 = vector.load %arg2[%c0_7, %c0_8] : memref<128x384xf32, #tpu.memory_space<vmem>>, vector<128x384xf32>
    %c0_9 = arith.constant 0 : index
    %c0_10 = arith.constant 0 : index
    %8 = vector.load %arg4[%c0_9, %c0_10] : memref<1x128xf32, #tpu.memory_space<vmem>>, vector<1x128xf32>
    %9 = vector.shape_cast %8 : vector<1x128xf32> to vector<1x128xf32>
    %10 = vector.broadcast %9 : vector<1x128xf32> to vector<2x128xf32>
    %cst_11 = arith.constant 0.000000e+00 : f32
    %11 = vector.broadcast %cst_11 : f32 to vector<2x128xf32>
    %c0_i32 = arith.constant 0 : i32
    %c2_i32 = arith.constant 2 : i32
    %12 = arith.muli %c0_i32, %c2_i32 : i32
    %13 = arith.index_cast %12 : i32 to index
    %c0_12 = arith.constant 0 : index
    %14 = vector.load %arg12[%13, %c0_12] : memref<16x384xf32, #tpu.memory_space<vmem>>, vector<2x384xf32>
    %cst_13 = arith.constant dense<0.000000e+00> : vector<2x384xf32>
    %15 = tpu.matmul %11, %7, %cst_13 {dimension_numbers = #tpu.dot_dimension_numbers<[1], [0], [0], [1], [0, 0, 1, 1], [], []>} : vector<2x128xf32>, vector<128x384xf32>, vector<2x384xf32> -> vector<2x384xf32>
    %16 = vector.extract_strided_slice %14 {offsets = [0, 0], sizes = [2, 128], strides = [1, 1]} : vector<2x384xf32> to vector<2x128xf32>
    %17 = vector.extract_strided_slice %15 {offsets = [0, 0], sizes = [2, 128], strides = [1, 1]} : vector<2x384xf32> to vector<2x128xf32>
    %18 = arith.addf %16, %17 : vector<2x128xf32>
    %19 = arith.negf %18 : vector<2x128xf32>
    %20 = math.exp %19 : vector<2x128xf32>
    %cst_14 = arith.constant 1.000000e+00 : f32
    %21 = vector.broadcast %cst_14 : f32 to vector<2x128xf32>
    %22 = arith.addf %21, %20 : vector<2x128xf32>
    %23 = arith.divf %21, %22 : vector<2x128xf32>
    %24 = vector.extract_strided_slice %14 {offsets = [0, 128], sizes = [2, 128], strides = [1, 1]} : vector<2x384xf32> to vector<2x128xf32>
    %25 = vector.extract_strided_slice %15 {offsets = [0, 128], sizes = [2, 128], strides = [1, 1]} : vector<2x384xf32> to vector<2x128xf32>
    %26 = arith.addf %24, %25 : vector<2x128xf32>
    %27 = arith.negf %26 : vector<2x128xf32>
    %28 = math.exp %27 : vector<2x128xf32>
    %cst_15 = arith.constant 1.000000e+00 : f32
    %29 = vector.broadcast %cst_15 : f32 to vector<2x128xf32>
    %30 = arith.addf %29, %28 : vector<2x128xf32>
    %31 = arith.divf %29, %30 : vector<2x128xf32>
    %32 = vector.extract_strided_slice %14 {offsets = [0, 256], sizes = [2, 128], strides = [1, 1]} : vector<2x384xf32> to vector<2x128xf32>
    %33 = vector.extract_strided_slice %15 {offsets = [0, 256], sizes = [2, 128], strides = [1, 1]} : vector<2x384xf32> to vector<2x128xf32>
    %34 = arith.addf %33, %10 : vector<2x128xf32>
    %35 = arith.mulf %23, %34 : vector<2x128xf32>
    %36 = arith.addf %32, %35 : vector<2x128xf32>
    %37 = math.tanh %36 : vector<2x128xf32>
    %38 = arith.subf %11, %37 : vector<2x128xf32>
    %39 = arith.mulf %31, %38 : vector<2x128xf32>
    %40 = arith.addf %37, %39 : vector<2x128xf32>
    %41 = arith.index_cast %12 : i32 to index
    %c0_16 = arith.constant 0 : index
    %42 = vector.load %arg13[%41, %c0_16] : memref<16x128xf32, #tpu.memory_space<vmem>>, vector<2x128xf32>
    tpu.vector_store %arg13[%41, %c0_16], %40 {strides = array<i32>} : memref<16x128xf32, #tpu.memory_space<vmem>>, vector<2x128xf32>,
    %c1_i32 = arith.constant 1 : i32
    %c2_i32_17 = arith.constant 2 : i32
    %43 = arith.muli %c1_i32, %c2_i32_17 : i32
    %44 = arith.index_cast %43 : i32 to index
    %c0_18 = arith.constant 0 : index
    %45 = vector.load %arg12[%44, %c0_18] : memref<16x384xf32, #tpu.memory_space<vmem>>, vector<2x384xf32>
    %cst_19 = arith.constant dense<0.000000e+00> : vector<2x384xf32>
    %46 = tpu.matmul %40, %7, %cst_19 {dimension_numbers = #tpu.dot_dimension_numbers<[1], [0], [0], [1], [0, 0, 1, 1], [], []>} : vector<2x128xf32>, vector<128x384xf32>, vector<2x384xf32> -> vector<2x384xf32>
    %47 = vector.extract_strided_slice %45 {offsets = [0, 0], sizes = [2, 128], strides = [1, 1]} : vector<2x384xf32> to vector<2x128xf32>
    %48 = vector.extract_strided_slice %46 {offsets = [0, 0], sizes = [2, 128], strides = [1, 1]} : vector<2x384xf32> to vector<2x128xf32>
    %49 = arith.addf %47, %48 : vector<2x128xf32>
    %50 = arith.negf %49 : vector<2x128xf32>
    %51 = math.exp %50 : vector<2x128xf32>
    %cst_20 = arith.constant 1.000000e+00 : f32
    %52 = vector.broadcast %cst_20 : f32 to vector<2x128xf32>
    %53 = arith.addf %52, %51 : vector<2x128xf32>
    %54 = arith.divf %52, %53 : vector<2x128xf32>
    %55 = vector.extract_strided_slice %45 {offsets = [0, 128], sizes = [2, 128], strides = [1, 1]} : vector<2x384xf32> to vector<2x128xf32>
    %56 = vector.extract_strided_slice %46 {offsets = [0, 128], sizes = [2, 128], strides = [1, 1]} : vector<2x384xf32> to vector<2x128xf32>
    %57 = arith.addf %55, %56 : vector<2x128xf32>
    %58 = arith.negf %57 : vector<2x128xf32>
    %59 = math.exp %58 : vector<2x128xf32>
    %cst_21 = arith.constant 1.000000e+00 : f32
    %60 = vector.broadcast %cst_21 : f32 to vector<2x128xf32>
    %61 = arith.addf %60, %59 : vector<2x128xf32>
    %62 = arith.divf %60, %61 : vector<2x128xf32>
    %63 = vector.extract_strided_slice %45 {offsets = [0, 256], sizes = [2, 128], strides = [1, 1]} : vector<2x384xf32> to vector<2x128xf32>
    %64 = vector.extract_strided_slice %46 {offsets = [0, 256], sizes = [2, 128], strides = [1, 1]} : vector<2x384xf32> to vector<2x128xf32>
    %65 = arith.addf %64, %10 : vector<2x128xf32>
    %66 = arith.mulf %54, %65 : vector<2x128xf32>
    %67 = arith.addf %63, %66 : vector<2x128xf32>
    %68 = math.tanh %67 : vector<2x128xf32>
    %69 = arith.subf %40, %68 : vector<2x128xf32>
    %70 = arith.mulf %62, %69 : vector<2x128xf32>
    %71 = arith.addf %68, %70 : vector<2x128xf32>
    %72 = arith.index_cast %43 : i32 to index
    %c0_22 = arith.constant 0 : index
    %73 = vector.load %arg13[%72, %c0_22] : memref<16x128xf32, #tpu.memory_space<vmem>>, vector<2x128xf32>
    tpu.vector_store %arg13[%72, %c0_22], %71 {strides = array<i32>} : memref<16x128xf32, #tpu.memory_space<vmem>>, vector<2x128xf32>,
    %c2_i32_23 = arith.constant 2 : i32
    %c2_i32_24 = arith.constant 2 : i32
    %74 = arith.muli %c2_i32_23, %c2_i32_24 : i32
    %75 = arith.index_cast %74 : i32 to index
    %c0_25 = arith.constant 0 : index
    %76 = vector.load %arg12[%75, %c0_25] : memref<16x384xf32, #tpu.memory_space<vmem>>, vector<2x384xf32>
    %cst_26 = arith.constant dense<0.000000e+00> : vector<2x384xf32>
    %77 = tpu.matmul %71, %7, %cst_26 {dimension_numbers = #tpu.dot_dimension_numbers<[1], [0], [0], [1], [0, 0, 1, 1], [], []>} : vector<2x128xf32>, vector<128x384xf32>, vector<2x384xf32> -> vector<2x384xf32>
    %78 = vector.extract_strided_slice %76 {offsets = [0, 0], sizes = [2, 128], strides = [1, 1]} : vector<2x384xf32> to vector<2x128xf32>
    %79 = vector.extract_strided_slice %77 {offsets = [0, 0], sizes = [2, 128], strides = [1, 1]} : vector<2x384xf32> to vector<2x128xf32>
    %80 = arith.addf %78, %79 : vector<2x128xf32>
    %81 = arith.negf %80 : vector<2x128xf32>
    %82 = math.exp %81 : vector<2x128xf32>
    %cst_27 = arith.constant 1.000000e+00 : f32
    %83 = vector.broadcast %cst_27 : f32 to vector<2x128xf32>
    %84 = arith.addf %83, %82 : vector<2x128xf32>
    %85 = arith.divf %83, %84 : vector<2x128xf32>
    %86 = vector.extract_strided_slice %76 {offsets = [0, 128], sizes = [2, 128], strides = [1, 1]} : vector<2x384xf32> to vector<2x128xf32>
    %87 = vector.extract_strided_slice %77 {offsets = [0, 128], sizes = [2, 128], strides = [1, 1]} : vector<2x384xf32> to vector<2x128xf32>
    %88 = arith.addf %86, %87 : vector<2x128xf32>
    %89 = arith.negf %88 : vector<2x128xf32>
    %90 = math.exp %89 : vector<2x128xf32>
    %cst_28 = arith.constant 1.000000e+00 : f32
    %91 = vector.broadcast %cst_28 : f32 to vector<2x128xf32>
    %92 = arith.addf %91, %90 : vector<2x128xf32>
    %93 = arith.divf %91, %92 : vector<2x128xf32>
    %94 = vector.extract_strided_slice %76 {offsets = [0, 256], sizes = [2, 128], strides = [1, 1]} : vector<2x384xf32> to vector<2x128xf32>
    %95 = vector.extract_strided_slice %77 {offsets = [0, 256], sizes = [2, 128], strides = [1, 1]} : vector<2x384xf32> to vector<2x128xf32>
    %96 = arith.addf %95, %10 : vector<2x128xf32>
    %97 = arith.mulf %85, %96 : vector<2x128xf32>
    %98 = arith.addf %94, %97 : vector<2x128xf32>
    %99 = math.tanh %98 : vector<2x128xf32>
    %100 = arith.subf %71, %99 : vector<2x128xf32>
    %101 = arith.mulf %93, %100 : vector<2x128xf32>
    %102 = arith.addf %99, %101 : vector<2x128xf32>
    %103 = arith.index_cast %74 : i32 to index
    %c0_29 = arith.constant 0 : index
    %104 = vector.load %arg13[%103, %c0_29] : memref<16x128xf32, #tpu.memory_space<vmem>>, vector<2x128xf32>
    tpu.vector_store %arg13[%103, %c0_29], %102 {strides = array<i32>} : memref<16x128xf32, #tpu.memory_space<vmem>>, vector<2x128xf32>,
    %c3_i32 = arith.constant 3 : i32
    %c2_i32_30 = arith.constant 2 : i32
    %105 = arith.muli %c3_i32, %c2_i32_30 : i32
    %106 = arith.index_cast %105 : i32 to index
    %c0_31 = arith.constant 0 : index
    %107 = vector.load %arg12[%106, %c0_31] : memref<16x384xf32, #tpu.memory_space<vmem>>, vector<2x384xf32>
    %cst_32 = arith.constant dense<0.000000e+00> : vector<2x384xf32>
    %108 = tpu.matmul %102, %7, %cst_32 {dimension_numbers = #tpu.dot_dimension_numbers<[1], [0], [0], [1], [0, 0, 1, 1], [], []>} : vector<2x128xf32>, vector<128x384xf32>, vector<2x384xf32> -> vector<2x384xf32>
    %109 = vector.extract_strided_slice %107 {offsets = [0, 0], sizes = [2, 128], strides = [1, 1]} : vector<2x384xf32> to vector<2x128xf32>
    %110 = vector.extract_strided_slice %108 {offsets = [0, 0], sizes = [2, 128], strides = [1, 1]} : vector<2x384xf32> to vector<2x128xf32>
    %111 = arith.addf %109, %110 : vector<2x128xf32>
    %112 = arith.negf %111 : vector<2x128xf32>
    %113 = math.exp %112 : vector<2x128xf32>
    %cst_33 = arith.constant 1.000000e+00 : f32
    %114 = vector.broadcast %cst_33 : f32 to vector<2x128xf32>
    %115 = arith.addf %114, %113 : vector<2x128xf32>
    %116 = arith.divf %114, %115 : vector<2x128xf32>
    %117 = vector.extract_strided_slice %107 {offsets = [0, 128], sizes = [2, 128], strides = [1, 1]} : vector<2x384xf32> to vector<2x128xf32>
    %118 = vector.extract_strided_slice %108 {offsets = [0, 128], sizes = [2, 128], strides = [1, 1]} : vector<2x384xf32> to vector<2x128xf32>
    %119 = arith.addf %117, %118 : vector<2x128xf32>
    %120 = arith.negf %119 : vector<2x128xf32>
    %121 = math.exp %120 : vector<2x128xf32>
    %cst_34 = arith.constant 1.000000e+00 : f32
    %122 = vector.broadcast %cst_34 : f32 to vector<2x128xf32>
    %123 = arith.addf %122, %121 : vector<2x128xf32>
    %124 = arith.divf %122, %123 : vector<2x128xf32>
    %125 = vector.extract_strided_slice %107 {offsets = [0, 256], sizes = [2, 128], strides = [1, 1]} : vector<2x384xf32> to vector<2x128xf32>
    %126 = vector.extract_strided_slice %108 {offsets = [0, 256], sizes = [2, 128], strides = [1, 1]} : vector<2x384xf32> to vector<2x128xf32>
    %127 = arith.addf %126, %10 : vector<2x128xf32>
    %128 = arith.mulf %116, %127 : vector<2x128xf32>
    %129 = arith.addf %125, %128 : vector<2x128xf32>
    %130 = math.tanh %129 : vector<2x128xf32>
    %131 = arith.subf %102, %130 : vector<2x128xf32>
    %132 = arith.mulf %124, %131 : vector<2x128xf32>
    %133 = arith.addf %130, %132 : vector<2x128xf32>
    %134 = arith.index_cast %105 : i32 to index
    %c0_35 = arith.constant 0 : index
    %135 = vector.load %arg13[%134, %c0_35] : memref<16x128xf32, #tpu.memory_space<vmem>>, vector<2x128xf32>
    tpu.vector_store %arg13[%134, %c0_35], %133 {strides = array<i32>} : memref<16x128xf32, #tpu.memory_space<vmem>>, vector<2x128xf32>,
    %c4_i32 = arith.constant 4 : i32
    %c2_i32_36 = arith.constant 2 : i32
    %136 = arith.muli %c4_i32, %c2_i32_36 : i32
    %137 = arith.index_cast %136 : i32 to index
    %c0_37 = arith.constant 0 : index
    %138 = vector.load %arg12[%137, %c0_37] : memref<16x384xf32, #tpu.memory_space<vmem>>, vector<2x384xf32>
    %cst_38 = arith.constant dense<0.000000e+00> : vector<2x384xf32>
    %139 = tpu.matmul %133, %7, %cst_38 {dimension_numbers = #tpu.dot_dimension_numbers<[1], [0], [0], [1], [0, 0, 1, 1], [], []>} : vector<2x128xf32>, vector<128x384xf32>, vector<2x384xf32> -> vector<2x384xf32>
    %140 = vector.extract_strided_slice %138 {offsets = [0, 0], sizes = [2, 128], strides = [1, 1]} : vector<2x384xf32> to vector<2x128xf32>
    %141 = vector.extract_strided_slice %139 {offsets = [0, 0], sizes = [2, 128], strides = [1, 1]} : vector<2x384xf32> to vector<2x128xf32>
    %142 = arith.addf %140, %141 : vector<2x128xf32>
    %143 = arith.negf %142 : vector<2x128xf32>
    %144 = math.exp %143 : vector<2x128xf32>
    %cst_39 = arith.constant 1.000000e+00 : f32
    %145 = vector.broadcast %cst_39 : f32 to vector<2x128xf32>
    %146 = arith.addf %145, %144 : vector<2x128xf32>
    %147 = arith.divf %145, %146 : vector<2x128xf32>
    %148 = vector.extract_strided_slice %138 {offsets = [0, 128], sizes = [2, 128], strides = [1, 1]} : vector<2x384xf32> to vector<2x128xf32>
    %149 = vector.extract_strided_slice %139 {offsets = [0, 128], sizes = [2, 128], strides = [1, 1]} : vector<2x384xf32> to vector<2x128xf32>
    %150 = arith.addf %148, %149 : vector<2x128xf32>
    %151 = arith.negf %150 : vector<2x128xf32>
    %152 = math.exp %151 : vector<2x128xf32>
    %cst_40 = arith.constant 1.000000e+00 : f32
    %153 = vector.broadcast %cst_40 : f32 to vector<2x128xf32>
    %154 = arith.addf %153, %152 : vector<2x128xf32>
    %155 = arith.divf %153, %154 : vector<2x128xf32>
    %156 = vector.extract_strided_slice %138 {offsets = [0, 256], sizes = [2, 128], strides = [1, 1]} : vector<2x384xf32> to vector<2x128xf32>
    %157 = vector.extract_strided_slice %139 {offsets = [0, 256], sizes = [2, 128], strides = [1, 1]} : vector<2x384xf32> to vector<2x128xf32>
    %158 = arith.addf %157, %10 : vector<2x128xf32>
    %159 = arith.mulf %147, %158 : vector<2x128xf32>
    %160 = arith.addf %156, %159 : vector<2x128xf32>
    %161 = math.tanh %160 : vector<2x128xf32>
    %162 = arith.subf %133, %161 : vector<2x128xf32>
    %163 = arith.mulf %155, %162 : vector<2x128xf32>
    %164 = arith.addf %161, %163 : vector<2x128xf32>
    %165 = arith.index_cast %136 : i32 to index
    %c0_41 = arith.constant 0 : index
    %166 = vector.load %arg13[%165, %c0_41] : memref<16x128xf32, #tpu.memory_space<vmem>>, vector<2x128xf32>
    tpu.vector_store %arg13[%165, %c0_41], %164 {strides = array<i32>} : memref<16x128xf32, #tpu.memory_space<vmem>>, vector<2x128xf32>,
    %c5_i32 = arith.constant 5 : i32
    %c2_i32_42 = arith.constant 2 : i32
    %167 = arith.muli %c5_i32, %c2_i32_42 : i32
    %168 = arith.index_cast %167 : i32 to index
    %c0_43 = arith.constant 0 : index
    %169 = vector.load %arg12[%168, %c0_43] : memref<16x384xf32, #tpu.memory_space<vmem>>, vector<2x384xf32>
    %cst_44 = arith.constant dense<0.000000e+00> : vector<2x384xf32>
    %170 = tpu.matmul %164, %7, %cst_44 {dimension_numbers = #tpu.dot_dimension_numbers<[1], [0], [0], [1], [0, 0, 1, 1], [], []>} : vector<2x128xf32>, vector<128x384xf32>, vector<2x384xf32> -> vector<2x384xf32>
    %171 = vector.extract_strided_slice %169 {offsets = [0, 0], sizes = [2, 128], strides = [1, 1]} : vector<2x384xf32> to vector<2x128xf32>
    %172 = vector.extract_strided_slice %170 {offsets = [0, 0], sizes = [2, 128], strides = [1, 1]} : vector<2x384xf32> to vector<2x128xf32>
    %173 = arith.addf %171, %172 : vector<2x128xf32>
    %174 = arith.negf %173 : vector<2x128xf32>
    %175 = math.exp %174 : vector<2x128xf32>
    %cst_45 = arith.constant 1.000000e+00 : f32
    %176 = vector.broadcast %cst_45 : f32 to vector<2x128xf32>
    %177 = arith.addf %176, %175 : vector<2x128xf32>
    %178 = arith.divf %176, %177 : vector<2x128xf32>
    %179 = vector.extract_strided_slice %169 {offsets = [0, 128], sizes = [2, 128], strides = [1, 1]} : vector<2x384xf32> to vector<2x128xf32>
    %180 = vector.extract_strided_slice %170 {offsets = [0, 128], sizes = [2, 128], strides = [1, 1]} : vector<2x384xf32> to vector<2x128xf32>
    %181 = arith.addf %179, %180 : vector<2x128xf32>
    %182 = arith.negf %181 : vector<2x128xf32>
    %183 = math.exp %182 : vector<2x128xf32>
    %cst_46 = arith.constant 1.000000e+00 : f32
    %184 = vector.broadcast %cst_46 : f32 to vector<2x128xf32>
    %185 = arith.addf %184, %183 : vector<2x128xf32>
    %186 = arith.divf %184, %185 : vector<2x128xf32>
    %187 = vector.extract_strided_slice %169 {offsets = [0, 256], sizes = [2, 128], strides = [1, 1]} : vector<2x384xf32> to vector<2x128xf32>
    %188 = vector.extract_strided_slice %170 {offsets = [0, 256], sizes = [2, 128], strides = [1, 1]} : vector<2x384xf32> to vector<2x128xf32>
    %189 = arith.addf %188, %10 : vector<2x128xf32>
    %190 = arith.mulf %178, %189 : vector<2x128xf32>
    %191 = arith.addf %187, %190 : vector<2x128xf32>
    %192 = math.tanh %191 : vector<2x128xf32>
    %193 = arith.subf %164, %192 : vector<2x128xf32>
    %194 = arith.mulf %186, %193 : vector<2x128xf32>
    %195 = arith.addf %192, %194 : vector<2x128xf32>
    %196 = arith.index_cast %167 : i32 to index
    %c0_47 = arith.constant 0 : index
    %197 = vector.load %arg13[%196, %c0_47] : memref<16x128xf32, #tpu.memory_space<vmem>>, vector<2x128xf32>
    tpu.vector_store %arg13[%196, %c0_47], %195 {strides = array<i32>} : memref<16x128xf32, #tpu.memory_space<vmem>>, vector<2x128xf32>,
    %c6_i32 = arith.constant 6 : i32
    %c2_i32_48 = arith.constant 2 : i32
    %198 = arith.muli %c6_i32, %c2_i32_48 : i32
    %199 = arith.index_cast %198 : i32 to index
    %c0_49 = arith.constant 0 : index
    %200 = vector.load %arg12[%199, %c0_49] : memref<16x384xf32, #tpu.memory_space<vmem>>, vector<2x384xf32>
    %cst_50 = arith.constant dense<0.000000e+00> : vector<2x384xf32>
    %201 = tpu.matmul %195, %7, %cst_50 {dimension_numbers = #tpu.dot_dimension_numbers<[1], [0], [0], [1], [0, 0, 1, 1], [], []>} : vector<2x128xf32>, vector<128x384xf32>, vector<2x384xf32> -> vector<2x384xf32>
    %202 = vector.extract_strided_slice %200 {offsets = [0, 0], sizes = [2, 128], strides = [1, 1]} : vector<2x384xf32> to vector<2x128xf32>
    %203 = vector.extract_strided_slice %201 {offsets = [0, 0], sizes = [2, 128], strides = [1, 1]} : vector<2x384xf32> to vector<2x128xf32>
    %204 = arith.addf %202, %203 : vector<2x128xf32>
    %205 = arith.negf %204 : vector<2x128xf32>
    %206 = math.exp %205 : vector<2x128xf32>
    %cst_51 = arith.constant 1.000000e+00 : f32
    %207 = vector.broadcast %cst_51 : f32 to vector<2x128xf32>
    %208 = arith.addf %207, %206 : vector<2x128xf32>
    %209 = arith.divf %207, %208 : vector<2x128xf32>
    %210 = vector.extract_strided_slice %200 {offsets = [0, 128], sizes = [2, 128], strides = [1, 1]} : vector<2x384xf32> to vector<2x128xf32>
    %211 = vector.extract_strided_slice %201 {offsets = [0, 128], sizes = [2, 128], strides = [1, 1]} : vector<2x384xf32> to vector<2x128xf32>
    %212 = arith.addf %210, %211 : vector<2x128xf32>
    %213 = arith.negf %212 : vector<2x128xf32>
    %214 = math.exp %213 : vector<2x128xf32>
    %cst_52 = arith.constant 1.000000e+00 : f32
    %215 = vector.broadcast %cst_52 : f32 to vector<2x128xf32>
    %216 = arith.addf %215, %214 : vector<2x128xf32>
    %217 = arith.divf %215, %216 : vector<2x128xf32>
    %218 = vector.extract_strided_slice %200 {offsets = [0, 256], sizes = [2, 128], strides = [1, 1]} : vector<2x384xf32> to vector<2x128xf32>
    %219 = vector.extract_strided_slice %201 {offsets = [0, 256], sizes = [2, 128], strides = [1, 1]} : vector<2x384xf32> to vector<2x128xf32>
    %220 = arith.addf %219, %10 : vector<2x128xf32>
    %221 = arith.mulf %209, %220 : vector<2x128xf32>
    %222 = arith.addf %218, %221 : vector<2x128xf32>
    %223 = math.tanh %222 : vector<2x128xf32>
    %224 = arith.subf %195, %223 : vector<2x128xf32>
    %225 = arith.mulf %217, %224 : vector<2x128xf32>
    %226 = arith.addf %223, %225 : vector<2x128xf32>
    %227 = arith.index_cast %198 : i32 to index
    %c0_53 = arith.constant 0 : index
    %228 = vector.load %arg13[%227, %c0_53] : memref<16x128xf32, #tpu.memory_space<vmem>>, vector<2x128xf32>
    tpu.vector_store %arg13[%227, %c0_53], %226 {strides = array<i32>} : memref<16x128xf32, #tpu.memory_space<vmem>>, vector<2x128xf32>,
    %c7_i32 = arith.constant 7 : i32
    %c2_i32_54 = arith.constant 2 : i32
    %229 = arith.muli %c7_i32, %c2_i32_54 : i32
    %230 = arith.index_cast %229 : i32 to index
    %c0_55 = arith.constant 0 : index
    %231 = vector.load %arg12[%230, %c0_55] : memref<16x384xf32, #tpu.memory_space<vmem>>, vector<2x384xf32>
    %cst_56 = arith.constant dense<0.000000e+00> : vector<2x384xf32>
    %232 = tpu.matmul %226, %7, %cst_56 {dimension_numbers = #tpu.dot_dimension_numbers<[1], [0], [0], [1], [0, 0, 1, 1], [], []>} : vector<2x128xf32>, vector<128x384xf32>, vector<2x384xf32> -> vector<2x384xf32>
    %233 = vector.extract_strided_slice %231 {offsets = [0, 0], sizes = [2, 128], strides = [1, 1]} : vector<2x384xf32> to vector<2x128xf32>
    %234 = vector.extract_strided_slice %232 {offsets = [0, 0], sizes = [2, 128], strides = [1, 1]} : vector<2x384xf32> to vector<2x128xf32>
    %235 = arith.addf %233, %234 : vector<2x128xf32>
    %236 = arith.negf %235 : vector<2x128xf32>
    %237 = math.exp %236 : vector<2x128xf32>
    %cst_57 = arith.constant 1.000000e+00 : f32
    %238 = vector.broadcast %cst_57 : f32 to vector<2x128xf32>
    %239 = arith.addf %238, %237 : vector<2x128xf32>
    %240 = arith.divf %238, %239 : vector<2x128xf32>
    %241 = vector.extract_strided_slice %231 {offsets = [0, 128], sizes = [2, 128], strides = [1, 1]} : vector<2x384xf32> to vector<2x128xf32>
    %242 = vector.extract_strided_slice %232 {offsets = [0, 128], sizes = [2, 128], strides = [1, 1]} : vector<2x384xf32> to vector<2x128xf32>
    %243 = arith.addf %241, %242 : vector<2x128xf32>
    %244 = arith.negf %243 : vector<2x128xf32>
    %245 = math.exp %244 : vector<2x128xf32>
    %cst_58 = arith.constant 1.000000e+00 : f32
    %246 = vector.broadcast %cst_58 : f32 to vector<2x128xf32>
    %247 = arith.addf %246, %245 : vector<2x128xf32>
    %248 = arith.divf %246, %247 : vector<2x128xf32>
    %249 = vector.extract_strided_slice %231 {offsets = [0, 256], sizes = [2, 128], strides = [1, 1]} : vector<2x384xf32> to vector<2x128xf32>
    %250 = vector.extract_strided_slice %232 {offsets = [0, 256], sizes = [2, 128], strides = [1, 1]} : vector<2x384xf32> to vector<2x128xf32>
    %251 = arith.addf %250, %10 : vector<2x128xf32>
    %252 = arith.mulf %240, %251 : vector<2x128xf32>
    %253 = arith.addf %249, %252 : vector<2x128xf32>
    %254 = math.tanh %253 : vector<2x128xf32>
    %255 = arith.subf %226, %254 : vector<2x128xf32>
    %256 = arith.mulf %248, %255 : vector<2x128xf32>
    %257 = arith.addf %254, %256 : vector<2x128xf32>
    %258 = arith.index_cast %229 : i32 to index
    %c0_59 = arith.constant 0 : index
    %259 = vector.load %arg13[%258, %c0_59] : memref<16x128xf32, #tpu.memory_space<vmem>>, vector<2x128xf32>
    tpu.vector_store %arg13[%258, %c0_59], %257 {strides = array<i32>} : memref<16x128xf32, #tpu.memory_space<vmem>>, vector<2x128xf32>,
    %c8_i32 = arith.constant 8 : i32
    %c0_60 = arith.constant 0 : index
    %c0_61 = arith.constant 0 : index
    %260 = vector.load %arg13[%c0_60, %c0_61] : memref<16x128xf32, #tpu.memory_space<vmem>>, vector<16x128xf32>
    %c0_62 = arith.constant 0 : index
    %c0_63 = arith.constant 0 : index
    %261 = vector.load %arg5[%c0_62, %c0_63] : memref<128x384xf32, #tpu.memory_space<vmem>>, vector<128x384xf32>
    %cst_64 = arith.constant dense<0.000000e+00> : vector<16x384xf32>
    %262 = tpu.matmul %260, %261, %cst_64 {dimension_numbers = #tpu.dot_dimension_numbers<[1], [0], [0], [1], [0, 0, 1, 1], [], []>} : vector<16x128xf32>, vector<128x384xf32>, vector<16x384xf32> -> vector<16x384xf32>
    %c0_65 = arith.constant 0 : index
    %c0_66 = arith.constant 0 : index
    %263 = vector.load %arg7[%c0_65, %c0_66] : memref<1x384xf32, #tpu.memory_space<vmem>>, vector<1x384xf32>
    %264 = vector.broadcast %263 : vector<1x384xf32> to vector<16x384xf32>
    %265 = arith.addf %262, %264 : vector<16x384xf32>
    %c0_67 = arith.constant 0 : index
    %c0_68 = arith.constant 0 : index
    %266 = vector.load %arg12[%c0_67, %c0_68] : memref<16x384xf32, #tpu.memory_space<vmem>>, vector<16x384xf32>
    tpu.vector_store %arg12[%c0_67, %c0_68], %265 {strides = array<i32>} : memref<16x384xf32, #tpu.memory_space<vmem>>, vector<16x384xf32>,
    %c0_69 = arith.constant 0 : index
    %c0_70 = arith.constant 0 : index
    %267 = vector.load %arg6[%c0_69, %c0_70] : memref<128x384xf32, #tpu.memory_space<vmem>>, vector<128x384xf32>
    %c0_71 = arith.constant 0 : index
    %c0_72 = arith.constant 0 : index
    %268 = vector.load %arg8[%c0_71, %c0_72] : memref<1x128xf32, #tpu.memory_space<vmem>>, vector<1x128xf32>
    %269 = vector.shape_cast %268 : vector<1x128xf32> to vector<1x128xf32>
    %270 = vector.broadcast %269 : vector<1x128xf32> to vector<2x128xf32>
    %cst_73 = arith.constant 0.000000e+00 : f32
    %271 = vector.broadcast %cst_73 : f32 to vector<2x128xf32>
    %c0_i32_74 = arith.constant 0 : i32
    %c2_i32_75 = arith.constant 2 : i32
    %272 = arith.muli %c0_i32_74, %c2_i32_75 : i32
    %273 = arith.index_cast %272 : i32 to index
    %c0_76 = arith.constant 0 : index
    %274 = vector.load %arg12[%273, %c0_76] : memref<16x384xf32, #tpu.memory_space<vmem>>, vector<2x384xf32>
    %cst_77 = arith.constant dense<0.000000e+00> : vector<2x384xf32>
    %275 = tpu.matmul %271, %267, %cst_77 {dimension_numbers = #tpu.dot_dimension_numbers<[1], [0], [0], [1], [0, 0, 1, 1], [], []>} : vector<2x128xf32>, vector<128x384xf32>, vector<2x384xf32> -> vector<2x384xf32>
    %276 = vector.extract_strided_slice %274 {offsets = [0, 0], sizes = [2, 128], strides = [1, 1]} : vector<2x384xf32> to vector<2x128xf32>
    %277 = vector.extract_strided_slice %275 {offsets = [0, 0], sizes = [2, 128], strides = [1, 1]} : vector<2x384xf32> to vector<2x128xf32>
    %278 = arith.addf %276, %277 : vector<2x128xf32>
    %279 = arith.negf %278 : vector<2x128xf32>
    %280 = math.exp %279 : vector<2x128xf32>
    %cst_78 = arith.constant 1.000000e+00 : f32
    %281 = vector.broadcast %cst_78 : f32 to vector<2x128xf32>
    %282 = arith.addf %281, %280 : vector<2x128xf32>
    %283 = arith.divf %281, %282 : vector<2x128xf32>
    %284 = vector.extract_strided_slice %274 {offsets = [0, 128], sizes = [2, 128], strides = [1, 1]} : vector<2x384xf32> to vector<2x128xf32>
    %285 = vector.extract_strided_slice %275 {offsets = [0, 128], sizes = [2, 128], strides = [1, 1]} : vector<2x384xf32> to vector<2x128xf32>
    %286 = arith.addf %284, %285 : vector<2x128xf32>
    %287 = arith.negf %286 : vector<2x128xf32>
    %288 = math.exp %287 : vector<2x128xf32>
    %cst_79 = arith.constant 1.000000e+00 : f32
    %289 = vector.broadcast %cst_79 : f32 to vector<2x128xf32>
    %290 = arith.addf %289, %288 : vector<2x128xf32>
    %291 = arith.divf %289, %290 : vector<2x128xf32>
    %292 = vector.extract_strided_slice %274 {offsets = [0, 256], sizes = [2, 128], strides = [1, 1]} : vector<2x384xf32> to vector<2x128xf32>
    %293 = vector.extract_strided_slice %275 {offsets = [0, 256], sizes = [2, 128], strides = [1, 1]} : vector<2x384xf32> to vector<2x128xf32>
    %294 = arith.addf %293, %270 : vector<2x128xf32>
    %295 = arith.mulf %283, %294 : vector<2x128xf32>
    %296 = arith.addf %292, %295 : vector<2x128xf32>
    %297 = math.tanh %296 : vector<2x128xf32>
    %298 = arith.subf %271, %297 : vector<2x128xf32>
    %299 = arith.mulf %291, %298 : vector<2x128xf32>
    %300 = arith.addf %297, %299 : vector<2x128xf32>
    %c1_i32_80 = arith.constant 1 : i32
    %c2_i32_81 = arith.constant 2 : i32
    %301 = arith.muli %c1_i32_80, %c2_i32_81 : i32
    %302 = arith.index_cast %301 : i32 to index
    %c0_82 = arith.constant 0 : index
    %303 = vector.load %arg12[%302, %c0_82] : memref<16x384xf32, #tpu.memory_space<vmem>>, vector<2x384xf32>
    %cst_83 = arith.constant dense<0.000000e+00> : vector<2x384xf32>
    %304 = tpu.matmul %300, %267, %cst_83 {dimension_numbers = #tpu.dot_dimension_numbers<[1], [0], [0], [1], [0, 0, 1, 1], [], []>} : vector<2x128xf32>, vector<128x384xf32>, vector<2x384xf32> -> vector<2x384xf32>
    %305 = vector.extract_strided_slice %303 {offsets = [0, 0], sizes = [2, 128], strides = [1, 1]} : vector<2x384xf32> to vector<2x128xf32>
    %306 = vector.extract_strided_slice %304 {offsets = [0, 0], sizes = [2, 128], strides = [1, 1]} : vector<2x384xf32> to vector<2x128xf32>
    %307 = arith.addf %305, %306 : vector<2x128xf32>
    %308 = arith.negf %307 : vector<2x128xf32>
    %309 = math.exp %308 : vector<2x128xf32>
    %cst_84 = arith.constant 1.000000e+00 : f32
    %310 = vector.broadcast %cst_84 : f32 to vector<2x128xf32>
    %311 = arith.addf %310, %309 : vector<2x128xf32>
    %312 = arith.divf %310, %311 : vector<2x128xf32>
    %313 = vector.extract_strided_slice %303 {offsets = [0, 128], sizes = [2, 128], strides = [1, 1]} : vector<2x384xf32> to vector<2x128xf32>
    %314 = vector.extract_strided_slice %304 {offsets = [0, 128], sizes = [2, 128], strides = [1, 1]} : vector<2x384xf32> to vector<2x128xf32>
    %315 = arith.addf %313, %314 : vector<2x128xf32>
    %316 = arith.negf %315 : vector<2x128xf32>
    %317 = math.exp %316 : vector<2x128xf32>
    %cst_85 = arith.constant 1.000000e+00 : f32
    %318 = vector.broadcast %cst_85 : f32 to vector<2x128xf32>
    %319 = arith.addf %318, %317 : vector<2x128xf32>
    %320 = arith.divf %318, %319 : vector<2x128xf32>
    %321 = vector.extract_strided_slice %303 {offsets = [0, 256], sizes = [2, 128], strides = [1, 1]} : vector<2x384xf32> to vector<2x128xf32>
    %322 = vector.extract_strided_slice %304 {offsets = [0, 256], sizes = [2, 128], strides = [1, 1]} : vector<2x384xf32> to vector<2x128xf32>
    %323 = arith.addf %322, %270 : vector<2x128xf32>
    %324 = arith.mulf %312, %323 : vector<2x128xf32>
    %325 = arith.addf %321, %324 : vector<2x128xf32>
    %326 = math.tanh %325 : vector<2x128xf32>
    %327 = arith.subf %300, %326 : vector<2x128xf32>
    %328 = arith.mulf %320, %327 : vector<2x128xf32>
    %329 = arith.addf %326, %328 : vector<2x128xf32>
    %c2_i32_86 = arith.constant 2 : i32
    %c2_i32_87 = arith.constant 2 : i32
    %330 = arith.muli %c2_i32_86, %c2_i32_87 : i32
    %331 = arith.index_cast %330 : i32 to index
    %c0_88 = arith.constant 0 : index
    %332 = vector.load %arg12[%331, %c0_88] : memref<16x384xf32, #tpu.memory_space<vmem>>, vector<2x384xf32>
    %cst_89 = arith.constant dense<0.000000e+00> : vector<2x384xf32>
    %333 = tpu.matmul %329, %267, %cst_89 {dimension_numbers = #tpu.dot_dimension_numbers<[1], [0], [0], [1], [0, 0, 1, 1], [], []>} : vector<2x128xf32>, vector<128x384xf32>, vector<2x384xf32> -> vector<2x384xf32>
    %334 = vector.extract_strided_slice %332 {offsets = [0, 0], sizes = [2, 128], strides = [1, 1]} : vector<2x384xf32> to vector<2x128xf32>
    %335 = vector.extract_strided_slice %333 {offsets = [0, 0], sizes = [2, 128], strides = [1, 1]} : vector<2x384xf32> to vector<2x128xf32>
    %336 = arith.addf %334, %335 : vector<2x128xf32>
    %337 = arith.negf %336 : vector<2x128xf32>
    %338 = math.exp %337 : vector<2x128xf32>
    %cst_90 = arith.constant 1.000000e+00 : f32
    %339 = vector.broadcast %cst_90 : f32 to vector<2x128xf32>
    %340 = arith.addf %339, %338 : vector<2x128xf32>
    %341 = arith.divf %339, %340 : vector<2x128xf32>
    %342 = vector.extract_strided_slice %332 {offsets = [0, 128], sizes = [2, 128], strides = [1, 1]} : vector<2x384xf32> to vector<2x128xf32>
    %343 = vector.extract_strided_slice %333 {offsets = [0, 128], sizes = [2, 128], strides = [1, 1]} : vector<2x384xf32> to vector<2x128xf32>
    %344 = arith.addf %342, %343 : vector<2x128xf32>
    %345 = arith.negf %344 : vector<2x128xf32>
    %346 = math.exp %345 : vector<2x128xf32>
    %cst_91 = arith.constant 1.000000e+00 : f32
    %347 = vector.broadcast %cst_91 : f32 to vector<2x128xf32>
    %348 = arith.addf %347, %346 : vector<2x128xf32>
    %349 = arith.divf %347, %348 : vector<2x128xf32>
    %350 = vector.extract_strided_slice %332 {offsets = [0, 256], sizes = [2, 128], strides = [1, 1]} : vector<2x384xf32> to vector<2x128xf32>
    %351 = vector.extract_strided_slice %333 {offsets = [0, 256], sizes = [2, 128], strides = [1, 1]} : vector<2x384xf32> to vector<2x128xf32>
    %352 = arith.addf %351, %270 : vector<2x128xf32>
    %353 = arith.mulf %341, %352 : vector<2x128xf32>
    %354 = arith.addf %350, %353 : vector<2x128xf32>
    %355 = math.tanh %354 : vector<2x128xf32>
    %356 = arith.subf %329, %355 : vector<2x128xf32>
    %357 = arith.mulf %349, %356 : vector<2x128xf32>
    %358 = arith.addf %355, %357 : vector<2x128xf32>
    %c3_i32_92 = arith.constant 3 : i32
    %c2_i32_93 = arith.constant 2 : i32
    %359 = arith.muli %c3_i32_92, %c2_i32_93 : i32
    %360 = arith.index_cast %359 : i32 to index
    %c0_94 = arith.constant 0 : index
    %361 = vector.load %arg12[%360, %c0_94] : memref<16x384xf32, #tpu.memory_space<vmem>>, vector<2x384xf32>
    %cst_95 = arith.constant dense<0.000000e+00> : vector<2x384xf32>
    %362 = tpu.matmul %358, %267, %cst_95 {dimension_numbers = #tpu.dot_dimension_numbers<[1], [0], [0], [1], [0, 0, 1, 1], [], []>} : vector<2x128xf32>, vector<128x384xf32>, vector<2x384xf32> -> vector<2x384xf32>
    %363 = vector.extract_strided_slice %361 {offsets = [0, 0], sizes = [2, 128], strides = [1, 1]} : vector<2x384xf32> to vector<2x128xf32>
    %364 = vector.extract_strided_slice %362 {offsets = [0, 0], sizes = [2, 128], strides = [1, 1]} : vector<2x384xf32> to vector<2x128xf32>
    %365 = arith.addf %363, %364 : vector<2x128xf32>
    %366 = arith.negf %365 : vector<2x128xf32>
    %367 = math.exp %366 : vector<2x128xf32>
    %cst_96 = arith.constant 1.000000e+00 : f32
    %368 = vector.broadcast %cst_96 : f32 to vector<2x128xf32>
    %369 = arith.addf %368, %367 : vector<2x128xf32>
    %370 = arith.divf %368, %369 : vector<2x128xf32>
    %371 = vector.extract_strided_slice %361 {offsets = [0, 128], sizes = [2, 128], strides = [1, 1]} : vector<2x384xf32> to vector<2x128xf32>
    %372 = vector.extract_strided_slice %362 {offsets = [0, 128], sizes = [2, 128], strides = [1, 1]} : vector<2x384xf32> to vector<2x128xf32>
    %373 = arith.addf %371, %372 : vector<2x128xf32>
    %374 = arith.negf %373 : vector<2x128xf32>
    %375 = math.exp %374 : vector<2x128xf32>
    %cst_97 = arith.constant 1.000000e+00 : f32
    %376 = vector.broadcast %cst_97 : f32 to vector<2x128xf32>
    %377 = arith.addf %376, %375 : vector<2x128xf32>
    %378 = arith.divf %376, %377 : vector<2x128xf32>
    %379 = vector.extract_strided_slice %361 {offsets = [0, 256], sizes = [2, 128], strides = [1, 1]} : vector<2x384xf32> to vector<2x128xf32>
    %380 = vector.extract_strided_slice %362 {offsets = [0, 256], sizes = [2, 128], strides = [1, 1]} : vector<2x384xf32> to vector<2x128xf32>
    %381 = arith.addf %380, %270 : vector<2x128xf32>
    %382 = arith.mulf %370, %381 : vector<2x128xf32>
    %383 = arith.addf %379, %382 : vector<2x128xf32>
    %384 = math.tanh %383 : vector<2x128xf32>
    %385 = arith.subf %358, %384 : vector<2x128xf32>
    %386 = arith.mulf %378, %385 : vector<2x128xf32>
    %387 = arith.addf %384, %386 : vector<2x128xf32>
    %c4_i32_98 = arith.constant 4 : i32
    %c2_i32_99 = arith.constant 2 : i32
    %388 = arith.muli %c4_i32_98, %c2_i32_99 : i32
    %389 = arith.index_cast %388 : i32 to index
    %c0_100 = arith.constant 0 : index
    %390 = vector.load %arg12[%389, %c0_100] : memref<16x384xf32, #tpu.memory_space<vmem>>, vector<2x384xf32>
    %cst_101 = arith.constant dense<0.000000e+00> : vector<2x384xf32>
    %391 = tpu.matmul %387, %267, %cst_101 {dimension_numbers = #tpu.dot_dimension_numbers<[1], [0], [0], [1], [0, 0, 1, 1], [], []>} : vector<2x128xf32>, vector<128x384xf32>, vector<2x384xf32> -> vector<2x384xf32>
    %392 = vector.extract_strided_slice %390 {offsets = [0, 0], sizes = [2, 128], strides = [1, 1]} : vector<2x384xf32> to vector<2x128xf32>
    %393 = vector.extract_strided_slice %391 {offsets = [0, 0], sizes = [2, 128], strides = [1, 1]} : vector<2x384xf32> to vector<2x128xf32>
    %394 = arith.addf %392, %393 : vector<2x128xf32>
    %395 = arith.negf %394 : vector<2x128xf32>
    %396 = math.exp %395 : vector<2x128xf32>
    %cst_102 = arith.constant 1.000000e+00 : f32
    %397 = vector.broadcast %cst_102 : f32 to vector<2x128xf32>
    %398 = arith.addf %397, %396 : vector<2x128xf32>
    %399 = arith.divf %397, %398 : vector<2x128xf32>
    %400 = vector.extract_strided_slice %390 {offsets = [0, 128], sizes = [2, 128], strides = [1, 1]} : vector<2x384xf32> to vector<2x128xf32>
    %401 = vector.extract_strided_slice %391 {offsets = [0, 128], sizes = [2, 128], strides = [1, 1]} : vector<2x384xf32> to vector<2x128xf32>
    %402 = arith.addf %400, %401 : vector<2x128xf32>
    %403 = arith.negf %402 : vector<2x128xf32>
    %404 = math.exp %403 : vector<2x128xf32>
    %cst_103 = arith.constant 1.000000e+00 : f32
    %405 = vector.broadcast %cst_103 : f32 to vector<2x128xf32>
    %406 = arith.addf %405, %404 : vector<2x128xf32>
    %407 = arith.divf %405, %406 : vector<2x128xf32>
    %408 = vector.extract_strided_slice %390 {offsets = [0, 256], sizes = [2, 128], strides = [1, 1]} : vector<2x384xf32> to vector<2x128xf32>
    %409 = vector.extract_strided_slice %391 {offsets = [0, 256], sizes = [2, 128], strides = [1, 1]} : vector<2x384xf32> to vector<2x128xf32>
    %410 = arith.addf %409, %270 : vector<2x128xf32>
    %411 = arith.mulf %399, %410 : vector<2x128xf32>
    %412 = arith.addf %408, %411 : vector<2x128xf32>
    %413 = math.tanh %412 : vector<2x128xf32>
    %414 = arith.subf %387, %413 : vector<2x128xf32>
    %415 = arith.mulf %407, %414 : vector<2x128xf32>
    %416 = arith.addf %413, %415 : vector<2x128xf32>
    %c5_i32_104 = arith.constant 5 : i32
    %c2_i32_105 = arith.constant 2 : i32
    %417 = arith.muli %c5_i32_104, %c2_i32_105 : i32
    %418 = arith.index_cast %417 : i32 to index
    %c0_106 = arith.constant 0 : index
    %419 = vector.load %arg12[%418, %c0_106] : memref<16x384xf32, #tpu.memory_space<vmem>>, vector<2x384xf32>
    %cst_107 = arith.constant dense<0.000000e+00> : vector<2x384xf32>
    %420 = tpu.matmul %416, %267, %cst_107 {dimension_numbers = #tpu.dot_dimension_numbers<[1], [0], [0], [1], [0, 0, 1, 1], [], []>} : vector<2x128xf32>, vector<128x384xf32>, vector<2x384xf32> -> vector<2x384xf32>
    %421 = vector.extract_strided_slice %419 {offsets = [0, 0], sizes = [2, 128], strides = [1, 1]} : vector<2x384xf32> to vector<2x128xf32>
    %422 = vector.extract_strided_slice %420 {offsets = [0, 0], sizes = [2, 128], strides = [1, 1]} : vector<2x384xf32> to vector<2x128xf32>
    %423 = arith.addf %421, %422 : vector<2x128xf32>
    %424 = arith.negf %423 : vector<2x128xf32>
    %425 = math.exp %424 : vector<2x128xf32>
    %cst_108 = arith.constant 1.000000e+00 : f32
    %426 = vector.broadcast %cst_108 : f32 to vector<2x128xf32>
    %427 = arith.addf %426, %425 : vector<2x128xf32>
    %428 = arith.divf %426, %427 : vector<2x128xf32>
    %429 = vector.extract_strided_slice %419 {offsets = [0, 128], sizes = [2, 128], strides = [1, 1]} : vector<2x384xf32> to vector<2x128xf32>
    %430 = vector.extract_strided_slice %420 {offsets = [0, 128], sizes = [2, 128], strides = [1, 1]} : vector<2x384xf32> to vector<2x128xf32>
    %431 = arith.addf %429, %430 : vector<2x128xf32>
    %432 = arith.negf %431 : vector<2x128xf32>
    %433 = math.exp %432 : vector<2x128xf32>
    %cst_109 = arith.constant 1.000000e+00 : f32
    %434 = vector.broadcast %cst_109 : f32 to vector<2x128xf32>
    %435 = arith.addf %434, %433 : vector<2x128xf32>
    %436 = arith.divf %434, %435 : vector<2x128xf32>
    %437 = vector.extract_strided_slice %419 {offsets = [0, 256], sizes = [2, 128], strides = [1, 1]} : vector<2x384xf32> to vector<2x128xf32>
    %438 = vector.extract_strided_slice %420 {offsets = [0, 256], sizes = [2, 128], strides = [1, 1]} : vector<2x384xf32> to vector<2x128xf32>
    %439 = arith.addf %438, %270 : vector<2x128xf32>
    %440 = arith.mulf %428, %439 : vector<2x128xf32>
    %441 = arith.addf %437, %440 : vector<2x128xf32>
    %442 = math.tanh %441 : vector<2x128xf32>
    %443 = arith.subf %416, %442 : vector<2x128xf32>
    %444 = arith.mulf %436, %443 : vector<2x128xf32>
    %445 = arith.addf %442, %444 : vector<2x128xf32>
    %c6_i32_110 = arith.constant 6 : i32
    %c2_i32_111 = arith.constant 2 : i32
    %446 = arith.muli %c6_i32_110, %c2_i32_111 : i32
    %447 = arith.index_cast %446 : i32 to index
    %c0_112 = arith.constant 0 : index
    %448 = vector.load %arg12[%447, %c0_112] : memref<16x384xf32, #tpu.memory_space<vmem>>, vector<2x384xf32>
    %cst_113 = arith.constant dense<0.000000e+00> : vector<2x384xf32>
    %449 = tpu.matmul %445, %267, %cst_113 {dimension_numbers = #tpu.dot_dimension_numbers<[1], [0], [0], [1], [0, 0, 1, 1], [], []>} : vector<2x128xf32>, vector<128x384xf32>, vector<2x384xf32> -> vector<2x384xf32>
    %450 = vector.extract_strided_slice %448 {offsets = [0, 0], sizes = [2, 128], strides = [1, 1]} : vector<2x384xf32> to vector<2x128xf32>
    %451 = vector.extract_strided_slice %449 {offsets = [0, 0], sizes = [2, 128], strides = [1, 1]} : vector<2x384xf32> to vector<2x128xf32>
    %452 = arith.addf %450, %451 : vector<2x128xf32>
    %453 = arith.negf %452 : vector<2x128xf32>
    %454 = math.exp %453 : vector<2x128xf32>
    %cst_114 = arith.constant 1.000000e+00 : f32
    %455 = vector.broadcast %cst_114 : f32 to vector<2x128xf32>
    %456 = arith.addf %455, %454 : vector<2x128xf32>
    %457 = arith.divf %455, %456 : vector<2x128xf32>
    %458 = vector.extract_strided_slice %448 {offsets = [0, 128], sizes = [2, 128], strides = [1, 1]} : vector<2x384xf32> to vector<2x128xf32>
    %459 = vector.extract_strided_slice %449 {offsets = [0, 128], sizes = [2, 128], strides = [1, 1]} : vector<2x384xf32> to vector<2x128xf32>
    %460 = arith.addf %458, %459 : vector<2x128xf32>
    %461 = arith.negf %460 : vector<2x128xf32>
    %462 = math.exp %461 : vector<2x128xf32>
    %cst_115 = arith.constant 1.000000e+00 : f32
    %463 = vector.broadcast %cst_115 : f32 to vector<2x128xf32>
    %464 = arith.addf %463, %462 : vector<2x128xf32>
    %465 = arith.divf %463, %464 : vector<2x128xf32>
    %466 = vector.extract_strided_slice %448 {offsets = [0, 256], sizes = [2, 128], strides = [1, 1]} : vector<2x384xf32> to vector<2x128xf32>
    %467 = vector.extract_strided_slice %449 {offsets = [0, 256], sizes = [2, 128], strides = [1, 1]} : vector<2x384xf32> to vector<2x128xf32>
    %468 = arith.addf %467, %270 : vector<2x128xf32>
    %469 = arith.mulf %457, %468 : vector<2x128xf32>
    %470 = arith.addf %466, %469 : vector<2x128xf32>
    %471 = math.tanh %470 : vector<2x128xf32>
    %472 = arith.subf %445, %471 : vector<2x128xf32>
    %473 = arith.mulf %465, %472 : vector<2x128xf32>
    %474 = arith.addf %471, %473 : vector<2x128xf32>
    %c7_i32_116 = arith.constant 7 : i32
    %c2_i32_117 = arith.constant 2 : i32
    %475 = arith.muli %c7_i32_116, %c2_i32_117 : i32
    %476 = arith.index_cast %475 : i32 to index
    %c0_118 = arith.constant 0 : index
    %477 = vector.load %arg12[%476, %c0_118] : memref<16x384xf32, #tpu.memory_space<vmem>>, vector<2x384xf32>
    %cst_119 = arith.constant dense<0.000000e+00> : vector<2x384xf32>
    %478 = tpu.matmul %474, %267, %cst_119 {dimension_numbers = #tpu.dot_dimension_numbers<[1], [0], [0], [1], [0, 0, 1, 1], [], []>} : vector<2x128xf32>, vector<128x384xf32>, vector<2x384xf32> -> vector<2x384xf32>
    %479 = vector.extract_strided_slice %477 {offsets = [0, 0], sizes = [2, 128], strides = [1, 1]} : vector<2x384xf32> to vector<2x128xf32>
    %480 = vector.extract_strided_slice %478 {offsets = [0, 0], sizes = [2, 128], strides = [1, 1]} : vector<2x384xf32> to vector<2x128xf32>
    %481 = arith.addf %479, %480 : vector<2x128xf32>
    %482 = arith.negf %481 : vector<2x128xf32>
    %483 = math.exp %482 : vector<2x128xf32>
    %cst_120 = arith.constant 1.000000e+00 : f32
    %484 = vector.broadcast %cst_120 : f32 to vector<2x128xf32>
    %485 = arith.addf %484, %483 : vector<2x128xf32>
    %486 = arith.divf %484, %485 : vector<2x128xf32>
    %487 = vector.extract_strided_slice %477 {offsets = [0, 128], sizes = [2, 128], strides = [1, 1]} : vector<2x384xf32> to vector<2x128xf32>
    %488 = vector.extract_strided_slice %478 {offsets = [0, 128], sizes = [2, 128], strides = [1, 1]} : vector<2x384xf32> to vector<2x128xf32>
    %489 = arith.addf %487, %488 : vector<2x128xf32>
    %490 = arith.negf %489 : vector<2x128xf32>
    %491 = math.exp %490 : vector<2x128xf32>
    %cst_121 = arith.constant 1.000000e+00 : f32
    %492 = vector.broadcast %cst_121 : f32 to vector<2x128xf32>
    %493 = arith.addf %492, %491 : vector<2x128xf32>
    %494 = arith.divf %492, %493 : vector<2x128xf32>
    %495 = vector.extract_strided_slice %477 {offsets = [0, 256], sizes = [2, 128], strides = [1, 1]} : vector<2x384xf32> to vector<2x128xf32>
    %496 = vector.extract_strided_slice %478 {offsets = [0, 256], sizes = [2, 128], strides = [1, 1]} : vector<2x384xf32> to vector<2x128xf32>
    %497 = arith.addf %496, %270 : vector<2x128xf32>
    %498 = arith.mulf %486, %497 : vector<2x128xf32>
    %499 = arith.addf %495, %498 : vector<2x128xf32>
    %500 = math.tanh %499 : vector<2x128xf32>
    %501 = arith.subf %474, %500 : vector<2x128xf32>
    %502 = arith.mulf %494, %501 : vector<2x128xf32>
    %503 = arith.addf %500, %502 : vector<2x128xf32>
    %c8_i32_122 = arith.constant 8 : i32
    %c0_123 = arith.constant 0 : index
    %c0_124 = arith.constant 0 : index
    %504 = vector.load %arg9[%c0_123, %c0_124] : memref<128x4xf32, #tpu.memory_space<vmem>>, vector<128x4xf32>
    %cst_125 = arith.constant dense<0.000000e+00> : vector<2x4xf32>
    %505 = tpu.matmul %503, %504, %cst_125 {dimension_numbers = #tpu.dot_dimension_numbers<[1], [0], [0], [1], [0, 0, 1, 1], [], []>} : vector<2x128xf32>, vector<128x4xf32>, vector<2x4xf32> -> vector<2x4xf32>
    %c0_126 = arith.constant 0 : index
    %c0_127 = arith.constant 0 : index
    %506 = vector.load %arg10[%c0_126, %c0_127] : memref<1x4xf32, #tpu.memory_space<vmem>>, vector<1x4xf32>
    %507 = vector.broadcast %506 : vector<1x4xf32> to vector<2x4xf32>
    %508 = arith.addf %505, %507 : vector<2x4xf32>
    %c0_128 = arith.constant 0 : index
    %c0_129 = arith.constant 0 : index
    %509 = vector.load %arg11[%c0_128, %c0_129] : memref<2x4xf32, #tpu.memory_space<vmem>>, vector<2x4xf32>
    tpu.vector_store %arg11[%c0_128, %c0_129], %508 {strides = array<i32>} : memref<2x4xf32, #tpu.memory_space<vmem>>, vector<2x4xf32>,
    return
  }
}

</mosaic_0001>

<bundles_post_ra>
// kernel: tpu_custom_call.1
= control target key start
LH: loop header
LB: loop body
LE: loop exit
PB: predicated region body
PF: predicated region fallthrough
CT: control target
= control target key end

     0   :  { %16 = vsyncpa [#allocation5], 0  ;;  %s6849_s0 = inlined_call_operand.vmem [shape: f32[16,16], index: 0, kind: input, shape index: {}]   ;;  %s6850_s1 = inlined_call_operand.vmem [shape: f32[16,384], index: 1, kind: input, shape index: {}]   ;;  %s6851_s2 = inlined_call_operand.hbm [shape: f32[128,384], index: 2, kind: input, shape index: {}]   ;;  %s6852_s3 = inlined_call_operand.vmem [shape: f32[1,384], index: 3, kind: input, shape index: {}]   ;;  %s6853_s4 = inlined_call_operand.vmem [shape: f32[1,128], index: 4, kind: input, shape index: {}]   ;;  %s6854_s5 = inlined_call_operand.hbm [shape: f32[128,384], index: 5, kind: input, shape index: {}]   ;;  %s6855_s6 = inlined_call_operand.hbm [shape: f32[128,384], index: 6, kind: input, shape index: {}]   ;;  %s6856_s7 = inlined_call_operand.vmem [shape: f32[1,384], index: 7, kind: input, shape index: {}]   ;;  %s6857_s8 = inlined_call_operand.vmem [shape: f32[1,128], index: 8, kind: input, shape index: {}]   ;;  %s6858_s9 = inlined_call_operand.vmem [shape: f32[128,4], index: 9, kind: input, shape index: {}]   ;;  %s6859_s10 = inlined_call_operand.vmem [shape: f32[1,4], index: 10, kind: input, shape index: {}]   ;;  %s6860_s11 = inlined_call_operand.hbm [shape: f32[2,4], index: 11, kind: output, shape index: {}]  }
   0x1   :  { %17 = vsyncpa [#allocation8], 0 }
   0x2   :  { %18 = vsyncpa [#allocation6], 0  ;;  %s5832_s17 = smov [#allocation7]   ;;  %s5833_s19 = smov [#allocation4]  }
   0x3   :  { %s44_s18 = sshll.u32 %s5832_s17, 4  ;;  %s28_s20 = sshll.u32 %s5833_s19, 4  ;;  %s45_s18 = int_to_ptr.vmem [resolvable:$true] %s44_s18  ;;  %s5901_s20 = int_to_ptr.vmem [resolvable:$true] %s28_s20 }
   0x4   :  { %s5738_s23 = scalar_lea.hbm %s6854_s5, 6144 }
   0x5   :  { %p5739_p0 = scmp.ne.s32.totalorder %s6854_s5, %s5738_s23  ;;  %p5742_p1 = scmp.lt.u32.totalorder %s5738_s23, %s6854_s5 }
   0x7   :  { %p5744_p2 = pnand %p5742_p1, %p5739_p0 }
   0x9   :  { %5747 = shalt.err (!%p5744_p2)
}
   0xa   :  { %s5748_s28 = scalar_lea.vmem %s45_s18, 6144  ;;  %p5753_p4 = scmp.lt.s32.totalorder %s45_s18, %s45_s18 }
   0xb   :  { %p5749_p3 = scmp.ne.s32.totalorder %s45_s18, %s5748_s28  ;;  %p5754_p5 = scmp.lt.s32.totalorder %s5748_s28, %s5748_s28 }
   0xd   :  { %p5755_p6 = por %p5754_p5, %p5753_p4 }
   0xf   :  { %p5756_p7 = pnand %p5755_p6, %p5749_p3 }
  0x11   :  { %5759 = shalt.err (!%p5756_p7)
}
  0x12   :  { %s5834_s29 = smov 384   ;;  %s5835_s30 = smov 24  }
  0x13   :  { %50 = dma.hbm_to_vmem [thread:$0]  %s6854_s5, 6144, %s45_s18, [#allocation8], %s5834_s29, %s5834_s29, %s5835_s30  }
  0x14   :  { %s5760_s16 = scalar_lea.hbm %s6851_s2, 6144 }
  0x15   :  { %p5761_p8 = scmp.ne.s32.totalorder %s6851_s2, %s5760_s16  ;;  %p5764_p9 = scmp.lt.u32.totalorder %s5760_s16, %s6851_s2 }
  0x17   :  { %p5766_p10 = pnand %p5764_p9, %p5761_p8 }
  0x19   :  { %5769 = shalt.err (!%p5766_p10)
}
  0x1a   :  { %s5770_s23 = scalar_lea.vmem %s5901_s20, 6144  ;;  %p5775_p12 = scmp.lt.s32.totalorder %s5901_s20, %s5901_s20 }
  0x1b   :  { %p5771_p11 = scmp.ne.s32.totalorder %s5901_s20, %s5770_s23  ;;  %p5776_p13 = scmp.lt.s32.totalorder %s5770_s23, %s5770_s23 }
  0x1d   :  { %p5777_p0 = por %p5776_p13, %p5775_p12 }
  0x1f   :  { %p5778_p1 = pnand %p5777_p0, %p5771_p11 }
  0x21   :  { %5781 = shalt.err (!%p5778_p1)
}
  0x22   :  { %34 = dma.hbm_to_vmem [thread:$0]  %s6851_s2, 6144, %s5901_s20, [#allocation5], %s5834_s29, %s5834_s29, %s5835_s30  }
  0x23   :  { %s5836_s24 = smov [#allocation9]   ;;  %s5782_s28 = scalar_lea.hbm %s6855_s6, 6144 }
  0x24   :  { %s56_s25 = sshll.u32 %s5836_s24, 4  ;;  %p5783_p2 = scmp.ne.s32.totalorder %s6855_s6, %s5782_s28  ;;  %s57_s25 = int_to_ptr.vmem [resolvable:$true] %s56_s25 }
  0x25   :  { %p5786_p3 = scmp.lt.u32.totalorder %s5782_s28, %s6855_s6 }
  0x27   :  { %p5788_p4 = pnand %p5786_p3, %p5783_p2 }
  0x29   :  { %5791 = shalt.err (!%p5788_p4)
}
  0x2a   :  { %s5792_s16 = scalar_lea.vmem %s57_s25, 6144  ;;  %p5797_p6 = scmp.lt.s32.totalorder %s57_s25, %s57_s25 }
  0x2b   :  { %p5793_p5 = scmp.ne.s32.totalorder %s57_s25, %s5792_s16  ;;  %p5798_p7 = scmp.lt.s32.totalorder %s5792_s16, %s5792_s16 }
  0x2d   :  { %p5799_p8 = por %p5798_p7, %p5797_p6 }
  0x2f   :  { %p5800_p9 = pnand %p5799_p8, %p5793_p5 }
  0x31   :  { %5803 = shalt.err (!%p5800_p9)
}
  0x32   :  { %62 = dma.hbm_to_vmem [thread:$0]  %s6855_s6, 6144, %s57_s25, [#allocation8], %s5834_s29, %s5834_s29, %s5835_s30  }
  0x33   :  { %5826 = dma.done.wait [#allocation5], 6144  }
  0x34   :  { %5827 = vsyncadd [#allocation5], 4294961152 }
  0x35   :  { %5828 = dma.done.wait [#allocation8], 12288  }
  0x36   :  { %5829 = vsyncadd [#allocation8], 4294955008  ;;  %v5837_v0 = vmov 0.0   ;;  %v271_v1 = vld [vmem:[#allocation4 + $0x8] sm:$0xff]  ;;  %v274_v2 = vld [vmem:[#allocation4 + $0x20] sm:$0xff]  ;;  %vm105_vm0 = vcmask 130048  }
  0x37   :  { %176 = vmatprep.mubr.f32.mxu1 %v5837_v0  ;;  %392 = vmatprep.mubr.f32.mxu0 %v5837_v0  ;;  %v270_v3 = vld [vmem:[#allocation4] sm:$0xff]  ;;  %v5955_v4 = vpack.c.bf16 %v274_v2, %v271_v1  ;;  %v273_v5 = vld [vmem:[#allocation4 + $0x18] sm:$0xff]  ;;  %v280_v7 = vld [vmem:[#allocation4 + $0x50] sm:$0xff]  ;;  %v5838_v43 = vmov 0.0|0.0   ;;  %vm5839_vm1 = vmmov 0   ;;  %s5840_s17 = smov [#allocation10]  }
  0x38   :  { %v277_v6 = vld [vmem:[#allocation4 + $0x38] sm:$0xff]  ;;  %v5957_v8 = vpack.c.bf16 %v273_v5, %v270_v3  ;;  %v276_v10 = vld [vmem:[#allocation4 + $0x30] sm:$0xff]  ;;  %v279_v11 = vld [vmem:[#allocation4 + $0x48] sm:$0xff]  ;;  %s3579_s19 = sshll.u32 %s5840_s17, 4  ;;  %vm3571_vm2 = vcmask 25600   ;;  %s3580_s19 = int_to_ptr.vmem [resolvable:$true] %s3579_s19 }
  0x39   :  { %v5959_v9 = vpack.c.bf16 %v280_v7, %v277_v6  ;;  %v283_v12 = vld [vmem:[#allocation4 + $0x68] sm:$0xff]  ;;  %4585 = vmatprep.subr.bf16.mxu0 %v5955_v4  ;;  %v286_v13 = vld [vmem:[#allocation4 + $0x80] sm:$0xff]  ;;  %v5963_v14 = vpack.c.bf16 %v279_v11, %v276_v10  ;;  %v285_v16 = vld [vmem:[#allocation4 + $0x78] sm:$0xff]  ;;  %s5804_s21 = scalar_lea.vmem %s3580_s19, 32  ;;  %p5809_p11 = scmp.lt.s32.totalorder %s3580_s19, %s3580_s19 }
  0x3a   :  { %4587 = vmatpush1.bf16.msra.mxu0 %v5957_v8  ;;  %v282_v15 = vld [vmem:[#allocation4 + $0x60] sm:$0xff]  ;;  %v5966_v17 = vpack.c.bf16 %v286_v13, %v283_v12  ;;  %v289_v18 = vld [vmem:[#allocation4 + $0x98] sm:$0xff]  ;;  %v83_v19 = vld [vmem:[%s6850_s1 + $0x8] sm:$0xff]  ;;  %p5805_p10 = scmp.ne.s32.totalorder %s3580_s19, %s5804_s21  ;;  %p5810_p12 = scmp.lt.s32.totalorder %s5804_s21, %s5804_s21 }
  0x3b   :  { %4589 = vmatprep.subr.bf16.mxu0 %v5959_v9  ;;  %v86_v20 = vld [vmem:[%s6850_s1 + $0x20] sm:$0xff]  ;;  %v292_v21 = vld [vmem:[#allocation4 + $0xb0] sm:$0xff]  ;;  %v85_v24 = vld [vmem:[%s6850_s1 + $0x18] sm:$0xff]  ;;  %v5981_v26 = vpack.c.bf16 %v285_v16, %v282_v15 }
  0x3c   :  { %v4576_v22 = vpack.c.bf16 %v86_v20, %v83_v19  ;;  %v82_v23 = vld [vmem:[%s6850_s1] sm:$0xff]  ;;  %v84_v27 = vld [vmem:[%s6850_s1 + $0x10] sm:$0xff]  ;;  %v87_v28 = vld [vmem:[%s6850_s1 + $0x28] sm:$0xff]  ;;  %v5990_v29 = vpack.c.bf16 %v292_v21, %v289_v18  ;;  %p5811_p13 = por %p5810_p12, %p5809_p11 }
  0x3d   :  { %v4578_v25 = vpack.c.bf16 %v85_v24, %v82_v23  ;;  %v288_v30 = vld [vmem:[#allocation4 + $0x90] sm:$0xff]  ;;  %v291_v31 = vld [vmem:[#allocation4 + $0xa8] sm:$0xff]  ;;  %v80_v32 = vld [vmem:[%s6849_s0] sm:$0xff]  ;;  %v4580_v33 = vpack.c.bf16 %v87_v28, %v84_v27  ;;  %v90_v28 = vlaneseq }
  0x3e   :  { %4591 = vmatpush1.bf16.msra.mxu0 %v5963_v14  ;;  %4577 = vmatprep.subr.bf16.mxu1 %v4576_v22  ;;  %v295_v34 = vld [vmem:[#allocation4 + $0xc8] sm:$0xff]  ;;  %v298_v35 = vld [vmem:[#allocation4 + $0xe0] sm:$0xff]  ;;  %v5996_v36 = vpack.c.bf16 %v291_v31, %v288_v30  ;;  %v297_v39 = vld [vmem:[#allocation4 + $0xd8] sm:$0xff]  ;;  %p5812_p0 = pnand %p5811_p13, %p5805_p10 }
  0x3f   :  { %4593 = vmatprep.subr.bf16.mxu0 %v5966_v17  ;;  %4579 = vmatpush1.bf16.msra.mxu1 %v4578_v25  ;;  %v294_v37 = vld [vmem:[#allocation4 + $0xc0] sm:$0xff]  ;;  %v6000_v38 = vpack.c.bf16 %v298_v35, %v295_v34  ;;  %v301_v40 = vld [vmem:[#allocation4 + $0xf8] sm:$0xff]  ;;  %v81_v41 = vld [vmem:[%s6849_s0 + $0x8] sm:$0xff]  ;;  %v6105_v30 = vshrl.u32 %v90_v28, 7 }
  0x40   :  { %4581 = vmatprep.subr.bf16.mxu1 %v4580_v33  ;;  %v304_v42 = vld [vmem:[#allocation4 + $0x110] sm:$0xff]  ;;  %v275_v45 = vld [vmem:[#allocation4 + $0x28] sm:$0xff]  ;;  %v6008_v46 = vpack.c.bf16 %v297_v39, %v294_v37  ;;  %v310_v52 = vld [vmem:[#allocation4 + $0x140] sm:$0xff] }
  0x41   :  { %v272_v44 = vld [vmem:[#allocation4 + $0x10] sm:$0xff]  ;;  %v6012_v47 = vpack.c.bf16 %v304_v42, %v301_v40  ;;  %v303_v49 = vld [vmem:[#allocation4 + $0x108] sm:$0xff]  ;;  %v278_v53 = vld [vmem:[#allocation4 + $0x40] sm:$0xff]  ;;  %v92_v31 = vsub.s32 0, %v6105_v30 }
  0x42   :  { %4595 = vmatpush1.bf16.msra.mxu0 %v5981_v26  ;;  %3589 = vmatmul.mubr.msk.f32.vlgmr.msra.gmra.mrb[0].mxu1 %vm105_vm0, %v80_v32  ;;  %v300_v48 = vld [vmem:[#allocation4 + $0xf0] sm:$0xff]  ;;  %v307_v50 = vld [vmem:[#allocation4 + $0x128] sm:$0xff]  ;;  %v6015_v51 = vpack.c.bf16 %v275_v45, %v272_v44  ;;  %v281_v54 = vld [vmem:[#allocation4 + $0x58] sm:$0xff] }
  0x43   :  { %4597 = vmatprep.subr.bf16.mxu0 %v5990_v29  ;;  %4583 = vmatpush3.bf16.msra.mxu1 %v4580_v33  ;;  %v6018_v55 = vpack.c.bf16 %v303_v49, %v300_v48  ;;  %v6022_v56 = vpack.c.bf16 %v310_v52, %v307_v50  ;;  %v306_v57 = vld [vmem:[#allocation4 + $0x120] sm:$0xff]  ;;  %v309_v58 = vld [vmem:[#allocation4 + $0x138] sm:$0xff]  ;;  %v6025_v60 = vpack.c.bf16 %v281_v54, %v278_v53  ;;  %v316_v61 = vld [vmem:[#allocation4 + $0x170] sm:$0xff]  ;;  %v96_v33 = vsub.s32 1, %v6105_v30 }
  0x44   :  { %182 = vmatprep.mubr.f32.mxu1 %v5837_v0  ;;  %4616 = vmatprep.subr.bf16.mxu1 %v5838_v43  ;;  %v313_v59 = vld [vmem:[#allocation4 + $0x158] sm:$0xff]  ;;  %v284_v62 = vld [vmem:[#allocation4 + $0x70] sm:$0xff]  ;;  %v287_v63 = vld [vmem:[#allocation4 + $0x88] sm:$0xff]  ;;  %v6031_v1 = vpack.c.bf16 %v309_v58, %v306_v57 }
  0x45   :  { %v6034_v2 = vpack.c.bf16 %v316_v61, %v313_v59  ;;  %v312_v3 = vld [vmem:[#allocation4 + $0x150] sm:$0xff]  ;;  %v315_v5 = vld [vmem:[#allocation4 + $0x168] sm:$0xff]  ;;  %v6037_v6 = vpack.c.bf16 %v287_v63, %v284_v62  ;;  %v290_v7 = vld [vmem:[#allocation4 + $0xa0] sm:$0xff] }
  0x46   :  { %4599 = vmatpush1.bf16.msra.mxu0 %v5996_v36  ;;  %3590 = vmatmul.mubr.msk.f32.gmra.mrb[2].mxu1 %vm105_vm0, %v81_v41  ;;  %v293_v10 = vld [vmem:[#allocation4 + $0xb8] sm:$0xff]  ;;  %v6041_v11 = vpack.c.bf16 %v315_v5, %v312_v3  ;;  %v296_v13 = vld [vmem:[#allocation4 + $0xd0] sm:$0xff]  ;;  %v299_v15 = vld [vmem:[#allocation4 + $0xe8] sm:$0xff] }
  0x47   :  { %4601 = vmatprep.subr.bf16.mxu0 %v6000_v38  ;;  %3943 = vmatprep.mubr.msk.f32.mxu1 %vm105_vm0, %v80_v32  ;;  %v6045_v12 = vpack.c.bf16 %v293_v10, %v290_v7  ;;  %v6050_v16 = vpack.c.bf16 %v299_v15, %v296_v13  ;;  %v302_v18 = vld [vmem:[#allocation4 + $0x100] sm:$0xff]  ;;  %v305_v19 = vld [vmem:[#allocation4 + $0x118] sm:$0xff]  ;;  %v308_v21 = vld [vmem:[#allocation4 + $0x130] sm:$0xff] }
  0x48   :  { %v6058_v20 = vpack.c.bf16 %v305_v19, %v302_v18  ;;  %v311_v22 = vld [vmem:[#allocation4 + $0x148] sm:$0xff]  ;;  %v314_v24 = vld [vmem:[#allocation4 + $0x160] sm:$0xff]  ;;  %v317_v25 = vld [vmem:[#allocation4 + $0x178] sm:$0xff] }
  0x49   :  { %v6064_v23 = vpack.c.bf16 %v311_v22, %v308_v21  ;;  %v6070_v27 = vpack.c.bf16 %v317_v25, %v314_v24  ;;  %v88_v32 = vld [vmem:[%s6852_s3] sm:$0x7] }
  0x4a   :  { %4603 = vmatpush1.bf16.msra.mxu0 %v6008_v46  ;;  %3944 = vmatmul.mubr.msk.f32.vlgmr.msra.gmra.mrb[4].mxu1 %vm105_vm0, %v81_v41  ;;  %v93_v34 = vrot.slane %v88_v32, %v92_v31  ;;  %v97_v35 = vrot.slane %v88_v32, %v96_v33  ;;  %v100_v41 = vsub.s32 2, %v6105_v30  ;;  %v6122_v19 = vld [vmem:[%s6853_s4] ss:$0 sm:$0xff] }
  0x4b   :  { %4605 = vmatprep.subr.bf16.mxu0 %v6012_v47  ;;  %4618 = vmatpush3.bf16.msra.mxu1 %v6015_v51 }
  0x4c   :  { %4619 = vmatprep.subr.bf16.mxu1 %v5838_v43  ;;  %3978 = vmatprep.mubr.msk.f32.mxu1 %vm5839_vm1, %v5837_v0  ;;  %v101_v49 = vrot.slane %v88_v32, %v100_v41 }
  0x4e   :  { %4607 = vmatpush1.bf16.msra.mxu0 %v6018_v55 }
  0x4f   :  { %4609 = vmatprep.subr.bf16.mxu0 %v6022_v56  ;;  %4621 = vmatpush3.bf16.msra.mxu1 %v6025_v60 }
  0x50   :  { %4622 = vmatprep.subr.bf16.mxu1 %v5838_v43 }
  0x52   :  { %4611 = vmatpush1.bf16.msra.mxu0 %v6031_v1 }
  0x53   :  { %4613 = vmatprep.subr.bf16.mxu0 %v6034_v2  ;;  %4624 = vmatpush3.bf16.msra.mxu1 %v6037_v6 }
  0x54   :  { %4625 = vmatprep.subr.bf16.mxu1 %v5838_v43 }
  0x56   :  { %4615 = vmatpush1.bf16.msra.mxu0 %v6041_v11 }
  0x57   :  { %4627 = vmatpush3.bf16.msra.mxu1 %v6045_v12  ;;  %4641 = vmatprep.subr.bf16.mxu0 %v5955_v4 }
  0x58   :  { %4628 = vmatprep.subr.bf16.mxu1 %v5838_v43 }
  0x59   :  { %393 = vmatmul.mubr.f32.vlgmr.msra.gmra.mrb[0].mxu0 %v5837_v0 }
  0x5a   :  { %4643 = vmatpush1.bf16.msra.mxu0 %v5957_v8  ;;  %558 = vmatprep.mubr.f32.mxu0 %v5837_v0 }
  0x5b   :  { %4630 = vmatpush3.bf16.msra.mxu1 %v6050_v16  ;;  %4645 = vmatprep.subr.bf16.mxu0 %v5959_v9 }
  0x5c   :  { %4631 = vmatprep.subr.bf16.mxu1 %v5838_v43 }
  0x5e   :  { %4647 = vmatpush1.bf16.msra.mxu0 %v5963_v14 }
  0x5f   :  { %4633 = vmatpush3.bf16.msra.mxu1 %v6058_v20  ;;  %4649 = vmatprep.subr.bf16.mxu0 %v5966_v17 }
  0x60   :  { %4634 = vmatprep.subr.bf16.mxu1 %v5838_v43 }
  0x62   :  { %4651 = vmatpush1.bf16.msra.mxu0 %v5981_v26 }
  0x63   :  { %4636 = vmatpush3.bf16.msra.mxu1 %v6064_v23  ;;  %4653 = vmatprep.subr.bf16.mxu0 %v5990_v29 }
  0x64   :  { %4637 = vmatprep.subr.bf16.mxu1 %v5838_v43 }
  0x66   :  { %4655 = vmatpush1.bf16.msra.mxu0 %v5996_v36 }
  0x67   :  { %4639 = vmatpush3.bf16.msra.mxu1 %v6070_v27  ;;  %4657 = vmatprep.subr.bf16.mxu0 %v6000_v38 }
  0x68   :  { %4672 = vmatprep.subr.bf16.mxu1 %v5838_v43 }
  0x6a   :  { %3979 = vmatmul.mubr.f32.vlgmr.msra.gmra.mrb[6].mxu1 %v5837_v0  ;;  %4659 = vmatpush1.bf16.msra.mxu0 %v6008_v46 }
  0x6b   :  { %4674 = vmatpush3.bf16.msra.mxu1 %v6015_v51  ;;  %4661 = vmatprep.subr.bf16.mxu0 %v6012_v47 }
  0x6c   :  { %4675 = vmatprep.subr.bf16.mxu1 %v5838_v43  ;;  %4013 = vmatprep.mubr.msk.f32.mxu1 %vm5839_vm1, %v5837_v0 }
  0x6e   :  { %4663 = vmatpush1.bf16.msra.mxu0 %v6018_v55 }
  0x6f   :  { %4677 = vmatpush3.bf16.msra.mxu1 %v6025_v60  ;;  %4665 = vmatprep.subr.bf16.mxu0 %v6022_v56 }
  0x70   :  { %4678 = vmatprep.subr.bf16.mxu1 %v5838_v43 }
  0x72   :  { %4667 = vmatpush1.bf16.msra.mxu0 %v6031_v1 }
  0x73   :  { %4680 = vmatpush3.bf16.msra.mxu1 %v6037_v6  ;;  %4669 = vmatprep.subr.bf16.mxu0 %v6034_v2 }
  0x74   :  { %4681 = vmatprep.subr.bf16.mxu1 %v5838_v43 }
  0x76   :  { %4671 = vmatpush1.bf16.msra.mxu0 %v6041_v11 }
  0x77   :  { %4683 = vmatpush3.bf16.msra.mxu1 %v6045_v12  ;;  %4697 = vmatprep.subr.bf16.mxu0 %v5955_v4 }
  0x78   :  { %4684 = vmatprep.subr.bf16.mxu1 %v5838_v43 }
  0x7b   :  { %4686 = vmatpush3.bf16.msra.mxu1 %v6050_v16 }
  0x7c   :  { %4687 = vmatprep.subr.bf16.mxu1 %v5838_v43 }
  0x7f   :  { %4689 = vmatpush3.bf16.msra.mxu1 %v6058_v20 }
  0x80   :  { %4690 = vmatprep.subr.bf16.mxu1 %v5838_v43 }
  0x83   :  { %4692 = vmatpush3.bf16.msra.mxu1 %v6064_v23 }
  0x84   :  { %4693 = vmatprep.subr.bf16.mxu1 %v5838_v43 }
  0x87   :  { %4695 = vmatpush3.bf16.msra.mxu1 %v6070_v27 }
  0x88   :  { %4728 = vmatprep.subr.bf16.mxu1 %v5838_v43 }
 0x115   :  { %v178_v37 = vpop.f32.mrb[0].mxu1 }
 0x116   :  { %v179_v39 = vadd.f32 %v178_v37, %v93_v34  ;;  %v180_v40 = vpop.f32.mrb[1].mxu1 }
 0x117   :  { %v181_v42 = vadd.f32 %v180_v40, %v97_v35 }
 0x118   :  { %264 = vst [vmem:[#allocation2] sm:$0xff] %v179_v39 }
 0x119   :  { %265 = vst [vmem:[#allocation2 + $0x8] sm:$0xff] %v181_v42  ;;  %v184_v44 = vpop.f32.mrb[2].mxu1 }
 0x11a   :  { %v185_v45 = vadd.f32 %v184_v44, %v93_v34  ;;  %v186_v48 = vpop.f32.mrb[3].mxu1 }
 0x11b   :  { %v187_v50 = vadd.f32 %v186_v48, %v97_v35 }
 0x11c   :  { %267 = vst [vmem:[#allocation2 + $0x18] sm:$0xff] %v185_v45 }
 0x11d   :  { %268 = vst [vmem:[#allocation2 + $0x20] sm:$0xff] %v187_v50  ;;  %v3945_v52 = vpop.f32.mrb[4].mxu1 }
 0x11e   :  { %v261_v53 = vadd.f32 %v3945_v52, %v101_v49  ;;  %v255_v54 = vpop.f32.mrb[5].mxu1 }
 0x11f   :  { %v256_v57 = vadd.f32 %v255_v54, %v101_v49  ;;  %v325_v58 = vld [vmem:[#allocation2] sm:$0x3]  ;;  %v491_v52 = vld [vmem:[#allocation2] sm:$0xc] }
 0x120   :  { %269 = vst [vmem:[#allocation2 + $0x28] sm:$0xff] %v261_v53  ;;  %v326_v3 = vld [vmem:[#allocation2 + $0x8] sm:$0x3] }
 0x121   :  { %266 = vst [vmem:[#allocation2 + $0x10] sm:$0xff] %v256_v57 }
 0x128   :  { %v327_v28 = vld [vmem:[#allocation2 + $0x10] sm:$0x3] }
 0x12c   :  { %v394_v59 = vpop.f32.mrb[0].mxu0 }
 0x12d   :  { %v469_v61 = vadd.f32 %v394_v59, %v325_v58  ;;  %v396_v62 = vpop.f32.mrb[1].mxu0  ;;  %v492_v58 = vld [vmem:[#allocation2 + $0x8] sm:$0xc] }
 0x12e   :  { %v476_v5 = vadd.f32 %v396_v62, %v326_v3 }
 0x12f   :  { %v3594_v63 = vmul.f32 -1.442695, %v469_v61 }
 0x130   :  { %v3595_v7 = vmul.f32 -1.442695, %v476_v5 }
 0x131   :  { %5577 = vpow2.f32 %v3594_v63 }
 0x132   :  { %5579 = vpow2.f32 %v3595_v7 }
 0x13b   :  { %v5578_v10 = vpop.eup %5577 }
 0x13c   :  { %v473_v13 = vadd.f32 1.0, %v5578_v10  ;;  %v5580_v22 = vpop.eup %5579 }
 0x13d   :  { %v465_v15 = vpop.f32.mrb[6].mxu1  ;;  %v480_v32 = vadd.f32 1.0, %v5580_v22 }
 0x13e   :  { %5581 = vrcp.f32 %v473_v13  ;;  %v3980_v18 = vpop.f32.mrb[7].mxu1  ;;  %v483_v21 = vadd.f32 %v6122_v19, %v465_v15  ;;  %v493_v13 = vld [vmem:[#allocation2 + $0x10] sm:$0xc] }
 0x148   :  { %v5582_v24 = vpop.eup %5581 }
 0x149   :  { %v484_v25 = vmul.f32 %v5582_v24, %v483_v21 }
 0x14b   :  { %v485_v34 = vadd.f32 %v484_v25, %v327_v28 }
 0x14d   :  { %5583 = vtanh.f32 %v485_v34 }
 0x14e   :  { %5585 = vrcp.f32 %v480_v32 }
 0x157   :  { %v5584_v35 = vpop.eup %5583 }
 0x158   :  { %v487_v37 = vsub.f32 0.0, %v5584_v35  ;;  %v5586_v39 = vpop.eup %5585 }
 0x15a   :  { %v488_v40 = vmul.f32 %v5586_v39, %v487_v37 }
 0x15c   :  { %v6125_v42 = vadd.f32 %v5584_v35, %v488_v40 }
 0x15e   :  { %490 = vst [vmem:[#allocation3] sm:$0x3] %v6125_v42  ;;  %559 = vmatmul.mubr.f32.vlgmr.msra.gmra.mrb[2].mxu0 %v6125_v42  ;;  %4014 = vmatmul.mubr.f32.vlgmr.msra.gmra.mrb[8].mxu1 %v6125_v42 }
 0x15f   :  { %4699 = vmatpush1.bf16.msra.mxu0 %v5957_v8  ;;  %4730 = vmatpush3.bf16.msra.mxu1 %v6015_v51 }
 0x160   :  { %4701 = vmatprep.subr.bf16.mxu0 %v5959_v9  ;;  %4731 = vmatprep.subr.bf16.mxu1 %v5838_v43 }
 0x161   :  { %742 = vmatprep.mubr.f32.mxu0 %v5837_v0  ;;  %4048 = vmatprep.mubr.msk.f32.mxu1 %vm5839_vm1, %v5837_v0 }
 0x163   :  { %4703 = vmatpush1.bf16.msra.mxu0 %v5963_v14  ;;  %4733 = vmatpush3.bf16.msra.mxu1 %v6025_v60 }
 0x164   :  { %4705 = vmatprep.subr.bf16.mxu0 %v5966_v17  ;;  %4734 = vmatprep.subr.bf16.mxu1 %v5838_v43 }
 0x167   :  { %4707 = vmatpush1.bf16.msra.mxu0 %v5981_v26  ;;  %4736 = vmatpush3.bf16.msra.mxu1 %v6037_v6 }
 0x168   :  { %4709 = vmatprep.subr.bf16.mxu0 %v5990_v29  ;;  %4737 = vmatprep.subr.bf16.mxu1 %v5838_v43 }
 0x16b   :  { %4711 = vmatpush1.bf16.msra.mxu0 %v5996_v36  ;;  %4739 = vmatpush3.bf16.msra.mxu1 %v6045_v12 }
 0x16c   :  { %4713 = vmatprep.subr.bf16.mxu0 %v6000_v38  ;;  %4740 = vmatprep.subr.bf16.mxu1 %v5838_v43 }
 0x16f   :  { %4715 = vmatpush1.bf16.msra.mxu0 %v6008_v46  ;;  %4742 = vmatpush3.bf16.msra.mxu1 %v6050_v16 }
 0x170   :  { %4717 = vmatprep.subr.bf16.mxu0 %v6012_v47  ;;  %4743 = vmatprep.subr.bf16.mxu1 %v5838_v43 }
 0x173   :  { %4719 = vmatpush1.bf16.msra.mxu0 %v6018_v55  ;;  %4745 = vmatpush3.bf16.msra.mxu1 %v6058_v20 }
 0x174   :  { %4721 = vmatprep.subr.bf16.mxu0 %v6022_v56  ;;  %4746 = vmatprep.subr.bf16.mxu1 %v5838_v43 }
 0x177   :  { %4723 = vmatpush1.bf16.msra.mxu0 %v6031_v1  ;;  %4748 = vmatpush3.bf16.msra.mxu1 %v6064_v23 }
 0x178   :  { %4725 = vmatprep.subr.bf16.mxu0 %v6034_v2  ;;  %4749 = vmatprep.subr.bf16.mxu1 %v5838_v43 }
 0x17b   :  { %4727 = vmatpush1.bf16.msra.mxu0 %v6041_v11  ;;  %4751 = vmatpush3.bf16.msra.mxu1 %v6070_v27 }
 0x17c   :  { %4753 = vmatprep.subr.bf16.mxu0 %v5955_v4  ;;  %4784 = vmatprep.subr.bf16.mxu1 %v5838_v43 }
 0x231   :  { %v560_v44 = vpop.f32.mrb[2].mxu0  ;;  %v631_v45 = vpop.f32.mrb[8].mxu1 }
 0x232   :  { %v636_v48 = vrot.slane %v560_v44, 6  ;;  %v562_v49 = vpop.f32.mrb[3].mxu0  ;;  %v4015_v50 = vpop.f32.mrb[9].mxu1  ;;  %v655_v3 = vadd.f32 %v6122_v19, %v631_v45 }
 0x233   :  { %v646_v57 = vrot.slane %v562_v49, 6 }
 0x234   :  { %v638_v53 = vadd.f32 %v636_v48, %v491_v52  ;;  %v657_v5 = vrot.slane %v655_v3, 6  ;;  %v672_v48 = vld [vmem:[#allocation2] sm:$0x30] }
 0x235   :  { %v648_v59 = vadd.f32 %v646_v57, %v492_v58 }
 0x236   :  { %v3596_v54 = vmul.f32 -1.442695, %v638_v53  ;;  %v673_v53 = vld [vmem:[#allocation2 + $0x8] sm:$0x30] }
 0x237   :  { %v3597_v63 = vmul.f32 -1.442695, %v648_v59 }
 0x238   :  { %5587 = vpow2.f32 %v3596_v54 }
 0x242   :  { %v5588_v61 = vpop.eup %5587 }
 0x243   :  { %v642_v62 = vadd.f32 1.0, %v5588_v61 }
 0x245   :  { %5589 = vrcp.f32 %v642_v62 }
 0x246   :  { %5591 = vpow2.f32 %v3597_v63 }
 0x24f   :  { %v5590_v7 = vpop.eup %5589 }
 0x250   :  { %v659_v10 = vmul.f32 %v5590_v7, %v657_v5  ;;  %v5592_v18 = vpop.eup %5591  ;;  %v674_v5 = vld [vmem:[#allocation2 + $0x10] sm:$0x30] }
 0x251   :  { %v652_v21 = vadd.f32 1.0, %v5592_v18 }
 0x252   :  { %v660_v15 = vadd.f32 %v659_v10, %v493_v13 }
 0x254   :  { %5593 = vtanh.f32 %v660_v15 }
 0x255   :  { %5595 = vrcp.f32 %v652_v21 }
 0x25e   :  { %v5594_v22 = vpop.eup %5593 }
 0x25f   :  { %v663_v24 = vrot.slane %v5594_v22, 2  ;;  %v5596_v32 = vpop.eup %5595 }
 0x261   :  { %v665_v25 = vsub.f32 %v6125_v42, %v663_v24 }
 0x263   :  { %v667_v28 = vrot.slane %v665_v25, 6 }
 0x265   :  { %v669_v34 = vmul.f32 %v5596_v32, %v667_v28 }
 0x267   :  { %v6167_v35 = vadd.f32 %v5594_v22, %v669_v34 }
 0x269   :  { %671 = vst [vmem:[#allocation3] sm:$0xc] %v6167_v35  ;;  %v676_v37 = vrot.slane %v6167_v35, 2 }
 0x26b   :  { %743 = vmatmul.mubr.f32.vlgmr.msra.gmra.mrb[4].mxu0 %v676_v37  ;;  %4049 = vmatmul.mubr.f32.vlgmr.msra.gmra.mrb[10].mxu1 %v676_v37 }
 0x26c   :  { %4755 = vmatpush1.bf16.msra.mxu0 %v5957_v8  ;;  %4786 = vmatpush3.bf16.msra.mxu1 %v6015_v51 }
 0x26d   :  { %4757 = vmatprep.subr.bf16.mxu0 %v5959_v9  ;;  %4787 = vmatprep.subr.bf16.mxu1 %v5838_v43 }
 0x26e   :  { %926 = vmatprep.mubr.f32.mxu0 %v5837_v0  ;;  %4083 = vmatprep.mubr.msk.f32.mxu1 %vm5839_vm1, %v5837_v0 }
 0x270   :  { %4759 = vmatpush1.bf16.msra.mxu0 %v5963_v14  ;;  %4789 = vmatpush3.bf16.msra.mxu1 %v6025_v60 }
 0x271   :  { %4761 = vmatprep.subr.bf16.mxu0 %v5966_v17  ;;  %4790 = vmatprep.subr.bf16.mxu1 %v5838_v43 }
 0x274   :  { %4763 = vmatpush1.bf16.msra.mxu0 %v5981_v26  ;;  %4792 = vmatpush3.bf16.msra.mxu1 %v6037_v6 }
 0x275   :  { %4765 = vmatprep.subr.bf16.mxu0 %v5990_v29  ;;  %4793 = vmatprep.subr.bf16.mxu1 %v5838_v43 }
 0x278   :  { %4767 = vmatpush1.bf16.msra.mxu0 %v5996_v36  ;;  %4795 = vmatpush3.bf16.msra.mxu1 %v6045_v12 }
 0x279   :  { %4769 = vmatprep.subr.bf16.mxu0 %v6000_v38  ;;  %4796 = vmatprep.subr.bf16.mxu1 %v5838_v43 }
 0x27c   :  { %4771 = vmatpush1.bf16.msra.mxu0 %v6008_v46  ;;  %4798 = vmatpush3.bf16.msra.mxu1 %v6050_v16 }
 0x27d   :  { %4773 = vmatprep.subr.bf16.mxu0 %v6012_v47  ;;  %4799 = vmatprep.subr.bf16.mxu1 %v5838_v43 }
 0x280   :  { %4775 = vmatpush1.bf16.msra.mxu0 %v6018_v55  ;;  %4801 = vmatpush3.bf16.msra.mxu1 %v6058_v20 }
 0x281   :  { %4777 = vmatprep.subr.bf16.mxu0 %v6022_v56  ;;  %4802 = vmatprep.subr.bf16.mxu1 %v5838_v43 }
 0x284   :  { %4779 = vmatpush1.bf16.msra.mxu0 %v6031_v1  ;;  %4804 = vmatpush3.bf16.msra.mxu1 %v6064_v23 }
 0x285   :  { %4781 = vmatprep.subr.bf16.mxu0 %v6034_v2  ;;  %4805 = vmatprep.subr.bf16.mxu1 %v5838_v43 }
 0x288   :  { %4783 = vmatpush1.bf16.msra.mxu0 %v6041_v11  ;;  %4807 = vmatpush3.bf16.msra.mxu1 %v6070_v27 }
 0x289   :  { %4809 = vmatprep.subr.bf16.mxu0 %v5955_v4  ;;  %4840 = vmatprep.subr.bf16.mxu1 %v5838_v43 }
 0x33e   :  { %v744_v39 = vpop.f32.mrb[4].mxu0  ;;  %v815_v40 = vpop.f32.mrb[10].mxu1 }
 0x33f   :  { %v820_v42 = vrot.slane %v744_v39, 4  ;;  %v746_v44 = vpop.f32.mrb[5].mxu0  ;;  %v4050_v45 = vpop.f32.mrb[11].mxu1  ;;  %v839_v61 = vadd.f32 %v6122_v19, %v815_v40 }
 0x340   :  { %v830_v52 = vrot.slane %v746_v44, 4 }
 0x341   :  { %v822_v49 = vadd.f32 %v820_v42, %v672_v48  ;;  %v841_v62 = vrot.slane %v839_v61, 4  ;;  %v856_v42 = vld [vmem:[#allocation2] sm:$0xc0] }
 0x342   :  { %v832_v54 = vadd.f32 %v830_v52, %v673_v53 }
 0x343   :  { %v3598_v50 = vmul.f32 -1.442695, %v822_v49  ;;  %v857_v49 = vld [vmem:[#allocation2 + $0x8] sm:$0xc0] }
 0x344   :  { %v3599_v59 = vmul.f32 -1.442695, %v832_v54 }
 0x345   :  { %5597 = vpow2.f32 %v3598_v50 }
 0x34f   :  { %v5598_v57 = vpop.eup %5597 }
 0x350   :  { %v826_v58 = vadd.f32 1.0, %v5598_v57 }
 0x352   :  { %5599 = vrcp.f32 %v826_v58 }
 0x353   :  { %5601 = vpow2.f32 %v3599_v59 }
 0x35c   :  { %v5600_v63 = vpop.eup %5599 }
 0x35d   :  { %v843_v3 = vmul.f32 %v5600_v63, %v841_v62  ;;  %v5602_v10 = vpop.eup %5601  ;;  %v858_v62 = vld [vmem:[#allocation2 + $0x10] sm:$0xc0] }
 0x35e   :  { %v836_v13 = vadd.f32 1.0, %v5602_v10 }
 0x35f   :  { %v844_v7 = vadd.f32 %v843_v3, %v674_v5 }
 0x361   :  { %5603 = vtanh.f32 %v844_v7 }
 0x362   :  { %5605 = vrcp.f32 %v836_v13 }
 0x36b   :  { %v5604_v15 = vpop.eup %5603 }
 0x36c   :  { %v847_v18 = vrot.slane %v5604_v15, 2  ;;  %v5606_v24 = vpop.eup %5605 }
 0x36e   :  { %v849_v21 = vsub.f32 %v6167_v35, %v847_v18 }
 0x370   :  { %v851_v22 = vrot.slane %v849_v21, 6 }
 0x372   :  { %v853_v25 = vmul.f32 %v5606_v24, %v851_v22 }
 0x374   :  { %v6208_v28 = vadd.f32 %v5604_v15, %v853_v25  ;;  %v1040_v25 = vld [vmem:[#allocation2 + $0x18] sm:$0x3] }
 0x376   :  { %855 = vst [vmem:[#allocation3] sm:$0x30] %v6208_v28  ;;  %v860_v32 = vrot.slane %v6208_v28, 4 }
 0x378   :  { %927 = vmatmul.mubr.f32.vlgmr.msra.gmra.mrb[6].mxu0 %v860_v32  ;;  %4084 = vmatmul.mubr.f32.vlgmr.msra.gmra.mrb[12].mxu1 %v860_v32 }
 0x379   :  { %4811 = vmatpush1.bf16.msra.mxu0 %v5957_v8  ;;  %4842 = vmatpush3.bf16.msra.mxu1 %v6015_v51 }
 0x37a   :  { %4813 = vmatprep.subr.bf16.mxu0 %v5959_v9  ;;  %4843 = vmatprep.subr.bf16.mxu1 %v5838_v43 }
 0x37b   :  { %1110 = vmatprep.mubr.f32.mxu0 %v5837_v0  ;;  %4118 = vmatprep.mubr.msk.f32.mxu1 %vm5839_vm1, %v5837_v0 }
 0x37d   :  { %4815 = vmatpush1.bf16.msra.mxu0 %v5963_v14  ;;  %4845 = vmatpush3.bf16.msra.mxu1 %v6025_v60 }
 0x37e   :  { %4817 = vmatprep.subr.bf16.mxu0 %v5966_v17  ;;  %4846 = vmatprep.subr.bf16.mxu1 %v5838_v43 }
 0x381   :  { %4819 = vmatpush1.bf16.msra.mxu0 %v5981_v26  ;;  %4848 = vmatpush3.bf16.msra.mxu1 %v6037_v6 }
 0x382   :  { %4821 = vmatprep.subr.bf16.mxu0 %v5990_v29  ;;  %4849 = vmatprep.subr.bf16.mxu1 %v5838_v43 }
 0x385   :  { %4823 = vmatpush1.bf16.msra.mxu0 %v5996_v36  ;;  %4851 = vmatpush3.bf16.msra.mxu1 %v6045_v12 }
 0x386   :  { %4825 = vmatprep.subr.bf16.mxu0 %v6000_v38  ;;  %4852 = vmatprep.subr.bf16.mxu1 %v5838_v43 }
 0x389   :  { %4827 = vmatpush1.bf16.msra.mxu0 %v6008_v46  ;;  %4854 = vmatpush3.bf16.msra.mxu1 %v6050_v16 }
 0x38a   :  { %4829 = vmatprep.subr.bf16.mxu0 %v6012_v47  ;;  %4855 = vmatprep.subr.bf16.mxu1 %v5838_v43 }
 0x38d   :  { %4831 = vmatpush1.bf16.msra.mxu0 %v6018_v55  ;;  %4857 = vmatpush3.bf16.msra.mxu1 %v6058_v20 }
 0x38e   :  { %4833 = vmatprep.subr.bf16.mxu0 %v6022_v56  ;;  %4858 = vmatprep.subr.bf16.mxu1 %v5838_v43 }
 0x391   :  { %4835 = vmatpush1.bf16.msra.mxu0 %v6031_v1  ;;  %4860 = vmatpush3.bf16.msra.mxu1 %v6064_v23 }
 0x392   :  { %4837 = vmatprep.subr.bf16.mxu0 %v6034_v2  ;;  %4861 = vmatprep.subr.bf16.mxu1 %v5838_v43 }
 0x395   :  { %4839 = vmatpush1.bf16.msra.mxu0 %v6041_v11  ;;  %4863 = vmatpush3.bf16.msra.mxu1 %v6070_v27 }
 0x396   :  { %4865 = vmatprep.subr.bf16.mxu0 %v5955_v4  ;;  %4896 = vmatprep.subr.bf16.mxu1 %v5838_v43 }
 0x44b   :  { %v928_v34 = vpop.f32.mrb[6].mxu0  ;;  %v999_v35 = vpop.f32.mrb[12].mxu1 }
 0x44c   :  { %v1004_v37 = vrot.slane %v928_v34, 2  ;;  %v930_v39 = vpop.f32.mrb[7].mxu0  ;;  %v4085_v40 = vpop.f32.mrb[13].mxu1  ;;  %v1023_v57 = vadd.f32 %v6122_v19, %v999_v35 }
 0x44d   :  { %v1014_v48 = vrot.slane %v930_v39, 2  ;;  %v1041_v40 = vld [vmem:[#allocation2 + $0x20] sm:$0x3] }
 0x44e   :  { %v1006_v44 = vadd.f32 %v1004_v37, %v856_v42  ;;  %v1025_v58 = vrot.slane %v1023_v57, 2 }
 0x44f   :  { %v1016_v50 = vadd.f32 %v1014_v48, %v857_v49 }
 0x450   :  { %v3600_v45 = vmul.f32 -1.442695, %v1006_v44 }
 0x451   :  { %v3601_v54 = vmul.f32 -1.442695, %v1016_v50 }
 0x452   :  { %5607 = vpow2.f32 %v3600_v45 }
 0x45c   :  { %v5608_v52 = vpop.eup %5607 }
 0x45d   :  { %v1010_v53 = vadd.f32 1.0, %v5608_v52 }
 0x45f   :  { %5609 = vrcp.f32 %v1010_v53  ;;  %v1042_v53 = vld [vmem:[#allocation2 + $0x28] sm:$0x3] }
 0x460   :  { %5611 = vpow2.f32 %v3601_v54 }
 0x469   :  { %v5610_v59 = vpop.eup %5609 }
 0x46a   :  { %v1027_v61 = vmul.f32 %v5610_v59, %v1025_v58  ;;  %v5612_v3 = vpop.eup %5611 }
 0x46b   :  { %v1020_v5 = vadd.f32 1.0, %v5612_v3 }
 0x46c   :  { %v1028_v63 = vadd.f32 %v1027_v61, %v858_v62 }
 0x46e   :  { %5613 = vtanh.f32 %v1028_v63 }
 0x46f   :  { %5615 = vrcp.f32 %v1020_v5 }
 0x478   :  { %v5614_v7 = vpop.eup %5613 }
 0x479   :  { %v1031_v10 = vrot.slane %v5614_v7, 2  ;;  %v5616_v18 = vpop.eup %5615 }
 0x47b   :  { %v1033_v13 = vsub.f32 %v6208_v28, %v1031_v10 }
 0x47d   :  { %v1035_v15 = vrot.slane %v1033_v13, 6 }
 0x47f   :  { %v1037_v21 = vmul.f32 %v5616_v18, %v1035_v15 }
 0x481   :  { %v6249_v22 = vadd.f32 %v5614_v7, %v1037_v21 }
 0x483   :  { %1039 = vst [vmem:[#allocation3] sm:$0xc0] %v6249_v22  ;;  %v1044_v24 = vrot.slane %v6249_v22, 6 }
 0x485   :  { %1111 = vmatmul.mubr.f32.vlgmr.msra.gmra.mrb[8].mxu0 %v1044_v24  ;;  %4119 = vmatmul.mubr.f32.vlgmr.msra.gmra.mrb[14].mxu1 %v1044_v24 }
 0x486   :  { %4867 = vmatpush1.bf16.msra.mxu0 %v5957_v8  ;;  %4898 = vmatpush3.bf16.msra.mxu1 %v6015_v51 }
 0x487   :  { %4869 = vmatprep.subr.bf16.mxu0 %v5959_v9  ;;  %4899 = vmatprep.subr.bf16.mxu1 %v5838_v43 }
 0x488   :  { %1282 = vmatprep.mubr.f32.mxu0 %v5837_v0  ;;  %4153 = vmatprep.mubr.msk.f32.mxu1 %vm5839_vm1, %v5837_v0 }
 0x48a   :  { %4871 = vmatpush1.bf16.msra.mxu0 %v5963_v14  ;;  %4901 = vmatpush3.bf16.msra.mxu1 %v6025_v60 }
 0x48b   :  { %4873 = vmatprep.subr.bf16.mxu0 %v5966_v17  ;;  %4902 = vmatprep.subr.bf16.mxu1 %v5838_v43 }
 0x48e   :  { %4875 = vmatpush1.bf16.msra.mxu0 %v5981_v26  ;;  %4904 = vmatpush3.bf16.msra.mxu1 %v6037_v6 }
 0x48f   :  { %4877 = vmatprep.subr.bf16.mxu0 %v5990_v29  ;;  %4905 = vmatprep.subr.bf16.mxu1 %v5838_v43 }
 0x492   :  { %4879 = vmatpush1.bf16.msra.mxu0 %v5996_v36  ;;  %4907 = vmatpush3.bf16.msra.mxu1 %v6045_v12 }
 0x493   :  { %4881 = vmatprep.subr.bf16.mxu0 %v6000_v38  ;;  %4908 = vmatprep.subr.bf16.mxu1 %v5838_v43 }
 0x496   :  { %4883 = vmatpush1.bf16.msra.mxu0 %v6008_v46  ;;  %4910 = vmatpush3.bf16.msra.mxu1 %v6050_v16 }
 0x497   :  { %4885 = vmatprep.subr.bf16.mxu0 %v6012_v47  ;;  %4911 = vmatprep.subr.bf16.mxu1 %v5838_v43 }
 0x49a   :  { %4887 = vmatpush1.bf16.msra.mxu0 %v6018_v55  ;;  %4913 = vmatpush3.bf16.msra.mxu1 %v6058_v20 }
 0x49b   :  { %4889 = vmatprep.subr.bf16.mxu0 %v6022_v56  ;;  %4914 = vmatprep.subr.bf16.mxu1 %v5838_v43 }
 0x49e   :  { %4891 = vmatpush1.bf16.msra.mxu0 %v6031_v1  ;;  %4916 = vmatpush3.bf16.msra.mxu1 %v6064_v23 }
 0x49f   :  { %4893 = vmatprep.subr.bf16.mxu0 %v6034_v2  ;;  %4917 = vmatprep.subr.bf16.mxu1 %v5838_v43 }
 0x4a2   :  { %4895 = vmatpush1.bf16.msra.mxu0 %v6041_v11  ;;  %4919 = vmatpush3.bf16.msra.mxu1 %v6070_v27 }
 0x4a3   :  { %4921 = vmatprep.subr.bf16.mxu0 %v5955_v4  ;;  %4952 = vmatprep.subr.bf16.mxu1 %v5838_v43 }
 0x558   :  { %v1112_v28 = vpop.f32.mrb[8].mxu0  ;;  %v1183_v32 = vpop.f32.mrb[14].mxu1 }
 0x559   :  { %v1187_v34 = vadd.f32 %v1112_v28, %v1040_v25  ;;  %v1114_v35 = vpop.f32.mrb[9].mxu0  ;;  %v4120_v37 = vpop.f32.mrb[15].mxu1  ;;  %v1201_v49 = vadd.f32 %v6122_v19, %v1183_v32  ;;  %v1216_v32 = vld [vmem:[#allocation2 + $0x20] sm:$0xc] }
 0x55a   :  { %v1194_v42 = vadd.f32 %v1114_v35, %v1041_v40 }
 0x55b   :  { %v3602_v39 = vmul.f32 -1.442695, %v1187_v34 }
 0x55c   :  { %v3603_v48 = vmul.f32 -1.442695, %v1194_v42 }
 0x55d   :  { %5617 = vpow2.f32 %v3602_v39 }
 0x567   :  { %v5618_v44 = vpop.eup %5617 }
 0x568   :  { %v1191_v45 = vadd.f32 1.0, %v5618_v44 }
 0x56a   :  { %5619 = vrcp.f32 %v1191_v45  ;;  %v1217_v45 = vld [vmem:[#allocation2 + $0x28] sm:$0xc] }
 0x56b   :  { %5621 = vpow2.f32 %v3603_v48 }
 0x574   :  { %v5620_v50 = vpop.eup %5619 }
 0x575   :  { %v1202_v52 = vmul.f32 %v5620_v50, %v1201_v49  ;;  %v5622_v57 = vpop.eup %5621 }
 0x576   :  { %v1198_v58 = vadd.f32 1.0, %v5622_v57 }
 0x577   :  { %v1203_v54 = vadd.f32 %v1202_v52, %v1042_v53 }
 0x579   :  { %5623 = vtanh.f32 %v1203_v54 }
 0x57a   :  { %5625 = vrcp.f32 %v1198_v58 }
 0x583   :  { %v5624_v59 = vpop.eup %5623 }
 0x584   :  { %v1206_v61 = vrot.slane %v5624_v59, 2  ;;  %v5626_v3 = vpop.eup %5625 }
 0x586   :  { %v1208_v62 = vsub.f32 %v6249_v22, %v1206_v61  ;;  %v1215_v22 = vld [vmem:[#allocation2 + $0x18] sm:$0xc] }
 0x588   :  { %v1210_v63 = vrot.slane %v1208_v62, 6 }
 0x58a   :  { %v1212_v5 = vmul.f32 %v5626_v3, %v1210_v63 }
 0x58c   :  { %v6290_v7 = vadd.f32 %v5624_v59, %v1212_v5 }
 0x58e   :  { %1214 = vst [vmem:[#allocation3 + $0x8] sm:$0x3] %v6290_v7  ;;  %1283 = vmatmul.mubr.f32.vlgmr.msra.gmra.mrb[10].mxu0 %v6290_v7  ;;  %4154 = vmatmul.mubr.f32.vlgmr.msra.gmra.mrb[16].mxu1 %v6290_v7 }
 0x58f   :  { %4923 = vmatpush1.bf16.msra.mxu0 %v5957_v8  ;;  %4954 = vmatpush3.bf16.msra.mxu1 %v6015_v51 }
 0x590   :  { %4925 = vmatprep.subr.bf16.mxu0 %v5959_v9  ;;  %4955 = vmatprep.subr.bf16.mxu1 %v5838_v43 }
 0x591   :  { %1466 = vmatprep.mubr.f32.mxu0 %v5837_v0  ;;  %4188 = vmatprep.mubr.msk.f32.mxu1 %vm5839_vm1, %v5837_v0 }
 0x593   :  { %4927 = vmatpush1.bf16.msra.mxu0 %v5963_v14  ;;  %4957 = vmatpush3.bf16.msra.mxu1 %v6025_v60 }
 0x594   :  { %4929 = vmatprep.subr.bf16.mxu0 %v5966_v17  ;;  %4958 = vmatprep.subr.bf16.mxu1 %v5838_v43 }
 0x597   :  { %4931 = vmatpush1.bf16.msra.mxu0 %v5981_v26  ;;  %4960 = vmatpush3.bf16.msra.mxu1 %v6037_v6 }
 0x598   :  { %4933 = vmatprep.subr.bf16.mxu0 %v5990_v29  ;;  %4961 = vmatprep.subr.bf16.mxu1 %v5838_v43 }
 0x59b   :  { %4935 = vmatpush1.bf16.msra.mxu0 %v5996_v36  ;;  %4963 = vmatpush3.bf16.msra.mxu1 %v6045_v12 }
 0x59c   :  { %4937 = vmatprep.subr.bf16.mxu0 %v6000_v38  ;;  %4964 = vmatprep.subr.bf16.mxu1 %v5838_v43 }
 0x59f   :  { %4939 = vmatpush1.bf16.msra.mxu0 %v6008_v46  ;;  %4966 = vmatpush3.bf16.msra.mxu1 %v6050_v16 }
 0x5a0   :  { %4941 = vmatprep.subr.bf16.mxu0 %v6012_v47  ;;  %4967 = vmatprep.subr.bf16.mxu1 %v5838_v43 }
 0x5a3   :  { %4943 = vmatpush1.bf16.msra.mxu0 %v6018_v55  ;;  %4969 = vmatpush3.bf16.msra.mxu1 %v6058_v20 }
 0x5a4   :  { %4945 = vmatprep.subr.bf16.mxu0 %v6022_v56  ;;  %4970 = vmatprep.subr.bf16.mxu1 %v5838_v43 }
 0x5a7   :  { %4947 = vmatpush1.bf16.msra.mxu0 %v6031_v1  ;;  %4972 = vmatpush3.bf16.msra.mxu1 %v6064_v23 }
 0x5a8   :  { %4949 = vmatprep.subr.bf16.mxu0 %v6034_v2  ;;  %4973 = vmatprep.subr.bf16.mxu1 %v5838_v43 }
 0x5ab   :  { %4951 = vmatpush1.bf16.msra.mxu0 %v6041_v11  ;;  %4975 = vmatpush3.bf16.msra.mxu1 %v6070_v27 }
 0x5ac   :  { %4977 = vmatprep.subr.bf16.mxu0 %v5955_v4  ;;  %5008 = vmatprep.subr.bf16.mxu1 %v5838_v43 }
 0x661   :  { %v1284_v10 = vpop.f32.mrb[10].mxu0  ;;  %v1355_v13 = vpop.f32.mrb[16].mxu1 }
 0x662   :  { %v1360_v15 = vrot.slane %v1284_v10, 6  ;;  %v1286_v18 = vpop.f32.mrb[11].mxu0  ;;  %v4155_v21 = vpop.f32.mrb[17].mxu1  ;;  %v1379_v4 = vadd.f32 %v6122_v19, %v1355_v13 }
 0x663   :  { %v1370_v28 = vrot.slane %v1286_v18, 6  ;;  %v1766_v21 = vld [vmem:[#allocation7] sm:$0xff] }
 0x664   :  { %v1362_v24 = vadd.f32 %v1360_v15, %v1215_v22  ;;  %v1381_v40 = vrot.slane %v1379_v4, 6  ;;  %v1769_v22 = vld [vmem:[#allocation7 + $0x18] sm:$0xff]  ;;  %v1782_v4 = vld [vmem:[#allocation7 + $0x80] sm:$0xff] }
 0x665   :  { %v1372_v34 = vadd.f32 %v1370_v28, %v1216_v32  ;;  %v5034_v28 = vpack.c.bf16 %v1769_v22, %v1766_v21  ;;  %v1992_v21 = vld [vmem:[#allocation9 + $0x18] sm:$0xff] }
 0x666   :  { %v3604_v25 = vmul.f32 -1.442695, %v1362_v24  ;;  %v1773_v24 = vld [vmem:[#allocation7 + $0x38] sm:$0xff] }
 0x667   :  { %v3605_v39 = vmul.f32 -1.442695, %v1372_v34 }
 0x668   :  { %5627 = vpow2.f32 %v3604_v25 }
 0x672   :  { %v5628_v35 = vpop.eup %5627 }
 0x673   :  { %v1366_v37 = vadd.f32 1.0, %v5628_v35  ;;  %v1772_v35 = vld [vmem:[#allocation7 + $0x30] sm:$0xff] }
 0x675   :  { %5629 = vrcp.f32 %v1366_v37  ;;  %v1775_v37 = vld [vmem:[#allocation7 + $0x48] sm:$0xff] }
 0x676   :  { %5631 = vpow2.f32 %v3605_v39  ;;  %v1779_v39 = vld [vmem:[#allocation7 + $0x68] sm:$0xff] }
 0x67f   :  { %v5630_v42 = vpop.eup %5629 }
 0x680   :  { %v1383_v44 = vmul.f32 %v5630_v42, %v1381_v40  ;;  %v5632_v49 = vpop.eup %5631  ;;  %v1764_v40 = vld [vmem:[#allocation3] sm:$0xff]  ;;  %v5038_v42 = vpack.c.bf16 %v1775_v37, %v1772_v35 }
 0x681   :  { %v1376_v50 = vadd.f32 1.0, %v5632_v49  ;;  %v1785_v49 = vld [vmem:[#allocation7 + $0x98] sm:$0xff]  ;;  %v1995_v37 = vld [vmem:[#allocation9 + $0x30] sm:$0xff] }
 0x682   :  { %v1384_v48 = vadd.f32 %v1383_v44, %v1217_v45  ;;  %v5040_v44 = vpack.c.bf16 %v1782_v4, %v1779_v39  ;;  %v1778_v45 = vld [vmem:[#allocation7 + $0x60] sm:$0xff]  ;;  %v1998_v39 = vld [vmem:[#allocation9 + $0x48] sm:$0xff] }
 0x683   :  { %v6385_v4 = vpack.c.bf16 %v1998_v39, %v1995_v37 }
 0x684   :  { %5633 = vtanh.f32 %v1384_v48  ;;  %v1781_v48 = vld [vmem:[#allocation7 + $0x78] sm:$0xff] }
 0x685   :  { %5635 = vrcp.f32 %v1376_v50  ;;  %v1788_v50 = vld [vmem:[#allocation7 + $0xb0] sm:$0xff] }
 0x68e   :  { %v5634_v52 = vpop.eup %5633 }
 0x68f   :  { %v1387_v53 = vrot.slane %v5634_v52, 2  ;;  %v5636_v58 = vpop.eup %5635 }
 0x691   :  { %v1389_v54 = vsub.f32 %v6290_v7, %v1387_v53  ;;  %v5044_v53 = vpack.c.bf16 %v1788_v50, %v1785_v49  ;;  %v2001_v50 = vld [vmem:[#allocation9 + $0x60] sm:$0xff] }
 0x693   :  { %v1391_v57 = vrot.slane %v1389_v54, 6  ;;  %v1784_v54 = vld [vmem:[#allocation7 + $0x90] sm:$0xff] }
 0x695   :  { %v1393_v59 = vmul.f32 %v5636_v58, %v1391_v57  ;;  %v1787_v57 = vld [vmem:[#allocation7 + $0xa8] sm:$0xff] }
 0x696   :  { %v1791_v58 = vld [vmem:[#allocation7 + $0xc8] sm:$0xff] }
 0x697   :  { %v6332_v61 = vadd.f32 %v5634_v52, %v1393_v59  ;;  %v5042_v52 = vpack.c.bf16 %v1781_v48, %v1778_v45  ;;  %v1794_v59 = vld [vmem:[#allocation7 + $0xe0] sm:$0xff]  ;;  %v2002_v45 = vld [vmem:[#allocation9 + $0x68] sm:$0xff] }
 0x698   :  { %v2005_v48 = vld [vmem:[#allocation9 + $0x80] sm:$0xff] }
 0x699   :  { %1395 = vst [vmem:[#allocation3 + $0x8] sm:$0xc] %v6332_v61  ;;  %v1400_v62 = vrot.slane %v6332_v61, 2  ;;  %v6389_v49 = vpack.c.bf16 %v2005_v48, %v2002_v45  ;;  %v1580_v45 = vld [vmem:[#allocation2 + $0x18] sm:$0xc0] }
 0x69b   :  { %1467 = vmatmul.mubr.f32.vlgmr.msra.gmra.mrb[12].mxu0 %v1400_v62  ;;  %4189 = vmatmul.mubr.f32.vlgmr.msra.gmra.mrb[18].mxu1 %v1400_v62  ;;  %v5048_v62 = vpack.c.bf16 %v1794_v59, %v1791_v58  ;;  %v2008_v59 = vld [vmem:[#allocation9 + $0x98] sm:$0xff] }
 0x69c   :  { %4979 = vmatpush1.bf16.msra.mxu0 %v5957_v8  ;;  %5010 = vmatpush3.bf16.msra.mxu1 %v6015_v51  ;;  %v1767_v8 = vld [vmem:[#allocation7 + $0x8] sm:$0xff] }
 0x69d   :  { %4981 = vmatprep.subr.bf16.mxu0 %v5959_v9  ;;  %5011 = vmatprep.subr.bf16.mxu1 %v5838_v43  ;;  %v1770_v9 = vld [vmem:[#allocation7 + $0x20] sm:$0xff] }
 0x69e   :  { %1650 = vmatprep.mubr.f32.mxu0 %v5837_v0  ;;  %4223 = vmatprep.mubr.msk.f32.mxu1 %vm5839_vm1, %v5837_v0 }
 0x6a0   :  { %4983 = vmatpush1.bf16.msra.mxu0 %v5963_v14  ;;  %5013 = vmatpush3.bf16.msra.mxu1 %v6025_v60  ;;  %v5032_v14 = vpack.c.bf16 %v1770_v9, %v1767_v8  ;;  %v1790_v8 = vld [vmem:[#allocation7 + $0xc0] sm:$0xff]  ;;  %v1793_v9 = vld [vmem:[#allocation7 + $0xd8] sm:$0xff] }
 0x6a1   :  { %4985 = vmatprep.subr.bf16.mxu0 %v5966_v17  ;;  %5014 = vmatprep.subr.bf16.mxu1 %v5838_v43 }
 0x6a4   :  { %4987 = vmatpush1.bf16.msra.mxu0 %v5981_v26  ;;  %5016 = vmatpush3.bf16.msra.mxu1 %v6037_v6 }
 0x6a5   :  { %4989 = vmatprep.subr.bf16.mxu0 %v5990_v29  ;;  %5017 = vmatprep.subr.bf16.mxu1 %v5838_v43 }
 0x6a8   :  { %4991 = vmatpush1.bf16.msra.mxu0 %v5996_v36  ;;  %5019 = vmatpush3.bf16.msra.mxu1 %v6045_v12 }
 0x6a9   :  { %4993 = vmatprep.subr.bf16.mxu0 %v6000_v38  ;;  %5020 = vmatprep.subr.bf16.mxu1 %v5838_v43 }
 0x6ac   :  { %4995 = vmatpush1.bf16.msra.mxu0 %v6008_v46  ;;  %5022 = vmatpush3.bf16.msra.mxu1 %v6050_v16  ;;  %v1396_v46 = vld [vmem:[#allocation2 + $0x18] sm:$0x30] }
 0x6ad   :  { %4997 = vmatprep.subr.bf16.mxu0 %v6012_v47  ;;  %5023 = vmatprep.subr.bf16.mxu1 %v5838_v43 }
 0x6b0   :  { %4999 = vmatpush1.bf16.msra.mxu0 %v6018_v55  ;;  %5025 = vmatpush3.bf16.msra.mxu1 %v6058_v20 }
 0x6b1   :  { %5001 = vmatprep.subr.bf16.mxu0 %v6022_v56  ;;  %5026 = vmatprep.subr.bf16.mxu1 %v5838_v43  ;;  %v1397_v56 = vld [vmem:[#allocation2 + $0x20] sm:$0x30] }
 0x6b4   :  { %5003 = vmatpush1.bf16.msra.mxu0 %v6031_v1  ;;  %5028 = vmatpush3.bf16.msra.mxu1 %v6064_v23  ;;  %v1398_v23 = vld [vmem:[#allocation2 + $0x28] sm:$0x30] }
 0x6b5   :  { %5005 = vmatprep.subr.bf16.mxu0 %v6034_v2  ;;  %5029 = vmatprep.subr.bf16.mxu1 %v5838_v43 }
 0x6b8   :  { %5007 = vmatpush1.bf16.msra.mxu0 %v6041_v11  ;;  %5031 = vmatpush3.bf16.msra.mxu1 %v6070_v27 }
 0x6b9   :  { %5033 = vmatprep.subr.bf16.mxu0 %v5032_v14  ;;  %v1797_v14 = vld [vmem:[#allocation7 + $0xf8] sm:$0xff] }
 0x76e   :  { %v1468_v17 = vpop.f32.mrb[12].mxu0  ;;  %v1539_v26 = vpop.f32.mrb[18].mxu1 }
 0x76f   :  { %v1544_v29 = vrot.slane %v1468_v17, 4  ;;  %v1470_v36 = vpop.f32.mrb[13].mxu0  ;;  %v4190_v38 = vpop.f32.mrb[19].mxu1  ;;  %v1563_v11 = vadd.f32 %v6122_v19, %v1539_v26  ;;  %v1776_v19 = vld [vmem:[#allocation7 + $0x50] sm:$0xff]  ;;  %v5050_v26 = vpack.c.bf16 %v1793_v9, %v1790_v8  ;;  %v2010_v9 = vld [vmem:[#allocation9 + $0xa8] sm:$0xff] }
 0x770   :  { %v1554_v55 = vrot.slane %v1470_v36, 4  ;;  %v5036_v34 = vpack.c.bf16 %v1776_v19, %v1773_v24  ;;  %v1800_v17 = vld [vmem:[#allocation7 + $0x110] sm:$0xff]  ;;  %v1799_v38 = vld [vmem:[#allocation7 + $0x108] sm:$0xff] }
 0x771   :  { %v1546_v47 = vadd.f32 %v1544_v29, %v1396_v46  ;;  %v1565_v12 = vrot.slane %v1563_v11, 4  ;;  %v5052_v29 = vpack.c.bf16 %v1800_v17, %v1797_v14  ;;  %v1796_v36 = vld [vmem:[#allocation7 + $0xf0] sm:$0xff]  ;;  %v1803_v46 = vld [vmem:[#allocation7 + $0x128] sm:$0xff]  ;;  %v1798_v17 = vld [vmem:[#allocation7 + $0x100] sm:$0xff] }
 0x772   :  { %v1556_v60 = vadd.f32 %v1554_v55, %v1397_v56  ;;  %v1802_v56 = vld [vmem:[#allocation7 + $0x120] sm:$0xff]  ;;  %v1780_v24 = vld [vmem:[#allocation7 + $0x70] sm:$0xff]  ;;  %v1783_v19 = vld [vmem:[#allocation7 + $0x88] sm:$0xff] }
 0x773   :  { %v3606_v51 = vmul.f32 -1.442695, %v1546_v47  ;;  %v1806_v47 = vld [vmem:[#allocation7 + $0x140] sm:$0xff]  ;;  %v2007_v8 = vld [vmem:[#allocation9 + $0x90] sm:$0xff] }
 0x774   :  { %v3607_v6 = vmul.f32 -1.442695, %v1556_v60  ;;  %v5056_v55 = vpack.c.bf16 %v1806_v47, %v1803_v46  ;;  %v1805_v60 = vld [vmem:[#allocation7 + $0x138] sm:$0xff]  ;;  %v6397_v14 = vpack.c.bf16 %v2010_v9, %v2007_v8  ;;  %v2013_v47 = vld [vmem:[#allocation9 + $0xc0] sm:$0xff] }
 0x775   :  { %5637 = vpow2.f32 %v3606_v51  ;;  %v5054_v51 = vpack.c.bf16 %v1799_v38, %v1796_v36  ;;  %v2014_v36 = vld [vmem:[#allocation9 + $0xc8] sm:$0xff]  ;;  %v2017_v38 = vld [vmem:[#allocation9 + $0xe0] sm:$0xff] }
 0x776   :  { %v6401_v46 = vpack.c.bf16 %v2017_v38, %v2014_v36  ;;  %v5737_v8 = vld [vmem:[%s6853_s4] ss:$0 sm:$0xff] }
 0x77f   :  { %v5638_v1 = vpop.eup %5637 }
 0x780   :  { %v1550_v2 = vadd.f32 1.0, %v5638_v1  ;;  %v1809_v1 = vld [vmem:[#allocation7 + $0x158] sm:$0xff] }
 0x782   :  { %5639 = vrcp.f32 %v1550_v2  ;;  %v1812_v2 = vld [vmem:[#allocation7 + $0x170] sm:$0xff] }
 0x783   :  { %5641 = vpow2.f32 %v3607_v6  ;;  %v5058_v6 = vpack.c.bf16 %v1805_v60, %v1802_v56  ;;  %v5060_v11 = vpack.c.bf16 %v1812_v2, %v1809_v1  ;;  %v1804_v56 = vld [vmem:[#allocation7 + $0x130] sm:$0xff]  ;;  %v1807_v60 = vld [vmem:[#allocation7 + $0x148] sm:$0xff]  ;;  %v2020_v2 = vld [vmem:[#allocation9 + $0xf8] sm:$0xff] }
 0x784   :  { %v5088_v1 = vpack.c.bf16 %v1807_v60, %v1804_v56 }
 0x78c   :  { %v5640_v16 = vpop.eup %5639 }
 0x78d   :  { %v1567_v20 = vmul.f32 %v5640_v16, %v1565_v12  ;;  %v5642_v63 = vpop.eup %5641  ;;  %v1808_v12 = vld [vmem:[#allocation7 + $0x150] sm:$0xff]  ;;  %v1811_v16 = vld [vmem:[#allocation7 + $0x168] sm:$0xff] }
 0x78e   :  { %v1560_v3 = vadd.f32 1.0, %v5642_v63 }
 0x78f   :  { %v1568_v27 = vadd.f32 %v1567_v20, %v1398_v23  ;;  %v5062_v20 = vpack.c.bf16 %v1811_v16, %v1808_v12  ;;  %v1768_v23 = vld [vmem:[#allocation7 + $0x10] sm:$0xff]  ;;  %v2022_v16 = vld [vmem:[#allocation9 + $0x108] sm:$0xff] }
 0x790   :  { %v2019_v12 = vld [vmem:[#allocation9 + $0xf0] sm:$0xff] }
 0x791   :  { %5643 = vtanh.f32 %v1568_v27  ;;  %v1771_v27 = vld [vmem:[#allocation7 + $0x28] sm:$0xff] }
 0x792   :  { %5645 = vrcp.f32 %v1560_v3  ;;  %v5064_v63 = vpack.c.bf16 %v1771_v27, %v1768_v23  ;;  %v1774_v3 = vld [vmem:[#allocation7 + $0x40] sm:$0xff]  ;;  %v1813_v27 = vld [vmem:[#allocation7 + $0x178] sm:$0xff] }
 0x793   :  { %v1810_v23 = vld [vmem:[#allocation7 + $0x160] sm:$0xff] }
 0x794   :  { %5065 = vmatprep.subr.bf16.mxu1 %v5064_v63 }
 0x79b   :  { %v5644_v5 = vpop.eup %5643 }
 0x79c   :  { %v1571_v7 = vrot.slane %v5644_v5, 2  ;;  %v5646_v15 = vpop.eup %5645 }
 0x79e   :  { %v1573_v10 = vsub.f32 %v6332_v61, %v1571_v7  ;;  %v5046_v61 = vpack.c.bf16 %v1787_v57, %v1784_v54  ;;  %v1792_v54 = vld [vmem:[#allocation7 + $0xd0] sm:$0xff]  ;;  %v1795_v57 = vld [vmem:[#allocation7 + $0xe8] sm:$0xff] }
 0x79f   :  { %v5080_v58 = vpack.c.bf16 %v1795_v57, %v1792_v54  ;;  %v1581_v54 = vld [vmem:[#allocation2 + $0x20] sm:$0xc0] }
 0x7a0   :  { %v1575_v13 = vrot.slane %v1573_v10, 6  ;;  %v1990_v10 = vld [vmem:[#allocation9 + $0x8] sm:$0xff] }
 0x7a2   :  { %v1577_v18 = vmul.f32 %v5646_v15, %v1575_v13  ;;  %v1993_v13 = vld [vmem:[#allocation9 + $0x20] sm:$0xff] }
 0x7a3   :  { %v6377_v15 = vpack.c.bf16 %v1993_v13, %v1990_v10  ;;  %v2028_v10 = vld [vmem:[#allocation9 + $0x138] sm:$0xff] }
 0x7a4   :  { %v6371_v25 = vadd.f32 %v5644_v5, %v1577_v18  ;;  %v1777_v5 = vld [vmem:[#allocation7 + $0x58] sm:$0xff]  ;;  %v1989_v18 = vld [vmem:[#allocation9] sm:$0xff] }
 0x7a5   :  { %v5068_v7 = vpack.c.bf16 %v1777_v5, %v1774_v3  ;;  %v6379_v22 = vpack.c.bf16 %v1992_v21, %v1989_v18  ;;  %v5092_v3 = vpack.c.bf16 %v1813_v27, %v1810_v23  ;;  %v2029_v5 = vld [vmem:[#allocation9 + $0x140] sm:$0xff]  ;;  %v2032_v21 = vld [vmem:[#allocation9 + $0x158] sm:$0xff] }
 0x7a6   :  { %1579 = vst [vmem:[#allocation3 + $0x8] sm:$0x30] %v6371_v25  ;;  %v1584_v32 = vrot.slane %v6371_v25, 4 }
 0x7a8   :  { %1651 = vmatmul.mubr.f32.vlgmr.msra.gmra.mrb[14].mxu0 %v1584_v32  ;;  %4224 = vmatmul.mubr.f32.vlgmr.msra.gmra.mrb[20].mxu1 %v1584_v32  ;;  %v1996_v32 = vld [vmem:[#allocation9 + $0x38] sm:$0xff] }
 0x7a9   :  { %5035 = vmatpush1.bf16.msra.mxu0 %v5034_v28  ;;  %4258 = vmatprep.mubr.f32.mxu1 %v1764_v40  ;;  %v5072_v28 = vpack.c.bf16 %v1783_v19, %v1780_v24  ;;  %v2035_v24 = vld [vmem:[#allocation9 + $0x170] sm:$0xff] }
 0x7aa   :  { %5037 = vmatprep.subr.bf16.mxu0 %v5036_v34  ;;  %1895 = vmatprep.mubr.f32.mxu0 %v5837_v0  ;;  %v1999_v34 = vld [vmem:[#allocation9 + $0x50] sm:$0xff]  ;;  %v6420_v19 = vpack.c.bf16 %v2035_v24, %v2032_v21  ;;  %v1997_v24 = vld [vmem:[#allocation9 + $0x40] sm:$0xff] }
 0x7ab   :  { %5067 = vmatpush3.bf16.msra.mxu1 %v5064_v63  ;;  %v6383_v35 = vpack.c.bf16 %v1999_v34, %v1996_v32  ;;  %v2026_v63 = vld [vmem:[#allocation9 + $0x128] sm:$0xff] }
 0x7ac   :  { %5069 = vmatprep.subr.bf16.mxu1 %v5068_v7  ;;  %v6413_v13 = vpack.c.bf16 %v2029_v5, %v2026_v63  ;;  %v2034_v32 = vld [vmem:[#allocation9 + $0x168] sm:$0xff] }
 0x7ad   :  { %5039 = vmatpush1.bf16.msra.mxu0 %v5038_v42  ;;  %v1789_v42 = vld [vmem:[#allocation7 + $0xb8] sm:$0xff] }
 0x7ae   :  { %5041 = vmatprep.subr.bf16.mxu0 %v5040_v44 }
 0x7af   :  { %5071 = vmatpush3.bf16.msra.mxu1 %v5068_v7  ;;  %v2025_v7 = vld [vmem:[#allocation9 + $0x120] sm:$0xff] }
 0x7b0   :  { %5073 = vmatprep.subr.bf16.mxu1 %v5072_v28  ;;  %v6415_v18 = vpack.c.bf16 %v2028_v10, %v2025_v7  ;;  %v1991_v7 = vld [vmem:[#allocation9 + $0x10] sm:$0xff]  ;;  %v1994_v10 = vld [vmem:[#allocation9 + $0x28] sm:$0xff] }
 0x7b1   :  { %5043 = vmatpush1.bf16.msra.mxu0 %v5042_v52  ;;  %v2004_v52 = vld [vmem:[#allocation9 + $0x78] sm:$0xff]  ;;  %v6448_v21 = vpack.c.bf16 %v1994_v10, %v1991_v7 }
 0x7b2   :  { %5045 = vmatprep.subr.bf16.mxu0 %v5044_v53  ;;  %v6391_v53 = vpack.c.bf16 %v2004_v52, %v2001_v50 }
 0x7b3   :  { %5075 = vmatpush3.bf16.msra.mxu1 %v5072_v28  ;;  %v2031_v28 = vld [vmem:[#allocation9 + $0x150] sm:$0xff] }
 0x7b4   :  { %v6422_v34 = vpack.c.bf16 %v2034_v32, %v2031_v28  ;;  %v2000_v28 = vld [vmem:[#allocation9 + $0x58] sm:$0xff] }
 0x7b5   :  { %5047 = vmatpush1.bf16.msra.mxu0 %v5046_v61  ;;  %v2011_v61 = vld [vmem:[#allocation9 + $0xb0] sm:$0xff] }
 0x7b6   :  { %5049 = vmatprep.subr.bf16.mxu0 %v5048_v62  ;;  %v6395_v62 = vpack.c.bf16 %v2011_v61, %v2008_v59 }
 0x7b9   :  { %5051 = vmatpush1.bf16.msra.mxu0 %v5050_v26  ;;  %v1801_v26 = vld [vmem:[#allocation7 + $0x118] sm:$0xff] }
 0x7ba   :  { %5053 = vmatprep.subr.bf16.mxu0 %v5052_v29  ;;  %v5084_v29 = vpack.c.bf16 %v1801_v26, %v1798_v17  ;;  %v6433_v17 = vld [vmem:[%s6856_s7] sm:$0x7] }
 0x7bb   :  { %v6443_v38 = vrot.slane %v6433_v17, %v96_v33 }
 0x7bd   :  { %5055 = vmatpush1.bf16.msra.mxu0 %v5054_v51  ;;  %v2016_v51 = vld [vmem:[#allocation9 + $0xd8] sm:$0xff] }
 0x7be   :  { %5057 = vmatprep.subr.bf16.mxu0 %v5056_v55  ;;  %v6403_v55 = vpack.c.bf16 %v2016_v51, %v2013_v47  ;;  %v1582_v51 = vld [vmem:[#allocation2 + $0x28] sm:$0xc0] }
 0x7c1   :  { %5059 = vmatpush1.bf16.msra.mxu0 %v5058_v6  ;;  %v2023_v6 = vld [vmem:[#allocation9 + $0x110] sm:$0xff] }
 0x7c2   :  { %5061 = vmatprep.subr.bf16.mxu0 %v5060_v11  ;;  %v6407_v11 = vpack.c.bf16 %v2023_v6, %v2020_v2 }
 0x7c5   :  { %5063 = vmatpush1.bf16.msra.mxu0 %v5062_v20  ;;  %v6409_v20 = vpack.c.bf16 %v2022_v16, %v2019_v12 }
 0x7c6   :  { %5097 = vmatprep.subr.bf16.mxu0 %v6377_v15 }
 0x7c8   :  { %1896 = vmatmul.mubr.f32.vlgmr.msra.gmra.mrb[16].mxu0 %v1764_v40  ;;  %v1786_v40 = vld [vmem:[#allocation7 + $0xa0] sm:$0xff] }
 0x7c9   :  { %1901 = vmatprep.mubr.f32.mxu0 %v5837_v0  ;;  %5099 = vmatpush1.bf16.msra.mxu0 %v6379_v22  ;;  %v5076_v44 = vpack.c.bf16 %v1789_v42, %v1786_v40 }
 0x7ca   :  { %5101 = vmatprep.subr.bf16.mxu0 %v6383_v35 }
 0x7cb   :  { %5077 = vmatprep.subr.bf16.mxu1 %v5076_v44 }
 0x7cc   :  { %5079 = vmatpush3.bf16.msra.mxu1 %v5076_v44 }
 0x7cd   :  { %5103 = vmatpush1.bf16.msra.mxu0 %v6385_v4  ;;  %5081 = vmatprep.subr.bf16.mxu1 %v5080_v58 }
 0x7ce   :  { %5105 = vmatprep.subr.bf16.mxu0 %v6389_v49 }
 0x7d0   :  { %5083 = vmatpush3.bf16.msra.mxu1 %v5080_v58 }
 0x7d1   :  { %5107 = vmatpush1.bf16.msra.mxu0 %v6391_v53  ;;  %5085 = vmatprep.subr.bf16.mxu1 %v5084_v29 }
 0x7d2   :  { %5109 = vmatprep.subr.bf16.mxu0 %v6395_v62 }
 0x7d4   :  { %5087 = vmatpush3.bf16.msra.mxu1 %v5084_v29  ;;  %v6438_v29 = vrot.slane %v6433_v17, %v92_v31 }
 0x7d5   :  { %5111 = vmatpush1.bf16.msra.mxu0 %v6397_v14  ;;  %5089 = vmatprep.subr.bf16.mxu1 %v5088_v1 }
 0x7d6   :  { %5113 = vmatprep.subr.bf16.mxu0 %v6401_v46 }
 0x7d8   :  { %5091 = vmatpush3.bf16.msra.mxu1 %v5088_v1 }
 0x7d9   :  { %5115 = vmatpush1.bf16.msra.mxu0 %v6403_v55  ;;  %5093 = vmatprep.subr.bf16.mxu1 %v5092_v3 }
 0x7da   :  { %5117 = vmatprep.subr.bf16.mxu0 %v6407_v11 }
 0x7dc   :  { %5095 = vmatpush3.bf16.msra.mxu1 %v5092_v3 }
 0x7dd   :  { %5119 = vmatpush1.bf16.msra.mxu0 %v6409_v20  ;;  %5128 = vmatprep.subr.bf16.mxu1 %v5838_v43 }
 0x7de   :  { %5121 = vmatprep.subr.bf16.mxu0 %v6413_v13 }
 0x7e1   :  { %5123 = vmatpush1.bf16.msra.mxu0 %v6415_v18 }
 0x7e2   :  { %5125 = vmatprep.subr.bf16.mxu0 %v6420_v19 }
 0x7e5   :  { %5127 = vmatpush1.bf16.msra.mxu0 %v6422_v34 }
 0x7e6   :  { %5153 = vmatprep.subr.bf16.mxu0 %v6377_v15 }
 0x87b   :  { %v1652_v37 = vpop.f32.mrb[14].mxu0  ;;  %v1723_v39 = vpop.f32.mrb[20].mxu1 }
 0x87c   :  { %v1728_v40 = vrot.slane %v1652_v37, 2  ;;  %v1654_v42 = vpop.f32.mrb[15].mxu0  ;;  %v4225_v44 = vpop.f32.mrb[21].mxu1  ;;  %v1747_v9 = vadd.f32 %v5737_v8, %v1723_v39  ;;  %v6452_v37 = vpack.c.bf16 %v2000_v28, %v1997_v24  ;;  %v2006_v39 = vld [vmem:[#allocation9 + $0x88] sm:$0xff] }
 0x87d   :  { %v1738_v52 = vrot.slane %v1654_v42, 2  ;;  %v2009_v42 = vld [vmem:[#allocation9 + $0xa0] sm:$0xff]  ;;  %v2012_v44 = vld [vmem:[#allocation9 + $0xb8] sm:$0xff] }
 0x87e   :  { %v1730_v48 = vadd.f32 %v1728_v40, %v1580_v45  ;;  %v1749_v26 = vrot.slane %v1747_v9, 2  ;;  %v6466_v45 = vpack.c.bf16 %v2012_v44, %v2009_v42  ;;  %v2033_v9 = vld [vmem:[#allocation9 + $0x160] sm:$0xff] }
 0x87f   :  { %v1740_v57 = vadd.f32 %v1738_v52, %v1581_v54  ;;  %v2021_v54 = vld [vmem:[#allocation9 + $0x100] sm:$0xff] }
 0x880   :  { %v3608_v50 = vmul.f32 -1.442695, %v1730_v48  ;;  %v2015_v48 = vld [vmem:[#allocation9 + $0xd0] sm:$0xff] }
 0x881   :  { %v3609_v61 = vmul.f32 -1.442695, %v1740_v57  ;;  %v2024_v57 = vld [vmem:[#allocation9 + $0x118] sm:$0xff] }
 0x882   :  { %5647 = vpow2.f32 %v3608_v50  ;;  %v2018_v50 = vld [vmem:[#allocation9 + $0xe8] sm:$0xff] }
 0x883   :  { %v6472_v52 = vpack.c.bf16 %v2018_v50, %v2015_v48 }
 0x88c   :  { %v5648_v58 = vpop.eup %5647 }
 0x88d   :  { %v1734_v59 = vadd.f32 1.0, %v5648_v58  ;;  %v6478_v58 = vpack.c.bf16 %v2024_v57, %v2021_v54 }
 0x88f   :  { %5649 = vrcp.f32 %v1734_v59  ;;  %v2027_v59 = vld [vmem:[#allocation9 + $0x130] sm:$0xff] }
 0x890   :  { %5651 = vpow2.f32 %v3609_v61  ;;  %v2030_v61 = vld [vmem:[#allocation9 + $0x148] sm:$0xff] }
 0x891   :  { %v6484_v8 = vpack.c.bf16 %v2030_v61, %v2027_v59 }
 0x899   :  { %v5650_v36 = vpop.eup %5649 }
 0x89a   :  { %v1751_v47 = vmul.f32 %v5650_v36, %v1749_v26  ;;  %v5652_v6 = vpop.eup %5651  ;;  %v2036_v26 = vld [vmem:[#allocation9 + $0x178] sm:$0xff] }
 0x89b   :  { %v1897_v56 = vpop.f32.mrb[16].mxu0  ;;  %v1744_v31 = vadd.f32 1.0, %v5652_v6  ;;  %v6490_v36 = vpack.c.bf16 %v2036_v26, %v2033_v9 }
 0x89c   :  { %v1752_v60 = vadd.f32 %v1751_v47, %v1582_v51  ;;  %v1898_v1 = vadd.f32 %v1897_v56, %v6438_v29  ;;  %v1899_v2 = vpop.f32.mrb[17].mxu0  ;;  %v1827_v47 = vrot.slane %v6433_v17, %v100_v41 }
 0x89d   :  { %v1900_v12 = vadd.f32 %v1899_v2, %v6443_v38 }
 0x89e   :  { %5653 = vtanh.f32 %v1752_v60  ;;  %1983 = vst [vmem:[#allocation2] sm:$0xff] %v1898_v1 }
 0x89f   :  { %1984 = vst [vmem:[#allocation2 + $0x8] sm:$0xff] %v1900_v12  ;;  %5655 = vrcp.f32 %v1744_v31 }
 0x8a6   :  { %v2045_v41 = vld [vmem:[#allocation2 + $0x8] sm:$0x3] }
 0x8a8   :  { %v5654_v16 = vpop.eup %5653 }
 0x8a9   :  { %v1755_v23 = vrot.slane %v5654_v16, 2  ;;  %v5656_v63 = vpop.eup %5655 }
 0x8ab   :  { %v1757_v33 = vsub.f32 %v6371_v25, %v1755_v23  ;;  %v2003_v25 = vld [vmem:[#allocation9 + $0x70] sm:$0xff] }
 0x8ac   :  { %v6459_v40 = vpack.c.bf16 %v2006_v39, %v2003_v25 }
 0x8ad   :  { %v1759_v27 = vrot.slane %v1757_v33, 6 }
 0x8af   :  { %v1761_v3 = vmul.f32 %v5656_v63, %v1759_v27 }
 0x8b1   :  { %v1762_v5 = vadd.f32 %v5654_v16, %v1761_v3  ;;  %v2044_v16 = vld [vmem:[#allocation2] sm:$0x3] }
 0x8b3   :  { %1763 = vst [vmem:[#allocation3 + $0x8] sm:$0xc0] %v1762_v5 }
 0x8ba   :  { %v1765_v32 = vld [vmem:[#allocation3 + $0x8] sm:$0xff] }
 0x8bb   :  { %1902 = vmatmul.mubr.f32.gmra.mrb[18].mxu0 %v1765_v32  ;;  %4259 = vmatmul.mubr.f32.vlgmr.msra.gmra.mrb[22].mxu1 %v1765_v32 }
 0x8bc   :  { %5130 = vmatpush3.bf16.msra.mxu1 %v6448_v21  ;;  %2111 = vmatprep.mubr.f32.mxu0 %v5837_v0 }
 0x8bd   :  { %5131 = vmatprep.subr.bf16.mxu1 %v5838_v43  ;;  %4293 = vmatprep.mubr.msk.f32.mxu1 %vm5839_vm1, %v5837_v0 }
 0x8bf   :  { %2112 = vmatmul.mubr.f32.vlgmr.msra.gmra.mrb[20].mxu0 %v5837_v0 }
 0x8c0   :  { %5133 = vmatpush3.bf16.msra.mxu1 %v6452_v37  ;;  %5155 = vmatpush1.bf16.msra.mxu0 %v6379_v22 }
 0x8c1   :  { %5134 = vmatprep.subr.bf16.mxu1 %v5838_v43  ;;  %5157 = vmatprep.subr.bf16.mxu0 %v6383_v35 }
 0x8c2   :  { %2276 = vmatprep.mubr.f32.mxu0 %v5837_v0 }
 0x8c4   :  { %5136 = vmatpush3.bf16.msra.mxu1 %v6459_v40  ;;  %5159 = vmatpush1.bf16.msra.mxu0 %v6385_v4 }
 0x8c5   :  { %5137 = vmatprep.subr.bf16.mxu1 %v5838_v43  ;;  %5161 = vmatprep.subr.bf16.mxu0 %v6389_v49 }
 0x8c8   :  { %5139 = vmatpush3.bf16.msra.mxu1 %v6466_v45  ;;  %5163 = vmatpush1.bf16.msra.mxu0 %v6391_v53 }
 0x8c9   :  { %5140 = vmatprep.subr.bf16.mxu1 %v5838_v43  ;;  %5165 = vmatprep.subr.bf16.mxu0 %v6395_v62 }
 0x8cc   :  { %5142 = vmatpush3.bf16.msra.mxu1 %v6472_v52  ;;  %5167 = vmatpush1.bf16.msra.mxu0 %v6397_v14 }
 0x8cd   :  { %5143 = vmatprep.subr.bf16.mxu1 %v5838_v43  ;;  %5169 = vmatprep.subr.bf16.mxu0 %v6401_v46 }
 0x8d0   :  { %5145 = vmatpush3.bf16.msra.mxu1 %v6478_v58  ;;  %5171 = vmatpush1.bf16.msra.mxu0 %v6403_v55 }
 0x8d1   :  { %5146 = vmatprep.subr.bf16.mxu1 %v5838_v43  ;;  %5173 = vmatprep.subr.bf16.mxu0 %v6407_v11 }
 0x8d4   :  { %5148 = vmatpush3.bf16.msra.mxu1 %v6484_v8  ;;  %5175 = vmatpush1.bf16.msra.mxu0 %v6409_v20 }
 0x8d5   :  { %5149 = vmatprep.subr.bf16.mxu1 %v5838_v43  ;;  %5177 = vmatprep.subr.bf16.mxu0 %v6413_v13 }
 0x8d8   :  { %5151 = vmatpush3.bf16.msra.mxu1 %v6490_v36  ;;  %5179 = vmatpush1.bf16.msra.mxu0 %v6415_v18 }
 0x8d9   :  { %5184 = vmatprep.subr.bf16.mxu1 %v5838_v43  ;;  %5181 = vmatprep.subr.bf16.mxu0 %v6420_v19 }
 0x8db   :  { %4294 = vmatmul.mubr.f32.vlgmr.msra.gmra.mrb[24].mxu1 %v5837_v0 }
 0x8dc   :  { %5186 = vmatpush3.bf16.msra.mxu1 %v6448_v21  ;;  %5183 = vmatpush1.bf16.msra.mxu0 %v6422_v34 }
 0x8dd   :  { %5187 = vmatprep.subr.bf16.mxu1 %v5838_v43  ;;  %4328 = vmatprep.mubr.msk.f32.mxu1 %vm5839_vm1, %v5837_v0 }
 0x8de   :  { %5209 = vmatprep.subr.bf16.mxu0 %v6377_v15 }
 0x8e0   :  { %5189 = vmatpush3.bf16.msra.mxu1 %v6452_v37 }
 0x8e1   :  { %5190 = vmatprep.subr.bf16.mxu1 %v5838_v43 }
 0x8e4   :  { %5192 = vmatpush3.bf16.msra.mxu1 %v6459_v40 }
 0x8e5   :  { %5193 = vmatprep.subr.bf16.mxu1 %v5838_v43 }
 0x8e8   :  { %5195 = vmatpush3.bf16.msra.mxu1 %v6466_v45 }
 0x8e9   :  { %5196 = vmatprep.subr.bf16.mxu1 %v5838_v43 }
 0x8ec   :  { %5198 = vmatpush3.bf16.msra.mxu1 %v6472_v52 }
 0x8ed   :  { %5199 = vmatprep.subr.bf16.mxu1 %v5838_v43 }
 0x8f0   :  { %5201 = vmatpush3.bf16.msra.mxu1 %v6478_v58 }
 0x8f1   :  { %5202 = vmatprep.subr.bf16.mxu1 %v5838_v43 }
 0x8f4   :  { %5204 = vmatpush3.bf16.msra.mxu1 %v6484_v8 }
 0x8f5   :  { %5205 = vmatprep.subr.bf16.mxu1 %v5838_v43 }
 0x8f8   :  { %5207 = vmatpush3.bf16.msra.mxu1 %v6490_v36 }
 0x8f9   :  { %5240 = vmatprep.subr.bf16.mxu1 %v5838_v43 }
 0x98e   :  { %v1903_v51 = vpop.f32.mrb[18].mxu0  ;;  %v4260_v56 = vpop.f32.mrb[22].mxu1 }
 0x98f   :  { %v1904_v60 = vadd.f32 %v1903_v51, %v6438_v29  ;;  %v1980_v1 = vadd.f32 %v4260_v56, %v1827_v47  ;;  %v1905_v2 = vpop.f32.mrb[19].mxu0  ;;  %v1974_v6 = vpop.f32.mrb[23].mxu1  ;;  %v2209_v51 = vld [vmem:[#allocation2] sm:$0xc] }
 0x990   :  { %v1906_v12 = vadd.f32 %v1905_v2, %v6443_v38  ;;  %v1975_v31 = vadd.f32 %v1974_v6, %v1827_v47  ;;  %v6528_v38 = vld [vmem:[%s6857_s8] ss:$0 sm:$0xff]  ;;  %v2210_v2 = vld [vmem:[#allocation2 + $0x8] sm:$0xc] }
 0x991   :  { %1986 = vst [vmem:[#allocation2 + $0x18] sm:$0xff] %v1904_v60  ;;  %1988 = vst [vmem:[#allocation2 + $0x28] sm:$0xff] %v1980_v1 }
 0x992   :  { %1987 = vst [vmem:[#allocation2 + $0x20] sm:$0xff] %v1906_v12  ;;  %1985 = vst [vmem:[#allocation2 + $0x10] sm:$0xff] %v1975_v31  ;;  %v2113_v23 = vpop.f32.mrb[20].mxu0 }
 0x993   :  { %v2188_v33 = vadd.f32 %v2113_v23, %v2044_v16  ;;  %v2115_v30 = vpop.f32.mrb[21].mxu0 }
 0x994   :  { %v2195_v17 = vadd.f32 %v2115_v30, %v2045_v41 }
 0x995   :  { %v3611_v27 = vmul.f32 -1.442695, %v2188_v33 }
 0x996   :  { %v3612_v3 = vmul.f32 -1.442695, %v2195_v17 }
 0x997   :  { %5657 = vpow2.f32 %v3611_v27 }
 0x999   :  { %v2046_v25 = vld [vmem:[#allocation2 + $0x10] sm:$0x3]  ;;  %v2211_v41 = vld [vmem:[#allocation2 + $0x10] sm:$0xc] }
 0x9a1   :  { %v5658_v63 = vpop.eup %5657 }
 0x9a2   :  { %v2192_v29 = vadd.f32 1.0, %v5658_v63 }
 0x9a4   :  { %5659 = vrcp.f32 %v2192_v29 }
 0x9a5   :  { %5661 = vpow2.f32 %v3612_v3 }
 0x9ae   :  { %v5660_v5 = vpop.eup %5659  ;;  %v2184_v7 = vpop.f32.mrb[24].mxu1 }
 0x9af   :  { %v2202_v10 = vadd.f32 %v6528_v38, %v2184_v7  ;;  %v4295_v24 = vpop.f32.mrb[25].mxu1  ;;  %v5662_v28 = vpop.eup %5661 }
 0x9b0   :  { %v2199_v39 = vadd.f32 1.0, %v5662_v28 }
 0x9b1   :  { %v2203_v32 = vmul.f32 %v5660_v5, %v2202_v10 }
 0x9b3   :  { %v2204_v42 = vadd.f32 %v2203_v32, %v2046_v25 }
 0x9b5   :  { %5663 = vtanh.f32 %v2204_v42 }
 0x9b6   :  { %5665 = vrcp.f32 %v2199_v39 }
 0x9bf   :  { %v5664_v44 = vpop.eup %5663 }
 0x9c0   :  { %v2206_v48 = vsub.f32 0.0, %v5664_v44  ;;  %v5666_v50 = vpop.eup %5665 }
 0x9c2   :  { %v2207_v54 = vmul.f32 %v5666_v50, %v2206_v48 }
 0x9c4   :  { %v6531_v57 = vadd.f32 %v5664_v44, %v2207_v54  ;;  %v2389_v54 = vld [vmem:[#allocation2] sm:$0x30] }
 0x9c6   :  { %2277 = vmatmul.mubr.f32.vlgmr.msra.gmra.mrb[22].mxu0 %v6531_v57  ;;  %4329 = vmatmul.mubr.f32.vlgmr.msra.gmra.mrb[26].mxu1 %v6531_v57 }
 0x9c7   :  { %5211 = vmatpush1.bf16.msra.mxu0 %v6379_v22  ;;  %5242 = vmatpush3.bf16.msra.mxu1 %v6448_v21 }
 0x9c8   :  { %5213 = vmatprep.subr.bf16.mxu0 %v6383_v35  ;;  %5243 = vmatprep.subr.bf16.mxu1 %v5838_v43 }
 0x9c9   :  { %2459 = vmatprep.mubr.f32.mxu0 %v5837_v0  ;;  %4363 = vmatprep.mubr.msk.f32.mxu1 %vm5839_vm1, %v5837_v0 }
 0x9cb   :  { %5215 = vmatpush1.bf16.msra.mxu0 %v6385_v4  ;;  %5245 = vmatpush3.bf16.msra.mxu1 %v6452_v37 }
 0x9cc   :  { %5217 = vmatprep.subr.bf16.mxu0 %v6389_v49  ;;  %5246 = vmatprep.subr.bf16.mxu1 %v5838_v43 }
 0x9cf   :  { %5219 = vmatpush1.bf16.msra.mxu0 %v6391_v53  ;;  %5248 = vmatpush3.bf16.msra.mxu1 %v6459_v40 }
 0x9d0   :  { %5221 = vmatprep.subr.bf16.mxu0 %v6395_v62  ;;  %5249 = vmatprep.subr.bf16.mxu1 %v5838_v43 }
 0x9d3   :  { %5223 = vmatpush1.bf16.msra.mxu0 %v6397_v14  ;;  %5251 = vmatpush3.bf16.msra.mxu1 %v6466_v45 }
 0x9d4   :  { %5225 = vmatprep.subr.bf16.mxu0 %v6401_v46  ;;  %5252 = vmatprep.subr.bf16.mxu1 %v5838_v43 }
 0x9d7   :  { %5227 = vmatpush1.bf16.msra.mxu0 %v6403_v55  ;;  %5254 = vmatpush3.bf16.msra.mxu1 %v6472_v52 }
 0x9d8   :  { %5229 = vmatprep.subr.bf16.mxu0 %v6407_v11  ;;  %5255 = vmatprep.subr.bf16.mxu1 %v5838_v43 }
 0x9db   :  { %5231 = vmatpush1.bf16.msra.mxu0 %v6409_v20  ;;  %5257 = vmatpush3.bf16.msra.mxu1 %v6478_v58 }
 0x9dc   :  { %5233 = vmatprep.subr.bf16.mxu0 %v6413_v13  ;;  %5258 = vmatprep.subr.bf16.mxu1 %v5838_v43 }
 0x9df   :  { %5235 = vmatpush1.bf16.msra.mxu0 %v6415_v18  ;;  %5260 = vmatpush3.bf16.msra.mxu1 %v6484_v8 }
 0x9e0   :  { %5237 = vmatprep.subr.bf16.mxu0 %v6420_v19  ;;  %5261 = vmatprep.subr.bf16.mxu1 %v5838_v43 }
 0x9e3   :  { %5239 = vmatpush1.bf16.msra.mxu0 %v6422_v34  ;;  %5263 = vmatpush3.bf16.msra.mxu1 %v6490_v36 }
 0x9e4   :  { %5265 = vmatprep.subr.bf16.mxu0 %v6377_v15  ;;  %5296 = vmatprep.subr.bf16.mxu1 %v5838_v43 }
 0xa99   :  { %v2278_v59 = vpop.f32.mrb[22].mxu0  ;;  %v2349_v61 = vpop.f32.mrb[26].mxu1 }
 0xa9a   :  { %v2354_v9 = vrot.slane %v2278_v59, 6  ;;  %v2280_v26 = vpop.f32.mrb[23].mxu0  ;;  %v4330_v47 = vpop.f32.mrb[27].mxu1  ;;  %v2373_v23 = vadd.f32 %v6528_v38, %v2349_v61 }
 0xa9b   :  { %v2364_v1 = vrot.slane %v2280_v26, 6 }
 0xa9c   :  { %v2356_v56 = vadd.f32 %v2354_v9, %v2209_v51  ;;  %v2375_v33 = vrot.slane %v2373_v23, 6  ;;  %v2390_v9 = vld [vmem:[#allocation2 + $0x8] sm:$0x30] }
 0xa9d   :  { %v2366_v6 = vadd.f32 %v2364_v1, %v2210_v2 }
 0xa9e   :  { %v3613_v60 = vmul.f32 -1.442695, %v2356_v56 }
 0xa9f   :  { %v3614_v16 = vmul.f32 -1.442695, %v2366_v6 }
 0xaa0   :  { %5667 = vpow2.f32 %v3613_v60 }
 0xaaa   :  { %v5668_v12 = vpop.eup %5667 }
 0xaab   :  { %v2360_v31 = vadd.f32 1.0, %v5668_v12  ;;  %v2391_v12 = vld [vmem:[#allocation2 + $0x10] sm:$0x30] }
 0xaad   :  { %5669 = vrcp.f32 %v2360_v31 }
 0xaae   :  { %5671 = vpow2.f32 %v3614_v16 }
 0xab7   :  { %v5670_v30 = vpop.eup %5669 }
 0xab8   :  { %v2377_v27 = vmul.f32 %v5670_v30, %v2375_v33  ;;  %v5672_v63 = vpop.eup %5671 }
 0xab9   :  { %v2370_v29 = vadd.f32 1.0, %v5672_v63 }
 0xaba   :  { %v2378_v17 = vadd.f32 %v2377_v27, %v2211_v41 }
 0xabc   :  { %5673 = vtanh.f32 %v2378_v17 }
 0xabd   :  { %5675 = vrcp.f32 %v2370_v29 }
 0xac6   :  { %v5674_v3 = vpop.eup %5673 }
 0xac7   :  { %v2381_v5 = vrot.slane %v5674_v3, 2  ;;  %v5676_v24 = vpop.eup %5675 }
 0xac9   :  { %v2383_v7 = vsub.f32 %v6531_v57, %v2381_v5 }
 0xacb   :  { %v2385_v10 = vrot.slane %v2383_v7, 6 }
 0xacd   :  { %v2387_v28 = vmul.f32 %v5676_v24, %v2385_v10 }
 0xacf   :  { %v6572_v32 = vadd.f32 %v5674_v3, %v2387_v28 }
 0xad1   :  { %v2393_v25 = vrot.slane %v6572_v32, 2 }
 0xad3   :  { %2460 = vmatmul.mubr.f32.vlgmr.msra.gmra.mrb[24].mxu0 %v2393_v25  ;;  %4364 = vmatmul.mubr.f32.vlgmr.msra.gmra.mrb[28].mxu1 %v2393_v25 }
 0xad4   :  { %5267 = vmatpush1.bf16.msra.mxu0 %v6379_v22  ;;  %5298 = vmatpush3.bf16.msra.mxu1 %v6448_v21 }
 0xad5   :  { %5269 = vmatprep.subr.bf16.mxu0 %v6383_v35  ;;  %5299 = vmatprep.subr.bf16.mxu1 %v5838_v43 }
 0xad6   :  { %2642 = vmatprep.mubr.f32.mxu0 %v5837_v0  ;;  %4398 = vmatprep.mubr.msk.f32.mxu1 %vm5839_vm1, %v5837_v0 }
 0xad8   :  { %5271 = vmatpush1.bf16.msra.mxu0 %v6385_v4  ;;  %5301 = vmatpush3.bf16.msra.mxu1 %v6452_v37 }
 0xad9   :  { %5273 = vmatprep.subr.bf16.mxu0 %v6389_v49  ;;  %5302 = vmatprep.subr.bf16.mxu1 %v5838_v43 }
 0xadc   :  { %5275 = vmatpush1.bf16.msra.mxu0 %v6391_v53  ;;  %5304 = vmatpush3.bf16.msra.mxu1 %v6459_v40 }
 0xadd   :  { %5277 = vmatprep.subr.bf16.mxu0 %v6395_v62  ;;  %5305 = vmatprep.subr.bf16.mxu1 %v5838_v43 }
 0xae0   :  { %5279 = vmatpush1.bf16.msra.mxu0 %v6397_v14  ;;  %5307 = vmatpush3.bf16.msra.mxu1 %v6466_v45 }
 0xae1   :  { %5281 = vmatprep.subr.bf16.mxu0 %v6401_v46  ;;  %5308 = vmatprep.subr.bf16.mxu1 %v5838_v43 }
 0xae4   :  { %5283 = vmatpush1.bf16.msra.mxu0 %v6403_v55  ;;  %5310 = vmatpush3.bf16.msra.mxu1 %v6472_v52 }
 0xae5   :  { %5285 = vmatprep.subr.bf16.mxu0 %v6407_v11  ;;  %5311 = vmatprep.subr.bf16.mxu1 %v5838_v43 }
 0xae8   :  { %5287 = vmatpush1.bf16.msra.mxu0 %v6409_v20  ;;  %5313 = vmatpush3.bf16.msra.mxu1 %v6478_v58 }
 0xae9   :  { %5289 = vmatprep.subr.bf16.mxu0 %v6413_v13  ;;  %5314 = vmatprep.subr.bf16.mxu1 %v5838_v43 }
 0xaec   :  { %5291 = vmatpush1.bf16.msra.mxu0 %v6415_v18  ;;  %5316 = vmatpush3.bf16.msra.mxu1 %v6484_v8 }
 0xaed   :  { %5293 = vmatprep.subr.bf16.mxu0 %v6420_v19  ;;  %5317 = vmatprep.subr.bf16.mxu1 %v5838_v43 }
 0xaf0   :  { %5295 = vmatpush1.bf16.msra.mxu0 %v6422_v34  ;;  %5319 = vmatpush3.bf16.msra.mxu1 %v6490_v36 }
 0xaf1   :  { %5321 = vmatprep.subr.bf16.mxu0 %v6377_v15  ;;  %5352 = vmatprep.subr.bf16.mxu1 %v5838_v43 }
 0xba6   :  { %v2461_v39 = vpop.f32.mrb[24].mxu0  ;;  %v2532_v42 = vpop.f32.mrb[28].mxu1 }
 0xba7   :  { %v2537_v44 = vrot.slane %v2461_v39, 4  ;;  %v2463_v48 = vpop.f32.mrb[25].mxu0  ;;  %v4365_v50 = vpop.f32.mrb[29].mxu1  ;;  %v2556_v60 = vadd.f32 %v6528_v38, %v2532_v42 }
 0xba8   :  { %v2547_v61 = vrot.slane %v2463_v48, 4 }
 0xba9   :  { %v2539_v57 = vadd.f32 %v2537_v44, %v2389_v54  ;;  %v2558_v1 = vrot.slane %v2556_v60, 4  ;;  %v2573_v44 = vld [vmem:[#allocation2 + $0x8] sm:$0xc0] }
 0xbaa   :  { %v2549_v26 = vadd.f32 %v2547_v61, %v2390_v9 }
 0xbab   :  { %v3615_v59 = vmul.f32 -1.442695, %v2539_v57 }
 0xbac   :  { %v3616_v56 = vmul.f32 -1.442695, %v2549_v26 }
 0xbad   :  { %5677 = vpow2.f32 %v3615_v59 }
 0xbb7   :  { %v5678_v47 = vpop.eup %5677 }
 0xbb8   :  { %v2543_v51 = vadd.f32 1.0, %v5678_v47  ;;  %v2574_v47 = vld [vmem:[#allocation2 + $0x10] sm:$0xc0] }
 0xbba   :  { %5679 = vrcp.f32 %v2543_v51 }
 0xbbb   :  { %5681 = vpow2.f32 %v3616_v56 }
 0xbc4   :  { %v5680_v2 = vpop.eup %5679 }
 0xbc5   :  { %v2560_v6 = vmul.f32 %v5680_v2, %v2558_v1  ;;  %v5682_v16 = vpop.eup %5681 }
 0xbc6   :  { %v2553_v23 = vadd.f32 1.0, %v5682_v16 }
 0xbc7   :  { %v2561_v31 = vadd.f32 %v2560_v6, %v2391_v12 }
 0xbc9   :  { %5683 = vtanh.f32 %v2561_v31 }
 0xbca   :  { %5685 = vrcp.f32 %v2553_v23 }
 0xbd3   :  { %v5684_v33 = vpop.eup %5683 }
 0xbd4   :  { %v2564_v30 = vrot.slane %v5684_v33, 2  ;;  %v5686_v17 = vpop.eup %5685 }
 0xbd6   :  { %v2566_v27 = vsub.f32 %v6572_v32, %v2564_v30  ;;  %v2572_v32 = vld [vmem:[#allocation2] sm:$0xc0]  ;;  %v2755_v30 = vld [vmem:[#allocation2 + $0x18] sm:$0x3] }
 0xbd8   :  { %v2568_v41 = vrot.slane %v2566_v27, 6 }
 0xbda   :  { %v2570_v63 = vmul.f32 %v5686_v17, %v2568_v41 }
 0xbdc   :  { %v6612_v29 = vadd.f32 %v5684_v33, %v2570_v63 }
 0xbde   :  { %v2576_v3 = vrot.slane %v6612_v29, 4 }
 0xbe0   :  { %2643 = vmatmul.mubr.f32.vlgmr.msra.gmra.mrb[26].mxu0 %v2576_v3  ;;  %4399 = vmatmul.mubr.f32.vlgmr.msra.gmra.mrb[30].mxu1 %v2576_v3 }
 0xbe1   :  { %5323 = vmatpush1.bf16.msra.mxu0 %v6379_v22  ;;  %5354 = vmatpush3.bf16.msra.mxu1 %v6448_v21 }
 0xbe2   :  { %5325 = vmatprep.subr.bf16.mxu0 %v6383_v35  ;;  %5355 = vmatprep.subr.bf16.mxu1 %v5838_v43 }
 0xbe3   :  { %2825 = vmatprep.mubr.f32.mxu0 %v5837_v0  ;;  %4433 = vmatprep.mubr.msk.f32.mxu1 %vm5839_vm1, %v5837_v0 }
 0xbe5   :  { %5327 = vmatpush1.bf16.msra.mxu0 %v6385_v4  ;;  %5357 = vmatpush3.bf16.msra.mxu1 %v6452_v37 }
 0xbe6   :  { %5329 = vmatprep.subr.bf16.mxu0 %v6389_v49  ;;  %5358 = vmatprep.subr.bf16.mxu1 %v5838_v43 }
 0xbe9   :  { %5331 = vmatpush1.bf16.msra.mxu0 %v6391_v53  ;;  %5360 = vmatpush3.bf16.msra.mxu1 %v6459_v40 }
 0xbea   :  { %5333 = vmatprep.subr.bf16.mxu0 %v6395_v62  ;;  %5361 = vmatprep.subr.bf16.mxu1 %v5838_v43 }
 0xbed   :  { %5335 = vmatpush1.bf16.msra.mxu0 %v6397_v14  ;;  %5363 = vmatpush3.bf16.msra.mxu1 %v6466_v45 }
 0xbee   :  { %5337 = vmatprep.subr.bf16.mxu0 %v6401_v46  ;;  %5364 = vmatprep.subr.bf16.mxu1 %v5838_v43 }
 0xbf1   :  { %5339 = vmatpush1.bf16.msra.mxu0 %v6403_v55  ;;  %5366 = vmatpush3.bf16.msra.mxu1 %v6472_v52 }
 0xbf2   :  { %5341 = vmatprep.subr.bf16.mxu0 %v6407_v11  ;;  %5367 = vmatprep.subr.bf16.mxu1 %v5838_v43 }
 0xbf5   :  { %5343 = vmatpush1.bf16.msra.mxu0 %v6409_v20  ;;  %5369 = vmatpush3.bf16.msra.mxu1 %v6478_v58 }
 0xbf6   :  { %5345 = vmatprep.subr.bf16.mxu0 %v6413_v13  ;;  %5370 = vmatprep.subr.bf16.mxu1 %v5838_v43 }
 0xbf9   :  { %5347 = vmatpush1.bf16.msra.mxu0 %v6415_v18  ;;  %5372 = vmatpush3.bf16.msra.mxu1 %v6484_v8 }
 0xbfa   :  { %5349 = vmatprep.subr.bf16.mxu0 %v6420_v19  ;;  %5373 = vmatprep.subr.bf16.mxu1 %v5838_v43 }
 0xbfd   :  { %5351 = vmatpush1.bf16.msra.mxu0 %v6422_v34  ;;  %5375 = vmatpush3.bf16.msra.mxu1 %v6490_v36 }
 0xbfe   :  { %5377 = vmatprep.subr.bf16.mxu0 %v6377_v15  ;;  %5408 = vmatprep.subr.bf16.mxu1 %v5838_v43 }
 0xcb3   :  { %v2644_v5 = vpop.f32.mrb[26].mxu0  ;;  %v2715_v7 = vpop.f32.mrb[30].mxu1 }
 0xcb4   :  { %v2720_v10 = vrot.slane %v2644_v5, 2  ;;  %v2646_v24 = vpop.f32.mrb[27].mxu0  ;;  %v4400_v28 = vpop.f32.mrb[31].mxu1  ;;  %v2739_v59 = vadd.f32 %v6528_v38, %v2715_v7  ;;  %v2756_v5 = vld [vmem:[#allocation2 + $0x20] sm:$0x3] }
 0xcb5   :  { %v2730_v42 = vrot.slane %v2646_v24, 2 }
 0xcb6   :  { %v2722_v25 = vadd.f32 %v2720_v10, %v2572_v32  ;;  %v2741_v61 = vrot.slane %v2739_v59, 2 }
 0xcb7   :  { %v2732_v48 = vadd.f32 %v2730_v42, %v2573_v44  ;;  %v2757_v42 = vld [vmem:[#allocation2 + $0x28] sm:$0x3] }
 0xcb8   :  { %v3617_v39 = vmul.f32 -1.442695, %v2722_v25 }
 0xcb9   :  { %v3618_v57 = vmul.f32 -1.442695, %v2732_v48 }
 0xcba   :  { %5687 = vpow2.f32 %v3617_v39 }
 0xcc4   :  { %v5688_v50 = vpop.eup %5687 }
 0xcc5   :  { %v2726_v54 = vadd.f32 1.0, %v5688_v50 }
 0xcc7   :  { %5689 = vrcp.f32 %v2726_v54 }
 0xcc8   :  { %5691 = vpow2.f32 %v3618_v57 }
 0xcd1   :  { %v5690_v9 = vpop.eup %5689 }
 0xcd2   :  { %v2743_v26 = vmul.f32 %v5690_v9, %v2741_v61  ;;  %v5692_v56 = vpop.eup %5691 }
 0xcd3   :  { %v2736_v60 = vadd.f32 1.0, %v5692_v56 }
 0xcd4   :  { %v2744_v51 = vadd.f32 %v2743_v26, %v2574_v47 }
 0xcd6   :  { %5693 = vtanh.f32 %v2744_v51 }
 0xcd7   :  { %5695 = vrcp.f32 %v2736_v60 }
 0xce0   :  { %v5694_v1 = vpop.eup %5693 }
 0xce1   :  { %v2747_v2 = vrot.slane %v5694_v1, 2  ;;  %v5696_v31 = vpop.eup %5695 }
 0xce3   :  { %v2749_v6 = vsub.f32 %v6612_v29, %v2747_v2 }
 0xce5   :  { %v2751_v12 = vrot.slane %v2749_v6, 6  ;;  %v2929_v6 = vld [vmem:[#allocation2 + $0x18] sm:$0xc] }
 0xce7   :  { %v2753_v16 = vmul.f32 %v5696_v31, %v2751_v12 }
 0xce9   :  { %v6652_v23 = vadd.f32 %v5694_v1, %v2753_v16 }
 0xceb   :  { %v2759_v33 = vrot.slane %v6652_v23, 6 }
 0xced   :  { %2826 = vmatmul.mubr.f32.vlgmr.msra.gmra.mrb[28].mxu0 %v2759_v33  ;;  %4434 = vmatmul.mubr.f32.vlgmr.msra.gmra.mrb[32].mxu1 %v2759_v33 }
 0xcee   :  { %5379 = vmatpush1.bf16.msra.mxu0 %v6379_v22  ;;  %5410 = vmatpush3.bf16.msra.mxu1 %v6448_v21 }
 0xcef   :  { %5381 = vmatprep.subr.bf16.mxu0 %v6383_v35  ;;  %5411 = vmatprep.subr.bf16.mxu1 %v5838_v43 }
 0xcf0   :  { %2996 = vmatprep.mubr.f32.mxu0 %v5837_v0  ;;  %4468 = vmatprep.mubr.msk.f32.mxu1 %vm5839_vm1, %v5837_v0 }
 0xcf2   :  { %5383 = vmatpush1.bf16.msra.mxu0 %v6385_v4  ;;  %5413 = vmatpush3.bf16.msra.mxu1 %v6452_v37 }
 0xcf3   :  { %5385 = vmatprep.subr.bf16.mxu0 %v6389_v49  ;;  %5414 = vmatprep.subr.bf16.mxu1 %v5838_v43 }
 0xcf6   :  { %5387 = vmatpush1.bf16.msra.mxu0 %v6391_v53  ;;  %5416 = vmatpush3.bf16.msra.mxu1 %v6459_v40 }
 0xcf7   :  { %5389 = vmatprep.subr.bf16.mxu0 %v6395_v62  ;;  %5417 = vmatprep.subr.bf16.mxu1 %v5838_v43 }
 0xcfa   :  { %5391 = vmatpush1.bf16.msra.mxu0 %v6397_v14  ;;  %5419 = vmatpush3.bf16.msra.mxu1 %v6466_v45 }
 0xcfb   :  { %5393 = vmatprep.subr.bf16.mxu0 %v6401_v46  ;;  %5420 = vmatprep.subr.bf16.mxu1 %v5838_v43 }
 0xcfe   :  { %5395 = vmatpush1.bf16.msra.mxu0 %v6403_v55  ;;  %5422 = vmatpush3.bf16.msra.mxu1 %v6472_v52 }
 0xcff   :  { %5397 = vmatprep.subr.bf16.mxu0 %v6407_v11  ;;  %5423 = vmatprep.subr.bf16.mxu1 %v5838_v43 }
 0xd02   :  { %5399 = vmatpush1.bf16.msra.mxu0 %v6409_v20  ;;  %5425 = vmatpush3.bf16.msra.mxu1 %v6478_v58 }
 0xd03   :  { %5401 = vmatprep.subr.bf16.mxu0 %v6413_v13  ;;  %5426 = vmatprep.subr.bf16.mxu1 %v5838_v43 }
 0xd06   :  { %5403 = vmatpush1.bf16.msra.mxu0 %v6415_v18  ;;  %5428 = vmatpush3.bf16.msra.mxu1 %v6484_v8 }
 0xd07   :  { %5405 = vmatprep.subr.bf16.mxu0 %v6420_v19  ;;  %5429 = vmatprep.subr.bf16.mxu1 %v5838_v43 }
 0xd0a   :  { %5407 = vmatpush1.bf16.msra.mxu0 %v6422_v34  ;;  %5431 = vmatpush3.bf16.msra.mxu1 %v6490_v36 }
 0xd0b   :  { %5433 = vmatprep.subr.bf16.mxu0 %v6377_v15  ;;  %5464 = vmatprep.subr.bf16.mxu1 %v5838_v43 }
 0xdc0   :  { %v2827_v27 = vpop.f32.mrb[28].mxu0  ;;  %v2898_v41 = vpop.f32.mrb[32].mxu1 }
 0xdc1   :  { %v2902_v17 = vadd.f32 %v2827_v27, %v2755_v30  ;;  %v2829_v63 = vpop.f32.mrb[29].mxu0  ;;  %v4435_v29 = vpop.f32.mrb[33].mxu1  ;;  %v2916_v32 = vadd.f32 %v6528_v38, %v2898_v41 }
 0xdc2   :  { %v2909_v7 = vadd.f32 %v2829_v63, %v2756_v5 }
 0xdc3   :  { %v3619_v3 = vmul.f32 -1.442695, %v2902_v17 }
 0xdc4   :  { %v3620_v28 = vmul.f32 -1.442695, %v2909_v7 }
 0xdc5   :  { %5697 = vpow2.f32 %v3619_v3  ;;  %v2931_v3 = vld [vmem:[#allocation2 + $0x28] sm:$0xc] }
 0xdcf   :  { %v5698_v10 = vpop.eup %5697 }
 0xdd0   :  { %v2906_v24 = vadd.f32 1.0, %v5698_v10 }
 0xdd2   :  { %5699 = vrcp.f32 %v2906_v24 }
 0xdd3   :  { %5701 = vpow2.f32 %v3620_v28 }
 0xddc   :  { %v5700_v25 = vpop.eup %5699 }
 0xddd   :  { %v2917_v39 = vmul.f32 %v5700_v25, %v2916_v32  ;;  %v5702_v48 = vpop.eup %5701 }
 0xdde   :  { %v2913_v50 = vadd.f32 1.0, %v5702_v48 }
 0xddf   :  { %v2918_v44 = vadd.f32 %v2917_v39, %v2757_v42 }
 0xde1   :  { %5703 = vtanh.f32 %v2918_v44 }
 0xde2   :  { %5705 = vrcp.f32 %v2913_v50 }
 0xdeb   :  { %v5704_v54 = vpop.eup %5703 }
 0xdec   :  { %v2921_v57 = vrot.slane %v5704_v54, 2  ;;  %v5706_v9 = vpop.eup %5705 }
 0xdee   :  { %v2923_v59 = vsub.f32 %v6652_v23, %v2921_v57  ;;  %v2930_v23 = vld [vmem:[#allocation2 + $0x20] sm:$0xc] }
 0xdf0   :  { %v2925_v61 = vrot.slane %v2923_v59, 6 }
 0xdf2   :  { %v2927_v26 = vmul.f32 %v5706_v9, %v2925_v61 }
 0xdf4   :  { %v6692_v47 = vadd.f32 %v5704_v54, %v2927_v26 }
 0xdf6   :  { %2997 = vmatmul.mubr.f32.vlgmr.msra.gmra.mrb[30].mxu0 %v6692_v47  ;;  %4469 = vmatmul.mubr.f32.vlgmr.msra.gmra.mrb[34].mxu1 %v6692_v47 }
 0xdf7   :  { %5435 = vmatpush1.bf16.msra.mxu0 %v6379_v22  ;;  %5466 = vmatpush3.bf16.msra.mxu1 %v6448_v21 }
 0xdf8   :  { %5437 = vmatprep.subr.bf16.mxu0 %v6383_v35  ;;  %5467 = vmatprep.subr.bf16.mxu1 %v5838_v43 }
 0xdf9   :  { %3179 = vmatprep.mubr.f32.mxu0 %v5837_v0  ;;  %4503 = vmatprep.mubr.msk.f32.mxu1 %vm5839_vm1, %v5837_v0 }
 0xdfb   :  { %5439 = vmatpush1.bf16.msra.mxu0 %v6385_v4  ;;  %5469 = vmatpush3.bf16.msra.mxu1 %v6452_v37 }
 0xdfc   :  { %5441 = vmatprep.subr.bf16.mxu0 %v6389_v49  ;;  %5470 = vmatprep.subr.bf16.mxu1 %v5838_v43 }
 0xdff   :  { %5443 = vmatpush1.bf16.msra.mxu0 %v6391_v53  ;;  %5472 = vmatpush3.bf16.msra.mxu1 %v6459_v40 }
 0xe00   :  { %5445 = vmatprep.subr.bf16.mxu0 %v6395_v62  ;;  %5473 = vmatprep.subr.bf16.mxu1 %v5838_v43 }
 0xe03   :  { %5447 = vmatpush1.bf16.msra.mxu0 %v6397_v14  ;;  %5475 = vmatpush3.bf16.msra.mxu1 %v6466_v45 }
 0xe04   :  { %5449 = vmatprep.subr.bf16.mxu0 %v6401_v46  ;;  %5476 = vmatprep.subr.bf16.mxu1 %v5838_v43 }
 0xe07   :  { %5451 = vmatpush1.bf16.msra.mxu0 %v6403_v55  ;;  %5478 = vmatpush3.bf16.msra.mxu1 %v6472_v52 }
 0xe08   :  { %5453 = vmatprep.subr.bf16.mxu0 %v6407_v11  ;;  %5479 = vmatprep.subr.bf16.mxu1 %v5838_v43 }
 0xe0b   :  { %5455 = vmatpush1.bf16.msra.mxu0 %v6409_v20  ;;  %5481 = vmatpush3.bf16.msra.mxu1 %v6478_v58 }
 0xe0c   :  { %5457 = vmatprep.subr.bf16.mxu0 %v6413_v13  ;;  %5482 = vmatprep.subr.bf16.mxu1 %v5838_v43 }
 0xe0f   :  { %5459 = vmatpush1.bf16.msra.mxu0 %v6415_v18  ;;  %5484 = vmatpush3.bf16.msra.mxu1 %v6484_v8 }
 0xe10   :  { %5461 = vmatprep.subr.bf16.mxu0 %v6420_v19  ;;  %5485 = vmatprep.subr.bf16.mxu1 %v5838_v43 }
 0xe13   :  { %5463 = vmatpush1.bf16.msra.mxu0 %v6422_v34  ;;  %5487 = vmatpush3.bf16.msra.mxu1 %v6490_v36 }
 0xe14   :  { %5489 = vmatprep.subr.bf16.mxu0 %v6377_v15  ;;  %5520 = vmatprep.subr.bf16.mxu1 %v5838_v43 }
 0xec9   :  { %v2998_v51 = vpop.f32.mrb[30].mxu0  ;;  %v3069_v56 = vpop.f32.mrb[34].mxu1 }
 0xeca   :  { %v3074_v60 = vrot.slane %v2998_v51, 6  ;;  %v3000_v1 = vpop.f32.mrb[31].mxu0  ;;  %v4470_v2 = vpop.f32.mrb[35].mxu1  ;;  %v3093_v15 = vadd.f32 %v6528_v38, %v3069_v56  ;;  %v3476_v51 = vld [vmem:[%s6858_s9 + $0x8] sm:$0xff] }
 0xecb   :  { %v3084_v16 = vrot.slane %v3000_v1, 6  ;;  %v3479_v2 = vld [vmem:[%s6858_s9 + $0x20] sm:$0xff] }
 0xecc   :  { %v3076_v12 = vadd.f32 %v3074_v60, %v2929_v6  ;;  %v3095_v17 = vrot.slane %v3093_v15, 6  ;;  %v3477_v60 = vld [vmem:[%s6858_s9 + $0x10] sm:$0xff]  ;;  %v3480_v6 = vld [vmem:[%s6858_s9 + $0x28] sm:$0xff]  ;;  %v3486_v15 = vld [vmem:[%s6858_s9 + $0x58] sm:$0xff] }
 0xecd   :  { %v3086_v33 = vadd.f32 %v3084_v16, %v2930_v23  ;;  %v3482_v16 = vld [vmem:[%s6858_s9 + $0x38] sm:$0xff] }
 0xece   :  { %v3621_v31 = vmul.f32 -1.442695, %v3076_v12  ;;  %v3481_v12 = vld [vmem:[%s6858_s9 + $0x30] sm:$0xff] }
 0xecf   :  { %v3622_v41 = vmul.f32 -1.442695, %v3086_v33  ;;  %v5554_v23 = vpack.c.bf16 %v3482_v16, %v3481_v12  ;;  %v3483_v33 = vld [vmem:[%s6858_s9 + $0x40] sm:$0xff] }
 0xed0   :  { %5707 = vpow2.f32 %v3621_v31  ;;  %v5551_v31 = vpack.c.bf16 %v3480_v6, %v3479_v2 }
 0xeda   :  { %v5708_v30 = vpop.eup %5707 }
 0xedb   :  { %v3080_v27 = vadd.f32 1.0, %v5708_v30  ;;  %v3484_v30 = vld [vmem:[%s6858_s9 + $0x48] sm:$0xff] }
 0xedd   :  { %5709 = vrcp.f32 %v3080_v27  ;;  %v5557_v27 = vpack.c.bf16 %v3484_v30, %v3483_v33 }
 0xede   :  { %5711 = vpow2.f32 %v3622_v41  ;;  %v3485_v41 = vld [vmem:[%s6858_s9 + $0x50] sm:$0xff] }
 0xee7   :  { %v5710_v63 = vpop.eup %5709 }
 0xee8   :  { %v3097_v29 = vmul.f32 %v5710_v63, %v3095_v17  ;;  %v5712_v7 = vpop.eup %5711  ;;  %v5560_v17 = vpack.c.bf16 %v3486_v15, %v3485_v41  ;;  %v3487_v63 = vld [vmem:[%s6858_s9 + $0x60] sm:$0xff] }
 0xee9   :  { %v3090_v10 = vadd.f32 1.0, %v5712_v7  ;;  %v3490_v7 = vld [vmem:[%s6858_s9 + $0x78] sm:$0xff] }
 0xeea   :  { %v3098_v5 = vadd.f32 %v3097_v29, %v2931_v3  ;;  %v3488_v29 = vld [vmem:[%s6858_s9 + $0x68] sm:$0xff] }
 0xeeb   :  { %v5563_v3 = vpack.c.bf16 %v3488_v29, %v3487_v63 }
 0xeec   :  { %5713 = vtanh.f32 %v3098_v5  ;;  %v3489_v5 = vld [vmem:[%s6858_s9 + $0x70] sm:$0xff] }
 0xeed   :  { %5715 = vrcp.f32 %v3090_v10  ;;  %v5566_v10 = vpack.c.bf16 %v3490_v7, %v3489_v5 }
 0xef6   :  { %v5714_v24 = vpop.eup %5713 }
 0xef7   :  { %v3101_v28 = vrot.slane %v5714_v24, 2  ;;  %v5716_v39 = vpop.eup %5715 }
 0xef9   :  { %v3103_v32 = vsub.f32 %v6692_v47, %v3101_v28  ;;  %v3475_v47 = vld [vmem:[%s6858_s9] sm:$0xff] }
 0xefa   :  { %v5545_v56 = vpack.c.bf16 %v3476_v51, %v3475_v47 }
 0xefb   :  { %v3105_v25 = vrot.slane %v3103_v32, 6 }
 0xefd   :  { %v3107_v42 = vmul.f32 %v5716_v39, %v3105_v25 }
 0xeff   :  { %v6733_v44 = vadd.f32 %v5714_v24, %v3107_v42  ;;  %v3292_v42 = vld [vmem:[#allocation2 + $0x18] sm:$0xc0] }
 0xf01   :  { %v3113_v48 = vrot.slane %v6733_v44, 2 }
 0xf03   :  { %3180 = vmatmul.mubr.f32.vlgmr.msra.gmra.mrb[32].mxu0 %v3113_v48  ;;  %4504 = vmatmul.mubr.f32.vlgmr.msra.gmra.mrb[36].mxu1 %v3113_v48 }
 0xf04   :  { %5491 = vmatpush1.bf16.msra.mxu0 %v6379_v22  ;;  %5522 = vmatpush3.bf16.msra.mxu1 %v6448_v21 }
 0xf05   :  { %5493 = vmatprep.subr.bf16.mxu0 %v6383_v35  ;;  %5523 = vmatprep.subr.bf16.mxu1 %v5838_v43 }
 0xf06   :  { %3362 = vmatprep.mubr.f32.mxu0 %v5837_v0  ;;  %4538 = vmatprep.mubr.msk.f32.mxu1 %vm5839_vm1, %v5837_v0 }
 0xf08   :  { %5495 = vmatpush1.bf16.msra.mxu0 %v6385_v4  ;;  %5525 = vmatpush3.bf16.msra.mxu1 %v6452_v37 }
 0xf09   :  { %5497 = vmatprep.subr.bf16.mxu0 %v6389_v49  ;;  %5526 = vmatprep.subr.bf16.mxu1 %v5838_v43 }
 0xf0c   :  { %5499 = vmatpush1.bf16.msra.mxu0 %v6391_v53  ;;  %5528 = vmatpush3.bf16.msra.mxu1 %v6459_v40 }
 0xf0d   :  { %5501 = vmatprep.subr.bf16.mxu0 %v6395_v62  ;;  %5529 = vmatprep.subr.bf16.mxu1 %v5838_v43  ;;  %v3109_v62 = vld [vmem:[#allocation2 + $0x18] sm:$0x30] }
 0xf10   :  { %5503 = vmatpush1.bf16.msra.mxu0 %v6397_v14  ;;  %5531 = vmatpush3.bf16.msra.mxu1 %v6466_v45  ;;  %v3111_v45 = vld [vmem:[#allocation2 + $0x28] sm:$0x30] }
 0xf11   :  { %5505 = vmatprep.subr.bf16.mxu0 %v6401_v46  ;;  %5532 = vmatprep.subr.bf16.mxu1 %v5838_v43 }
 0xf14   :  { %5507 = vmatpush1.bf16.msra.mxu0 %v6403_v55  ;;  %5534 = vmatpush3.bf16.msra.mxu1 %v6472_v52 }
 0xf15   :  { %5509 = vmatprep.subr.bf16.mxu0 %v6407_v11  ;;  %5535 = vmatprep.subr.bf16.mxu1 %v5838_v43  ;;  %v3110_v11 = vld [vmem:[#allocation2 + $0x20] sm:$0x30] }
 0xf18   :  { %5511 = vmatpush1.bf16.msra.mxu0 %v6409_v20  ;;  %5537 = vmatpush3.bf16.msra.mxu1 %v6478_v58 }
 0xf19   :  { %5513 = vmatprep.subr.bf16.mxu0 %v6413_v13  ;;  %5538 = vmatprep.subr.bf16.mxu1 %v5838_v43 }
 0xf1c   :  { %5515 = vmatpush1.bf16.msra.mxu0 %v6415_v18  ;;  %5540 = vmatpush3.bf16.msra.mxu1 %v6484_v8 }
 0xf1d   :  { %5517 = vmatprep.subr.bf16.mxu0 %v6420_v19  ;;  %5541 = vmatprep.subr.bf16.mxu1 %v5838_v43 }
 0xf20   :  { %5519 = vmatpush1.bf16.msra.mxu0 %v6422_v34  ;;  %5543 = vmatpush3.bf16.msra.mxu1 %v6490_v36 }
 0xf21   :  { %5544 = vmatprep.subr.bf16.mxu0 %v5838_v43 }
 0xfd6   :  { %v3181_v22 = vpop.f32.mrb[32].mxu0  ;;  %v3252_v35 = vpop.f32.mrb[36].mxu1 }
 0xfd7   :  { %v3257_v4 = vrot.slane %v3181_v22, 4  ;;  %v3183_v49 = vpop.f32.mrb[33].mxu0  ;;  %v4505_v53 = vpop.f32.mrb[37].mxu1  ;;  %v3276_v34 = vadd.f32 %v6528_v38, %v3252_v35  ;;  %v3293_v35 = vld [vmem:[#allocation2 + $0x20] sm:$0xc0] }
 0xfd8   :  { %v3267_v55 = vrot.slane %v3183_v49, 4 }
 0xfd9   :  { %v3259_v14 = vadd.f32 %v3257_v4, %v3109_v62  ;;  %v3278_v21 = vrot.slane %v3276_v34, 4 }
 0xfda   :  { %v3269_v20 = vadd.f32 %v3267_v55, %v3110_v11  ;;  %v3294_v11 = vld [vmem:[#allocation2 + $0x28] sm:$0xc0] }
 0xfdb   :  { %v3623_v46 = vmul.f32 -1.442695, %v3259_v14 }
 0xfdc   :  { %v3624_v19 = vmul.f32 -1.442695, %v3269_v20 }
 0xfdd   :  { %5717 = vpow2.f32 %v3623_v46 }
 0xfe7   :  { %v5718_v13 = vpop.eup %5717 }
 0xfe8   :  { %v3263_v18 = vadd.f32 1.0, %v5718_v13 }
 0xfea   :  { %5719 = vrcp.f32 %v3263_v18 }
 0xfeb   :  { %5721 = vpow2.f32 %v3624_v19 }
 0xff4   :  { %v5720_v37 = vpop.eup %5719 }
 0xff5   :  { %v3280_v40 = vmul.f32 %v5720_v37, %v3278_v21  ;;  %v5722_v58 = vpop.eup %5721 }
 0xff6   :  { %v3273_v8 = vadd.f32 1.0, %v5722_v58 }
 0xff7   :  { %v3281_v52 = vadd.f32 %v3280_v40, %v3111_v45 }
 0xff9   :  { %5723 = vtanh.f32 %v3281_v52 }
 0xffa   :  { %5725 = vrcp.f32 %v3273_v8 }
0x1003   :  { %v5724_v36 = vpop.eup %5723 }
0x1004   :  { %v3284_v50 = vrot.slane %v5724_v36, 2  ;;  %v5726_v59 = vpop.eup %5725 }
0x1006   :  { %v3286_v54 = vsub.f32 %v6733_v44, %v3284_v50 }
0x1008   :  { %v3288_v57 = vrot.slane %v3286_v54, 6 }
0x100a   :  { %v3290_v61 = vmul.f32 %v5726_v59, %v3288_v57 }
0x100c   :  { %v6772_v9 = vadd.f32 %v5724_v36, %v3290_v61 }
0x100e   :  { %v3296_v26 = vrot.slane %v6772_v9, 4 }
0x1010   :  { %3363 = vmatmul.mubr.f32.vlgmr.msra.gmra.mrb[34].mxu0 %v3296_v26  ;;  %4539 = vmatmul.mubr.f32.vlgmr.msra.gmra.mrb[38].mxu1 %v3296_v26 }
0x1011   :  { %4573 = vmatprep.mubr.msk.f32.mxu0 %vm5839_vm1, %v5837_v0  ;;  %5546 = vmatpush3.bf16.msra.mxu0 %v5545_v56  ;;  %v3478_v0 = vld [vmem:[%s6858_s9 + $0x18] sm:$0xff] }
0x1012   :  { %5547 = vmatprep.subr.bf16.mxu0 %v5838_v43  ;;  %v5548_v1 = vpack.c.bf16 %v3478_v0, %v3477_v60 }
0x1015   :  { %5549 = vmatpush3.bf16.msra.mxu0 %v5548_v1 }
0x1016   :  { %5550 = vmatprep.subr.bf16.mxu0 %v5838_v43 }
0x1019   :  { %5552 = vmatpush3.bf16.msra.mxu0 %v5551_v31 }
0x101a   :  { %5553 = vmatprep.subr.bf16.mxu0 %v5838_v43 }
0x101d   :  { %5555 = vmatpush3.bf16.msra.mxu0 %v5554_v23 }
0x101e   :  { %5556 = vmatprep.subr.bf16.mxu0 %v5838_v43 }
0x1021   :  { %5558 = vmatpush3.bf16.msra.mxu0 %v5557_v27 }
0x1022   :  { %5559 = vmatprep.subr.bf16.mxu0 %v5838_v43 }
0x1025   :  { %5561 = vmatpush3.bf16.msra.mxu0 %v5560_v17 }
0x1026   :  { %5562 = vmatprep.subr.bf16.mxu0 %v5838_v43 }
0x1029   :  { %5564 = vmatpush3.bf16.msra.mxu0 %v5563_v3 }
0x102a   :  { %5565 = vmatprep.subr.bf16.mxu0 %v5838_v43 }
0x102d   :  { %5567 = vmatpush3.bf16.msra.mxu0 %v5566_v10 }
0x10e3   :  { %v3364_v24 = vpop.f32.mrb[34].mxu0  ;;  %v3435_v28 = vpop.f32.mrb[38].mxu1 }
0x10e4   :  { %v3440_v32 = vrot.slane %v3364_v24, 2  ;;  %v3366_v25 = vpop.f32.mrb[35].mxu0  ;;  %v4540_v39 = vpop.f32.mrb[39].mxu1  ;;  %v3459_v43 = vadd.f32 %v6528_v38, %v3435_v28  ;;  %v3627_v38 = vld [vmem:[%s6859_s10] ss:$0 sm:$0xff] }
0x10e5   :  { %v3450_v22 = vrot.slane %v3366_v25, 2 }
0x10e6   :  { %v3442_v44 = vadd.f32 %v3440_v32, %v3292_v42  ;;  %v3461_v14 = vrot.slane %v3459_v43, 2 }
0x10e7   :  { %v3452_v4 = vadd.f32 %v3450_v22, %v3293_v35 }
0x10e8   :  { %v3625_v48 = vmul.f32 -1.442695, %v3442_v44 }
0x10e9   :  { %v3626_v62 = vmul.f32 -1.442695, %v3452_v4 }
0x10ea   :  { %5727 = vpow2.f32 %v3625_v48 }
0x10f4   :  { %v5728_v49 = vpop.eup %5727 }
0x10f5   :  { %v3446_v53 = vadd.f32 1.0, %v5728_v49 }
0x10f7   :  { %5729 = vrcp.f32 %v3446_v53 }
0x10f8   :  { %5731 = vpow2.f32 %v3626_v62 }
0x1101   :  { %v5730_v46 = vpop.eup %5729 }
0x1102   :  { %v3463_v55 = vmul.f32 %v5730_v46, %v3461_v14  ;;  %v5732_v13 = vpop.eup %5731 }
0x1103   :  { %v3456_v18 = vadd.f32 1.0, %v5732_v13 }
0x1104   :  { %v3464_v20 = vadd.f32 %v3463_v55, %v3294_v11 }
0x1106   :  { %5733 = vtanh.f32 %v3464_v20 }
0x1107   :  { %5735 = vrcp.f32 %v3456_v18 }
0x1110   :  { %v5734_v19 = vpop.eup %5733 }
0x1111   :  { %v3467_v34 = vrot.slane %v5734_v19, 2  ;;  %v5736_v40 = vpop.eup %5735 }
0x1113   :  { %v3469_v21 = vsub.f32 %v6772_v9, %v3467_v34 }
0x1115   :  { %v3471_v37 = vrot.slane %v3469_v21, 6 }
0x1117   :  { %v3473_v45 = vmul.f32 %v5736_v40, %v3471_v37 }
0x1119   :  { %v3474_v52 = vadd.f32 %v5734_v19, %v3473_v45 }
0x111b   :  { %v3499_v58 = vrot.slane %v3474_v52, 6 }
0x111d   :  { %4574 = vmatmul.mubr.f32.vlgmr.msra.gmra.mrb[36].mxu0 %v3499_v58 }
0x11f0   :  { %v3567_v8 = vpop.f32.mrb[36].mxu0 }
0x11f1   :  { %v3568_v36 = vadd.f32 %v3627_v38, %v3567_v8  ;;  %v4575_v50 = vpop.f32.mrb[37].mxu0 }
0x11f3   :  { %3572 = vst.msk [vmem:[#allocation10] sm:$0x3] %vm3571_vm2, %v3568_v36 }
0x11f4   :  { %5815 = shalt.err (!%p5812_p0)
}
0x11f5   :  { %s5816_s5 = scalar_lea.hbm %s6860_s11, 32 }
0x11f6   :  { %p5817_p1 = scmp.ne.s32.totalorder %s6860_s11, %s5816_s5  ;;  %p5820_p2 = scmp.lt.u32.totalorder %s5816_s5, %s6860_s11 }
0x11f8   :  { %p5822_p3 = pnand %p5820_p2, %p5817_p1 }
0x11fa   :  { %5825 = shalt.err (!%p5822_p3)
}
0x11fb   :  { %3582 = dma.vmem_to_hbm [thread:$0]  %s3580_s19, 32, %s6860_s11, [#allocation6]  }
0x11fc   :  { %5830 = dma.done.wait [#allocation6], 32  }
0x11fd   :  { %5831 = vsyncadd [#allocation6], 4294967264 }
0x11fe   :  { %3586 = vsyncpa [#allocation5], 1 }
0x11ff   :  { %3587 = vsyncpa [#allocation8], 1 }
0x1200   :  { %3588 = vsyncpa [#allocation6], 1 }

</bundles_post_ra>
